<compile_context>
chip_gen: v6e
topology: v6e:2x2x1
jax: 0.10.0
libtpu: 0.0.40
codegen_flags: <defaults>
</compile_context>

<pallas_src>
import functools
import math

import jax
import jax.numpy as jnp
from jax import lax
from jax.experimental import pallas as pl
from jax.experimental.pallas import tpu as pltpu


def _triple(v):
    return (v, v, v) if isinstance(v, int) else tuple(v)


def _round_up(a, b):
    return (a + b - 1) // b * b


# --------------------------------------------------------------------------- #
# Pallas kernel 1: construct the trilinearly-interpolated (dilated) kernel.
#   w_ref, p*_ref : (MB, Kt)   with M = O * I rows (tiled), Kt = K1*K2*K3
#   k_ref         : (MB, DKt)  with DKt = dks1*dks2*dks3 (flat, row-major (t1,t2,t3))
# --------------------------------------------------------------------------- #
def _construct3d_body(w_ref, p1_ref, p2_ref, p3_ref, k_ref, *, kshape, dks):
    K1, K2, K3 = kshape
    d1, d2, d3 = dks
    DKt = d1 * d2 * d3
    mb = w_ref.shape[0]

    w = w_ref[...].astype(jnp.float32)

    def prep(pref, dk):
        hb = dk // 2
        ht = hb - (dk + 1) % 2
        p = jnp.clip(pref[...].astype(jnp.float32), -float(hb), float(ht)) + float(hb)
        pf = jnp.floor(p)
        return pf.astype(jnp.int32), p - pf

    f1, r1 = prep(p1_ref, d1)
    f2, r2 = prep(p2_ref, d2)
    f3, r3 = prep(p3_ref, d3)

    col = lax.broadcasted_iota(jnp.int32, (mb, DKt), 1)
    acc = jnp.zeros((mb, DKt), jnp.float32)
    # Static, small unrolled loop over taps and the 8 trilinear corners.
    # Out-of-range corners (pf+1 == dks) always carry an exactly-zero weight (r == 0 at
    # the clamp boundary), so the flat-index comparison scatter is exact.
    for kidx in range(K1 * K2 * K3):
        wl = w[:, kidx:kidx + 1]
        a1, b1 = f1[:, kidx:kidx + 1], r1[:, kidx:kidx + 1]
        a2, b2 = f2[:, kidx:kidx + 1], r2[:, kidx:kidx + 1]
        a3, b3 = f3[:, kidx:kidx + 1], r3[:, kidx:kidx + 1]
        for c1 in (0, 1):
            w1 = b1 if c1 else (1.0 - b1)
            i1 = a1 + c1
            for c2 in (0, 1):
                w2 = b2 if c2 else (1.0 - b2)
                i2 = a2 + c2
                for c3 in (0, 1):
                    w3 = b3 if c3 else (1.0 - b3)
                    i3 = a3 + c3
                    tgt = (i1 * d2 + i2) * d3 + i3
                    acc = acc + jnp.where(col == tgt, wl * w1 * w2 * w3, 0.0)
    k_ref[...] = acc.astype(k_ref.dtype)


def construct_kernel_3d(weight, P1, P2, P3, dilation):
    """weight, P1..3: (O, I, K1, K2, K3) -> constructed kernel (O, I, d1, d2, d3)."""
    O, I, K1, K2, K3 = weight.shape
    d1, d2, d3 = dilation[0] * K1, dilation[1] * K2, dilation[2] * K3
    Kt = K1 * K2 * K3
    DKt = d1 * d2 * d3
    M = O * I

    # Tile the row axis (review: do not keep the whole (M, .) block resident for big M).
    MB = 256 if M > 256 else _round_up(M, 8)
    M_pad = _round_up(M, MB)

    def flat(a):
        a2 = a.reshape(M, Kt).astype(jnp.float32)
        return jnp.pad(a2, ((0, M_pad - M), (0, 0)))

    w2, p1, p2, p3 = flat(weight), flat(P1), flat(P2), flat(P3)

    out = pl.pallas_call(
        functools.partial(_construct3d_body, kshape=(K1, K2, K3), dks=(d1, d2, d3)),
        out_shape=jax.ShapeDtypeStruct((M_pad, DKt), jnp.float32),
        grid=(M_pad // MB,),
        in_specs=[pl.BlockSpec((MB, Kt), lambda i: (i, 0)),
                  pl.BlockSpec((MB, Kt), lambda i: (i, 0)),
                  pl.BlockSpec((MB, Kt), lambda i: (i, 0)),
                  pl.BlockSpec((MB, Kt), lambda i: (i, 0))],
        out_specs=pl.BlockSpec((MB, DKt), lambda i: (i, 0)),
        compiler_params=pltpu.CompilerParams(dimension_semantics=("parallel",)),
    )(w2, p1, p2, p3)
    return out[:M].reshape(O, I, d1, d2, d3)


# --------------------------------------------------------------------------- #
# Pallas kernel 2: 3-D cross-correlation as ONE MXU matmul per (batch, group).
#   x_ref    : (1, 1, C_in_g, L_pad)        padded input, spatial flattened, bf16
#   w_ref    : (1, C_out_g, CKp)            constructed kernel, (tap, ci)-major, bf16
#   b_ref    : (1, C_out_g, 1)              bias, f32
#   o_ref    : (1, 1, C_out_g, L_out)       flat stride-1 correlation, f32
#   xcol_ref : (CKp, L_out)                 im2col slab scratch (VMEM), bf16
# --------------------------------------------------------------------------- #
def _conv3d_kernel_body(x_ref, w_ref, b_ref, o_ref, xcol_ref, *,
                        tap_offsets, l_out, c_in_g, c_pad):
    if c_pad != c_in_g:
        # Padding rows pair with zero weight columns; zero them so stale VMEM (possibly
        # NaN bit patterns) can never leak through 0 * garbage.
        xcol_ref[...] = jnp.zeros(xcol_ref.shape, xcol_ref.dtype)

    # Build the im2col slab once: each tap is a contiguous lane-shifted slice of the
    # flattened padded input, stored at a sublane-tile-aligned row offset.
    for t, off in enumerate(tap_offsets):
        r0 = t * c_pad
        xcol_ref[r0:r0 + c_in_g, :] = x_ref[0, 0, :, off:off + l_out]

    # Single big matmul: contraction = n_taps * c_pad, bf16 operands, f32 accumulate.
    acc = jnp.dot(w_ref[0], xcol_ref[...], preferred_element_type=jnp.float32)
    acc = acc + b_ref[0].astype(jnp.float32)
    o_ref[0, 0] = acc.astype(o_ref.dtype)


def dcls3d_forward(x, weight, bias, P, *, stride=1, padding=0, dilation=1, groups=1):
    """Dcls3d forward.  x: (N, C_in, D, H, W) -> (N, C_out, D_out, H_out, W_out)."""
    stride = _triple(stride)
    padding = _triple(padding)
    dilation = _triple(dilation)

    N, C_in, D, H, W = x.shape
    O, I, K1, K2, K3 = weight.shape
    assert C_in % groups == 0 and O % groups == 0 and C_in // groups == I

    d1, d2, d3 = dilation[0] * K1, dilation[1] * K2, dilation[2] * K3
    pads = tuple(padding[i] + dilation[i] // 2 for i in range(3))   # Dcls3d.__init__

    G = groups
    C_in_g = I
    C_out_g = O // G

    # --- construct the interpolated kernel (Pallas) ---
    Kc = construct_kernel_3d(weight, P[0], P[1], P[2], dilation)    # (O, I, d1, d2, d3) f32

    # --- geometry of the flattened padded volume ---
    D_pad, H_pad, W_pad = D + 2 * pads[0], H + 2 * pads[1], W + 2 * pads[2]
    Df, Hf, Wf = D_pad - d1 + 1, H_pad - d2 + 1, W_pad - d3 + 1      # stride-1 output extents
    assert Df > 0 and Hf > 0 and Wf > 0, "dilated kernel larger than padded input"
    L_pad = D_pad * H_pad * W_pad
    max_off = (d1 - 1) * H_pad * W_pad + (d2 - 1) * W_pad + (d3 - 1)
    L_out = L_pad - max_off

    dks_tot = d1 * d2 * d3
    c_pad = _round_up(C_in_g, 16)             # bf16 sublane-tile-aligned row stride per tap
    CKp = dks_tot * c_pad

    # Weight matrix (G, C_out_g, CKp) in (tap, ci)-major order, zero-padded channels, bf16.
    wm = jnp.transpose(Kc, (0, 2, 3, 4, 1)).reshape(O, dks_tot, C_in_g)
    wm = jnp.pad(wm, ((0, 0), (0, 0), (0, c_pad - C_in_g)))
    wm = wm.reshape(G, C_out_g, CKp).astype(jnp.bfloat16)

    b = bias.reshape(G, C_out_g, 1).astype(jnp.float32)

    # Pad input in bf16 (no f32 up-cast copy) and flatten the spatial volume.
    xb = x.astype(jnp.bfloat16).reshape(N, G, C_in_g, D, H, W)
    xb = jnp.pad(xb, ((0, 0), (0, 0), (0, 0),
                      (pads[0], pads[0]), (pads[1], pads[1]), (pads[2], pads[2])))
    xb = xb.reshape(N, G, C_in_g, L_pad)

    tap_offsets = tuple((t1 * H_pad + t2) * W_pad + t3
                        for t1 in range(d1) for t2 in range(d2) for t3 in range(d3))

    raw = pl.pallas_call(
        functools.partial(_conv3d_kernel_body, tap_offsets=tap_offsets,
                          l_out=L_out, c_in_g=C_in_g, c_pad=c_pad),
        out_shape=jax.ShapeDtypeStruct((N, G, C_out_g, L_out), jnp.float32),
        grid=(N, G),
        in_specs=[pl.BlockSpec((1, 1, C_in_g, L_pad), lambda n, g: (n, g, 0, 0)),
                  pl.BlockSpec((1, C_out_g, CKp), lambda n, g: (g, 0, 0)),
                  pl.BlockSpec((1, C_out_g, 1), lambda n, g: (g, 0, 0))],
        out_specs=pl.BlockSpec((1, 1, C_out_g, L_out), lambda n, g: (n, g, 0, 0)),
        scratch_shapes=[pltpu.VMEM((CKp, L_out), jnp.bfloat16)],
        compiler_params=pltpu.CompilerParams(
            dimension_semantics=("parallel", "parallel")),
    )(xb, wm, b)

    # Un-flatten: keep only the valid (non wrap-around) columns of the flat correlation.
    pad_tail = Df * H_pad * W_pad - L_out
    raw = jnp.pad(raw, ((0, 0), (0, 0), (0, 0), (0, pad_tail)))
    out = raw.reshape(N, G, C_out_g, Df, H_pad, W_pad)[:, :, :, :, :Hf, :Wf]
    out = out.reshape(N, O, Df, Hf, Wf)

    if any(s != 1 for s in stride):
        out = out[:, :, ::stride[0], ::stride[1], ::stride[2]]
    return out


# --------------------------------------------------------------------------- #
# Pure-JAX reference (same semantics), used only for a correctness check.
# --------------------------------------------------------------------------- #
def dcls3d_reference(x, weight, bias, P, *, stride, padding, dilation, groups):
    stride = _triple(stride)
    padding = _triple(padding)
    dilation = _triple(dilation)
    O, I, K1, K2, K3 = weight.shape
    d1, d2, d3 = dilation[0] * K1, dilation[1] * K2, dilation[2] * K3

    def prep(Pax, dk):
        hb = dk // 2
        ht = hb - (dk + 1) % 2
        p = jnp.clip(Pax, -hb, ht) + hb
        pf = jnp.floor(p)
        return pf, p - pf

    pf1, r1 = prep(P[0], d1)
    pf2, r2 = prep(P[1], d2)
    pf3, r3 = prep(P[2], d3)

    iz = jnp.arange(d1).reshape(d1, 1, 1)
    iy = jnp.arange(d2).reshape(1, d2, 1)
    ix = jnp.arange(d3).reshape(1, 1, d3)
    Kc = jnp.zeros((O, I, d1, d2, d3), jnp.float32)
    for c1 in (0, 1):
        for c2 in (0, 1):
            for c3 in (0, 1):
                wc = (weight * (r1 if c1 else 1.0 - r1)
                      * (r2 if c2 else 1.0 - r2) * (r3 if c3 else 1.0 - r3))
                m = ((iz == (pf1 + c1)[..., None, None, None])
                     & (iy == (pf2 + c2)[..., None, None, None])
                     & (ix == (pf3 + c3)[..., None, None, None]))
                Kc = Kc + jnp.sum(jnp.where(m, wc[..., None, None, None], 0.0),
                                  axis=(2, 3, 4))

    pads = [(padding[i] + dilation[i] // 2,) * 2 for i in range(3)]
    out = lax.conv_general_dilated(
        x, Kc, window_strides=stride, padding=pads,
        dimension_numbers=('NCDHW', 'OIDHW', 'NCDHW'),
        feature_group_count=groups)
    return out + bias[None, :, None, None, None]


if __name__ == "__main__":
    # Small, module-consistent shapes.
    N, C_in, C_out = 2, 4, 8
    D = H = W = 6
    K = (2, 2, 2)
    stride, padding, dilation, groups = 1, 1, (2, 2, 2), 2

    key = jax.random.PRNGKey(0)
    k1, k2, k3, k4, k5 = jax.random.split(key, 5)

    I = C_in // groups
    fan_in = I * K[0] * K[1] * K[2]
    bound = 1.0 / math.sqrt(fan_in)                 # kaiming_uniform_(a=sqrt(5)) bound
    weight = jax.random.uniform(k1, (C_out, I) + K, jnp.float32, -bound, bound)
    bias = jax.random.uniform(k2, (C_out,), jnp.float32, -bound, bound)
    std = dilation[0] / 2.0 / math.sqrt(C_out * I * K[0] * K[1])
    P = std * jax.random.normal(k3, (3, C_out, I) + K, jnp.float32)
    # spread positions so the interpolation/scatter path is actually exercised
    P = P + jax.random.uniform(k4, P.shape, jnp.float32,
                               -float(max(dilation)), float(max(dilation)))

    x = jax.random.normal(k5, (N, C_in, D, H, W), jnp.float32)

    out = dcls3d_forward(x, weight, bias, P, stride=stride, padding=padding,
                         dilation=dilation, groups=groups)
    out = jax.block_until_ready(out)

    ref = dcls3d_reference(x, weight, bias, P, stride=stride, padding=padding,
                           dilation=dilation, groups=groups)

    assert out.shape == ref.shape, (out.shape, ref.shape)
    max_err = float(jnp.max(jnp.abs(out - ref)))
    assert jnp.allclose(out, ref, atol=5e-2, rtol=5e-2), max_err
    print("KERNEL_OK")
</pallas_src>

<mosaic_0001>
module attributes {stable_mosaic.version = 11 : i64} {
  func.func @_construct3d_body(%arg0: i32, %arg1: memref<16x8xf32, #tpu.memory_space<vmem>>, %arg2: memref<16x8xf32, #tpu.memory_space<vmem>>, %arg3: memref<16x8xf32, #tpu.memory_space<vmem>>, %arg4: memref<16x8xf32, #tpu.memory_space<vmem>>, %arg5: memref<16x64xf32, #tpu.memory_space<vmem>>) attributes {dimension_semantics = [#tpu.dimension_semantics<parallel>], iteration_bounds = array<i64: 1>, scalar_prefetch = 0 : i64, scratch_operands = 0 : i64, tpu.core_type = #tpu.core_type<tc>, window_params = [{transform_indices = @transform_0, window_bounds = array<i64: 16, 8>}, {transform_indices = @transform_1, window_bounds = array<i64: 16, 8>}, {transform_indices = @transform_2, window_bounds = array<i64: 16, 8>}, {transform_indices = @transform_3, window_bounds = array<i64: 16, 8>}, {transform_indices = @transform_4, window_bounds = array<i64: 16, 64>}]} {
    %c0 = arith.constant 0 : index
    %c0_0 = arith.constant 0 : index
    %0 = vector.load %arg1[%c0, %c0_0] : memref<16x8xf32, #tpu.memory_space<vmem>>, vector<16x8xf32>
    %c0_1 = arith.constant 0 : index
    %c0_2 = arith.constant 0 : index
    %1 = vector.load %arg2[%c0_1, %c0_2] : memref<16x8xf32, #tpu.memory_space<vmem>>, vector<16x8xf32>
    %cst = arith.constant -2.000000e+00 : f32
    %cst_3 = arith.constant 1.000000e+00 : f32
    %2 = vector.broadcast %cst : f32 to vector<16x8xf32>
    %3 = arith.maximumf %2, %1 : vector<16x8xf32>
    %4 = vector.broadcast %cst_3 : f32 to vector<16x8xf32>
    %5 = arith.minimumf %4, %3 : vector<16x8xf32>
    %cst_4 = arith.constant 2.000000e+00 : f32
    %6 = vector.broadcast %cst_4 : f32 to vector<16x8xf32>
    %7 = arith.addf %5, %6 : vector<16x8xf32>
    %8 = math.floor %7 : vector<16x8xf32>
    %9 = arith.fptosi %8 : vector<16x8xf32> to vector<16x8xi32>
    %10 = arith.subf %7, %8 : vector<16x8xf32>
    %c0_5 = arith.constant 0 : index
    %c0_6 = arith.constant 0 : index
    %11 = vector.load %arg3[%c0_5, %c0_6] : memref<16x8xf32, #tpu.memory_space<vmem>>, vector<16x8xf32>
    %cst_7 = arith.constant -2.000000e+00 : f32
    %cst_8 = arith.constant 1.000000e+00 : f32
    %12 = vector.broadcast %cst_7 : f32 to vector<16x8xf32>
    %13 = arith.maximumf %12, %11 : vector<16x8xf32>
    %14 = vector.broadcast %cst_8 : f32 to vector<16x8xf32>
    %15 = arith.minimumf %14, %13 : vector<16x8xf32>
    %cst_9 = arith.constant 2.000000e+00 : f32
    %16 = vector.broadcast %cst_9 : f32 to vector<16x8xf32>
    %17 = arith.addf %15, %16 : vector<16x8xf32>
    %18 = math.floor %17 : vector<16x8xf32>
    %19 = arith.fptosi %18 : vector<16x8xf32> to vector<16x8xi32>
    %20 = arith.subf %17, %18 : vector<16x8xf32>
    %c0_10 = arith.constant 0 : index
    %c0_11 = arith.constant 0 : index
    %21 = vector.load %arg4[%c0_10, %c0_11] : memref<16x8xf32, #tpu.memory_space<vmem>>, vector<16x8xf32>
    %cst_12 = arith.constant -2.000000e+00 : f32
    %cst_13 = arith.constant 1.000000e+00 : f32
    %22 = vector.broadcast %cst_12 : f32 to vector<16x8xf32>
    %23 = arith.maximumf %22, %21 : vector<16x8xf32>
    %24 = vector.broadcast %cst_13 : f32 to vector<16x8xf32>
    %25 = arith.minimumf %24, %23 : vector<16x8xf32>
    %cst_14 = arith.constant 2.000000e+00 : f32
    %26 = vector.broadcast %cst_14 : f32 to vector<16x8xf32>
    %27 = arith.addf %25, %26 : vector<16x8xf32>
    %28 = math.floor %27 : vector<16x8xf32>
    %29 = arith.fptosi %28 : vector<16x8xf32> to vector<16x8xi32>
    %30 = arith.subf %27, %28 : vector<16x8xf32>
    %31 = tpu.iota {dimensions = array<i32: 1>} : vector<16x64xi32>
    %cst_15 = arith.constant 0.000000e+00 : f32
    %32 = vector.broadcast %cst_15 : f32 to vector<16x64xf32>
    %33 = vector.extract_strided_slice %0 {offsets = [0, 0], sizes = [16, 1], strides = [1, 1]} : vector<16x8xf32> to vector<16x1xf32>
    %34 = vector.extract_strided_slice %9 {offsets = [0, 0], sizes = [16, 1], strides = [1, 1]} : vector<16x8xi32> to vector<16x1xi32>
    %35 = vector.extract_strided_slice %10 {offsets = [0, 0], sizes = [16, 1], strides = [1, 1]} : vector<16x8xf32> to vector<16x1xf32>
    %36 = vector.extract_strided_slice %19 {offsets = [0, 0], sizes = [16, 1], strides = [1, 1]} : vector<16x8xi32> to vector<16x1xi32>
    %37 = vector.extract_strided_slice %20 {offsets = [0, 0], sizes = [16, 1], strides = [1, 1]} : vector<16x8xf32> to vector<16x1xf32>
    %38 = vector.extract_strided_slice %29 {offsets = [0, 0], sizes = [16, 1], strides = [1, 1]} : vector<16x8xi32> to vector<16x1xi32>
    %39 = vector.extract_strided_slice %30 {offsets = [0, 0], sizes = [16, 1], strides = [1, 1]} : vector<16x8xf32> to vector<16x1xf32>
    %cst_16 = arith.constant 1.000000e+00 : f32
    %40 = vector.broadcast %cst_16 : f32 to vector<16x1xf32>
    %41 = arith.subf %40, %35 : vector<16x1xf32>
    %c0_i32 = arith.constant 0 : i32
    %42 = vector.broadcast %c0_i32 : i32 to vector<16x1xi32>
    %43 = arith.addi %34, %42 : vector<16x1xi32>
    %cst_17 = arith.constant 1.000000e+00 : f32
    %44 = vector.broadcast %cst_17 : f32 to vector<16x1xf32>
    %45 = arith.subf %44, %37 : vector<16x1xf32>
    %c0_i32_18 = arith.constant 0 : i32
    %46 = vector.broadcast %c0_i32_18 : i32 to vector<16x1xi32>
    %47 = arith.addi %36, %46 : vector<16x1xi32>
    %cst_19 = arith.constant 1.000000e+00 : f32
    %48 = vector.broadcast %cst_19 : f32 to vector<16x1xf32>
    %49 = arith.subf %48, %39 : vector<16x1xf32>
    %c0_i32_20 = arith.constant 0 : i32
    %50 = vector.broadcast %c0_i32_20 : i32 to vector<16x1xi32>
    %51 = arith.addi %38, %50 : vector<16x1xi32>
    %c4_i32 = arith.constant 4 : i32
    %52 = vector.broadcast %c4_i32 : i32 to vector<16x1xi32>
    %53 = arith.muli %43, %52 : vector<16x1xi32>
    %54 = arith.addi %53, %47 : vector<16x1xi32>
    %c4_i32_21 = arith.constant 4 : i32
    %55 = vector.broadcast %c4_i32_21 : i32 to vector<16x1xi32>
    %56 = arith.muli %54, %55 : vector<16x1xi32>
    %57 = arith.addi %56, %51 : vector<16x1xi32>
    %58 = vector.broadcast %57 : vector<16x1xi32> to vector<16x64xi32>
    %59 = arith.cmpi eq, %31, %58 : vector<16x64xi32>
    %60 = arith.mulf %33, %41 : vector<16x1xf32>
    %61 = arith.mulf %60, %45 : vector<16x1xf32>
    %62 = arith.mulf %61, %49 : vector<16x1xf32>
    %cst_22 = arith.constant 0.000000e+00 : f32
    %63 = vector.shape_cast %62 : vector<16x1xf32> to vector<16x1xf32>
    %64 = vector.broadcast %63 : vector<16x1xf32> to vector<16x64xf32>
    %65 = vector.broadcast %cst_22 : f32 to vector<16x64xf32>
    %66 = arith.select %59, %64, %65 : vector<16x64xi1>, vector<16x64xf32>
    %67 = arith.addf %32, %66 : vector<16x64xf32>
    %c1_i32 = arith.constant 1 : i32
    %68 = vector.broadcast %c1_i32 : i32 to vector<16x1xi32>
    %69 = arith.addi %38, %68 : vector<16x1xi32>
    %c4_i32_23 = arith.constant 4 : i32
    %70 = vector.broadcast %c4_i32_23 : i32 to vector<16x1xi32>
    %71 = arith.muli %43, %70 : vector<16x1xi32>
    %72 = arith.addi %71, %47 : vector<16x1xi32>
    %c4_i32_24 = arith.constant 4 : i32
    %73 = vector.broadcast %c4_i32_24 : i32 to vector<16x1xi32>
    %74 = arith.muli %72, %73 : vector<16x1xi32>
    %75 = arith.addi %74, %69 : vector<16x1xi32>
    %76 = vector.broadcast %75 : vector<16x1xi32> to vector<16x64xi32>
    %77 = arith.cmpi eq, %31, %76 : vector<16x64xi32>
    %78 = arith.mulf %33, %41 : vector<16x1xf32>
    %79 = arith.mulf %78, %45 : vector<16x1xf32>
    %80 = arith.mulf %79, %39 : vector<16x1xf32>
    %cst_25 = arith.constant 0.000000e+00 : f32
    %81 = vector.shape_cast %80 : vector<16x1xf32> to vector<16x1xf32>
    %82 = vector.broadcast %81 : vector<16x1xf32> to vector<16x64xf32>
    %83 = vector.broadcast %cst_25 : f32 to vector<16x64xf32>
    %84 = arith.select %77, %82, %83 : vector<16x64xi1>, vector<16x64xf32>
    %85 = arith.addf %67, %84 : vector<16x64xf32>
    %c1_i32_26 = arith.constant 1 : i32
    %86 = vector.broadcast %c1_i32_26 : i32 to vector<16x1xi32>
    %87 = arith.addi %36, %86 : vector<16x1xi32>
    %cst_27 = arith.constant 1.000000e+00 : f32
    %88 = vector.broadcast %cst_27 : f32 to vector<16x1xf32>
    %89 = arith.subf %88, %39 : vector<16x1xf32>
    %c0_i32_28 = arith.constant 0 : i32
    %90 = vector.broadcast %c0_i32_28 : i32 to vector<16x1xi32>
    %91 = arith.addi %38, %90 : vector<16x1xi32>
    %c4_i32_29 = arith.constant 4 : i32
    %92 = vector.broadcast %c4_i32_29 : i32 to vector<16x1xi32>
    %93 = arith.muli %43, %92 : vector<16x1xi32>
    %94 = arith.addi %93, %87 : vector<16x1xi32>
    %c4_i32_30 = arith.constant 4 : i32
    %95 = vector.broadcast %c4_i32_30 : i32 to vector<16x1xi32>
    %96 = arith.muli %94, %95 : vector<16x1xi32>
    %97 = arith.addi %96, %91 : vector<16x1xi32>
    %98 = vector.broadcast %97 : vector<16x1xi32> to vector<16x64xi32>
    %99 = arith.cmpi eq, %31, %98 : vector<16x64xi32>
    %100 = arith.mulf %33, %41 : vector<16x1xf32>
    %101 = arith.mulf %100, %37 : vector<16x1xf32>
    %102 = arith.mulf %101, %89 : vector<16x1xf32>
    %cst_31 = arith.constant 0.000000e+00 : f32
    %103 = vector.shape_cast %102 : vector<16x1xf32> to vector<16x1xf32>
    %104 = vector.broadcast %103 : vector<16x1xf32> to vector<16x64xf32>
    %105 = vector.broadcast %cst_31 : f32 to vector<16x64xf32>
    %106 = arith.select %99, %104, %105 : vector<16x64xi1>, vector<16x64xf32>
    %107 = arith.addf %85, %106 : vector<16x64xf32>
    %c1_i32_32 = arith.constant 1 : i32
    %108 = vector.broadcast %c1_i32_32 : i32 to vector<16x1xi32>
    %109 = arith.addi %38, %108 : vector<16x1xi32>
    %c4_i32_33 = arith.constant 4 : i32
    %110 = vector.broadcast %c4_i32_33 : i32 to vector<16x1xi32>
    %111 = arith.muli %43, %110 : vector<16x1xi32>
    %112 = arith.addi %111, %87 : vector<16x1xi32>
    %c4_i32_34 = arith.constant 4 : i32
    %113 = vector.broadcast %c4_i32_34 : i32 to vector<16x1xi32>
    %114 = arith.muli %112, %113 : vector<16x1xi32>
    %115 = arith.addi %114, %109 : vector<16x1xi32>
    %116 = vector.broadcast %115 : vector<16x1xi32> to vector<16x64xi32>
    %117 = arith.cmpi eq, %31, %116 : vector<16x64xi32>
    %118 = arith.mulf %33, %41 : vector<16x1xf32>
    %119 = arith.mulf %118, %37 : vector<16x1xf32>
    %120 = arith.mulf %119, %39 : vector<16x1xf32>
    %cst_35 = arith.constant 0.000000e+00 : f32
    %121 = vector.shape_cast %120 : vector<16x1xf32> to vector<16x1xf32>
    %122 = vector.broadcast %121 : vector<16x1xf32> to vector<16x64xf32>
    %123 = vector.broadcast %cst_35 : f32 to vector<16x64xf32>
    %124 = arith.select %117, %122, %123 : vector<16x64xi1>, vector<16x64xf32>
    %125 = arith.addf %107, %124 : vector<16x64xf32>
    %c1_i32_36 = arith.constant 1 : i32
    %126 = vector.broadcast %c1_i32_36 : i32 to vector<16x1xi32>
    %127 = arith.addi %34, %126 : vector<16x1xi32>
    %cst_37 = arith.constant 1.000000e+00 : f32
    %128 = vector.broadcast %cst_37 : f32 to vector<16x1xf32>
    %129 = arith.subf %128, %37 : vector<16x1xf32>
    %c0_i32_38 = arith.constant 0 : i32
    %130 = vector.broadcast %c0_i32_38 : i32 to vector<16x1xi32>
    %131 = arith.addi %36, %130 : vector<16x1xi32>
    %cst_39 = arith.constant 1.000000e+00 : f32
    %132 = vector.broadcast %cst_39 : f32 to vector<16x1xf32>
    %133 = arith.subf %132, %39 : vector<16x1xf32>
    %c0_i32_40 = arith.constant 0 : i32
    %134 = vector.broadcast %c0_i32_40 : i32 to vector<16x1xi32>
    %135 = arith.addi %38, %134 : vector<16x1xi32>
    %c4_i32_41 = arith.constant 4 : i32
    %136 = vector.broadcast %c4_i32_41 : i32 to vector<16x1xi32>
    %137 = arith.muli %127, %136 : vector<16x1xi32>
    %138 = arith.addi %137, %131 : vector<16x1xi32>
    %c4_i32_42 = arith.constant 4 : i32
    %139 = vector.broadcast %c4_i32_42 : i32 to vector<16x1xi32>
    %140 = arith.muli %138, %139 : vector<16x1xi32>
    %141 = arith.addi %140, %135 : vector<16x1xi32>
    %142 = vector.broadcast %141 : vector<16x1xi32> to vector<16x64xi32>
    %143 = arith.cmpi eq, %31, %142 : vector<16x64xi32>
    %144 = arith.mulf %33, %35 : vector<16x1xf32>
    %145 = arith.mulf %144, %129 : vector<16x1xf32>
    %146 = arith.mulf %145, %133 : vector<16x1xf32>
    %cst_43 = arith.constant 0.000000e+00 : f32
    %147 = vector.shape_cast %146 : vector<16x1xf32> to vector<16x1xf32>
    %148 = vector.broadcast %147 : vector<16x1xf32> to vector<16x64xf32>
    %149 = vector.broadcast %cst_43 : f32 to vector<16x64xf32>
    %150 = arith.select %143, %148, %149 : vector<16x64xi1>, vector<16x64xf32>
    %151 = arith.addf %125, %150 : vector<16x64xf32>
    %c1_i32_44 = arith.constant 1 : i32
    %152 = vector.broadcast %c1_i32_44 : i32 to vector<16x1xi32>
    %153 = arith.addi %38, %152 : vector<16x1xi32>
    %c4_i32_45 = arith.constant 4 : i32
    %154 = vector.broadcast %c4_i32_45 : i32 to vector<16x1xi32>
    %155 = arith.muli %127, %154 : vector<16x1xi32>
    %156 = arith.addi %155, %131 : vector<16x1xi32>
    %c4_i32_46 = arith.constant 4 : i32
    %157 = vector.broadcast %c4_i32_46 : i32 to vector<16x1xi32>
    %158 = arith.muli %156, %157 : vector<16x1xi32>
    %159 = arith.addi %158, %153 : vector<16x1xi32>
    %160 = vector.broadcast %159 : vector<16x1xi32> to vector<16x64xi32>
    %161 = arith.cmpi eq, %31, %160 : vector<16x64xi32>
    %162 = arith.mulf %33, %35 : vector<16x1xf32>
    %163 = arith.mulf %162, %129 : vector<16x1xf32>
    %164 = arith.mulf %163, %39 : vector<16x1xf32>
    %cst_47 = arith.constant 0.000000e+00 : f32
    %165 = vector.shape_cast %164 : vector<16x1xf32> to vector<16x1xf32>
    %166 = vector.broadcast %165 : vector<16x1xf32> to vector<16x64xf32>
    %167 = vector.broadcast %cst_47 : f32 to vector<16x64xf32>
    %168 = arith.select %161, %166, %167 : vector<16x64xi1>, vector<16x64xf32>
    %169 = arith.addf %151, %168 : vector<16x64xf32>
    %c1_i32_48 = arith.constant 1 : i32
    %170 = vector.broadcast %c1_i32_48 : i32 to vector<16x1xi32>
    %171 = arith.addi %36, %170 : vector<16x1xi32>
    %cst_49 = arith.constant 1.000000e+00 : f32
    %172 = vector.broadcast %cst_49 : f32 to vector<16x1xf32>
    %173 = arith.subf %172, %39 : vector<16x1xf32>
    %c0_i32_50 = arith.constant 0 : i32
    %174 = vector.broadcast %c0_i32_50 : i32 to vector<16x1xi32>
    %175 = arith.addi %38, %174 : vector<16x1xi32>
    %c4_i32_51 = arith.constant 4 : i32
    %176 = vector.broadcast %c4_i32_51 : i32 to vector<16x1xi32>
    %177 = arith.muli %127, %176 : vector<16x1xi32>
    %178 = arith.addi %177, %171 : vector<16x1xi32>
    %c4_i32_52 = arith.constant 4 : i32
    %179 = vector.broadcast %c4_i32_52 : i32 to vector<16x1xi32>
    %180 = arith.muli %178, %179 : vector<16x1xi32>
    %181 = arith.addi %180, %175 : vector<16x1xi32>
    %182 = vector.broadcast %181 : vector<16x1xi32> to vector<16x64xi32>
    %183 = arith.cmpi eq, %31, %182 : vector<16x64xi32>
    %184 = arith.mulf %33, %35 : vector<16x1xf32>
    %185 = arith.mulf %184, %37 : vector<16x1xf32>
    %186 = arith.mulf %185, %173 : vector<16x1xf32>
    %cst_53 = arith.constant 0.000000e+00 : f32
    %187 = vector.shape_cast %186 : vector<16x1xf32> to vector<16x1xf32>
    %188 = vector.broadcast %187 : vector<16x1xf32> to vector<16x64xf32>
    %189 = vector.broadcast %cst_53 : f32 to vector<16x64xf32>
    %190 = arith.select %183, %188, %189 : vector<16x64xi1>, vector<16x64xf32>
    %191 = arith.addf %169, %190 : vector<16x64xf32>
    %c1_i32_54 = arith.constant 1 : i32
    %192 = vector.broadcast %c1_i32_54 : i32 to vector<16x1xi32>
    %193 = arith.addi %38, %192 : vector<16x1xi32>
    %c4_i32_55 = arith.constant 4 : i32
    %194 = vector.broadcast %c4_i32_55 : i32 to vector<16x1xi32>
    %195 = arith.muli %127, %194 : vector<16x1xi32>
    %196 = arith.addi %195, %171 : vector<16x1xi32>
    %c4_i32_56 = arith.constant 4 : i32
    %197 = vector.broadcast %c4_i32_56 : i32 to vector<16x1xi32>
    %198 = arith.muli %196, %197 : vector<16x1xi32>
    %199 = arith.addi %198, %193 : vector<16x1xi32>
    %200 = vector.broadcast %199 : vector<16x1xi32> to vector<16x64xi32>
    %201 = arith.cmpi eq, %31, %200 : vector<16x64xi32>
    %202 = arith.mulf %33, %35 : vector<16x1xf32>
    %203 = arith.mulf %202, %37 : vector<16x1xf32>
    %204 = arith.mulf %203, %39 : vector<16x1xf32>
    %cst_57 = arith.constant 0.000000e+00 : f32
    %205 = vector.shape_cast %204 : vector<16x1xf32> to vector<16x1xf32>
    %206 = vector.broadcast %205 : vector<16x1xf32> to vector<16x64xf32>
    %207 = vector.broadcast %cst_57 : f32 to vector<16x64xf32>
    %208 = arith.select %201, %206, %207 : vector<16x64xi1>, vector<16x64xf32>
    %209 = arith.addf %191, %208 : vector<16x64xf32>
    %210 = vector.extract_strided_slice %0 {offsets = [0, 1], sizes = [16, 1], strides = [1, 1]} : vector<16x8xf32> to vector<16x1xf32>
    %211 = vector.extract_strided_slice %9 {offsets = [0, 1], sizes = [16, 1], strides = [1, 1]} : vector<16x8xi32> to vector<16x1xi32>
    %212 = vector.extract_strided_slice %10 {offsets = [0, 1], sizes = [16, 1], strides = [1, 1]} : vector<16x8xf32> to vector<16x1xf32>
    %213 = vector.extract_strided_slice %19 {offsets = [0, 1], sizes = [16, 1], strides = [1, 1]} : vector<16x8xi32> to vector<16x1xi32>
    %214 = vector.extract_strided_slice %20 {offsets = [0, 1], sizes = [16, 1], strides = [1, 1]} : vector<16x8xf32> to vector<16x1xf32>
    %215 = vector.extract_strided_slice %29 {offsets = [0, 1], sizes = [16, 1], strides = [1, 1]} : vector<16x8xi32> to vector<16x1xi32>
    %216 = vector.extract_strided_slice %30 {offsets = [0, 1], sizes = [16, 1], strides = [1, 1]} : vector<16x8xf32> to vector<16x1xf32>
    %cst_58 = arith.constant 1.000000e+00 : f32
    %217 = vector.broadcast %cst_58 : f32 to vector<16x1xf32>
    %218 = arith.subf %217, %212 : vector<16x1xf32>
    %c0_i32_59 = arith.constant 0 : i32
    %219 = vector.broadcast %c0_i32_59 : i32 to vector<16x1xi32>
    %220 = arith.addi %211, %219 : vector<16x1xi32>
    %cst_60 = arith.constant 1.000000e+00 : f32
    %221 = vector.broadcast %cst_60 : f32 to vector<16x1xf32>
    %222 = arith.subf %221, %214 : vector<16x1xf32>
    %c0_i32_61 = arith.constant 0 : i32
    %223 = vector.broadcast %c0_i32_61 : i32 to vector<16x1xi32>
    %224 = arith.addi %213, %223 : vector<16x1xi32>
    %cst_62 = arith.constant 1.000000e+00 : f32
    %225 = vector.broadcast %cst_62 : f32 to vector<16x1xf32>
    %226 = arith.subf %225, %216 : vector<16x1xf32>
    %c0_i32_63 = arith.constant 0 : i32
    %227 = vector.broadcast %c0_i32_63 : i32 to vector<16x1xi32>
    %228 = arith.addi %215, %227 : vector<16x1xi32>
    %c4_i32_64 = arith.constant 4 : i32
    %229 = vector.broadcast %c4_i32_64 : i32 to vector<16x1xi32>
    %230 = arith.muli %220, %229 : vector<16x1xi32>
    %231 = arith.addi %230, %224 : vector<16x1xi32>
    %c4_i32_65 = arith.constant 4 : i32
    %232 = vector.broadcast %c4_i32_65 : i32 to vector<16x1xi32>
    %233 = arith.muli %231, %232 : vector<16x1xi32>
    %234 = arith.addi %233, %228 : vector<16x1xi32>
    %235 = vector.broadcast %234 : vector<16x1xi32> to vector<16x64xi32>
    %236 = arith.cmpi eq, %31, %235 : vector<16x64xi32>
    %237 = arith.mulf %210, %218 : vector<16x1xf32>
    %238 = arith.mulf %237, %222 : vector<16x1xf32>
    %239 = arith.mulf %238, %226 : vector<16x1xf32>
    %cst_66 = arith.constant 0.000000e+00 : f32
    %240 = vector.shape_cast %239 : vector<16x1xf32> to vector<16x1xf32>
    %241 = vector.broadcast %240 : vector<16x1xf32> to vector<16x64xf32>
    %242 = vector.broadcast %cst_66 : f32 to vector<16x64xf32>
    %243 = arith.select %236, %241, %242 : vector<16x64xi1>, vector<16x64xf32>
    %244 = arith.addf %209, %243 : vector<16x64xf32>
    %c1_i32_67 = arith.constant 1 : i32
    %245 = vector.broadcast %c1_i32_67 : i32 to vector<16x1xi32>
    %246 = arith.addi %215, %245 : vector<16x1xi32>
    %c4_i32_68 = arith.constant 4 : i32
    %247 = vector.broadcast %c4_i32_68 : i32 to vector<16x1xi32>
    %248 = arith.muli %220, %247 : vector<16x1xi32>
    %249 = arith.addi %248, %224 : vector<16x1xi32>
    %c4_i32_69 = arith.constant 4 : i32
    %250 = vector.broadcast %c4_i32_69 : i32 to vector<16x1xi32>
    %251 = arith.muli %249, %250 : vector<16x1xi32>
    %252 = arith.addi %251, %246 : vector<16x1xi32>
    %253 = vector.broadcast %252 : vector<16x1xi32> to vector<16x64xi32>
    %254 = arith.cmpi eq, %31, %253 : vector<16x64xi32>
    %255 = arith.mulf %210, %218 : vector<16x1xf32>
    %256 = arith.mulf %255, %222 : vector<16x1xf32>
    %257 = arith.mulf %256, %216 : vector<16x1xf32>
    %cst_70 = arith.constant 0.000000e+00 : f32
    %258 = vector.shape_cast %257 : vector<16x1xf32> to vector<16x1xf32>
    %259 = vector.broadcast %258 : vector<16x1xf32> to vector<16x64xf32>
    %260 = vector.broadcast %cst_70 : f32 to vector<16x64xf32>
    %261 = arith.select %254, %259, %260 : vector<16x64xi1>, vector<16x64xf32>
    %262 = arith.addf %244, %261 : vector<16x64xf32>
    %c1_i32_71 = arith.constant 1 : i32
    %263 = vector.broadcast %c1_i32_71 : i32 to vector<16x1xi32>
    %264 = arith.addi %213, %263 : vector<16x1xi32>
    %cst_72 = arith.constant 1.000000e+00 : f32
    %265 = vector.broadcast %cst_72 : f32 to vector<16x1xf32>
    %266 = arith.subf %265, %216 : vector<16x1xf32>
    %c0_i32_73 = arith.constant 0 : i32
    %267 = vector.broadcast %c0_i32_73 : i32 to vector<16x1xi32>
    %268 = arith.addi %215, %267 : vector<16x1xi32>
    %c4_i32_74 = arith.constant 4 : i32
    %269 = vector.broadcast %c4_i32_74 : i32 to vector<16x1xi32>
    %270 = arith.muli %220, %269 : vector<16x1xi32>
    %271 = arith.addi %270, %264 : vector<16x1xi32>
    %c4_i32_75 = arith.constant 4 : i32
    %272 = vector.broadcast %c4_i32_75 : i32 to vector<16x1xi32>
    %273 = arith.muli %271, %272 : vector<16x1xi32>
    %274 = arith.addi %273, %268 : vector<16x1xi32>
    %275 = vector.broadcast %274 : vector<16x1xi32> to vector<16x64xi32>
    %276 = arith.cmpi eq, %31, %275 : vector<16x64xi32>
    %277 = arith.mulf %210, %218 : vector<16x1xf32>
    %278 = arith.mulf %277, %214 : vector<16x1xf32>
    %279 = arith.mulf %278, %266 : vector<16x1xf32>
    %cst_76 = arith.constant 0.000000e+00 : f32
    %280 = vector.shape_cast %279 : vector<16x1xf32> to vector<16x1xf32>
    %281 = vector.broadcast %280 : vector<16x1xf32> to vector<16x64xf32>
    %282 = vector.broadcast %cst_76 : f32 to vector<16x64xf32>
    %283 = arith.select %276, %281, %282 : vector<16x64xi1>, vector<16x64xf32>
    %284 = arith.addf %262, %283 : vector<16x64xf32>
    %c1_i32_77 = arith.constant 1 : i32
    %285 = vector.broadcast %c1_i32_77 : i32 to vector<16x1xi32>
    %286 = arith.addi %215, %285 : vector<16x1xi32>
    %c4_i32_78 = arith.constant 4 : i32
    %287 = vector.broadcast %c4_i32_78 : i32 to vector<16x1xi32>
    %288 = arith.muli %220, %287 : vector<16x1xi32>
    %289 = arith.addi %288, %264 : vector<16x1xi32>
    %c4_i32_79 = arith.constant 4 : i32
    %290 = vector.broadcast %c4_i32_79 : i32 to vector<16x1xi32>
    %291 = arith.muli %289, %290 : vector<16x1xi32>
    %292 = arith.addi %291, %286 : vector<16x1xi32>
    %293 = vector.broadcast %292 : vector<16x1xi32> to vector<16x64xi32>
    %294 = arith.cmpi eq, %31, %293 : vector<16x64xi32>
    %295 = arith.mulf %210, %218 : vector<16x1xf32>
    %296 = arith.mulf %295, %214 : vector<16x1xf32>
    %297 = arith.mulf %296, %216 : vector<16x1xf32>
    %cst_80 = arith.constant 0.000000e+00 : f32
    %298 = vector.shape_cast %297 : vector<16x1xf32> to vector<16x1xf32>
    %299 = vector.broadcast %298 : vector<16x1xf32> to vector<16x64xf32>
    %300 = vector.broadcast %cst_80 : f32 to vector<16x64xf32>
    %301 = arith.select %294, %299, %300 : vector<16x64xi1>, vector<16x64xf32>
    %302 = arith.addf %284, %301 : vector<16x64xf32>
    %c1_i32_81 = arith.constant 1 : i32
    %303 = vector.broadcast %c1_i32_81 : i32 to vector<16x1xi32>
    %304 = arith.addi %211, %303 : vector<16x1xi32>
    %cst_82 = arith.constant 1.000000e+00 : f32
    %305 = vector.broadcast %cst_82 : f32 to vector<16x1xf32>
    %306 = arith.subf %305, %214 : vector<16x1xf32>
    %c0_i32_83 = arith.constant 0 : i32
    %307 = vector.broadcast %c0_i32_83 : i32 to vector<16x1xi32>
    %308 = arith.addi %213, %307 : vector<16x1xi32>
    %cst_84 = arith.constant 1.000000e+00 : f32
    %309 = vector.broadcast %cst_84 : f32 to vector<16x1xf32>
    %310 = arith.subf %309, %216 : vector<16x1xf32>
    %c0_i32_85 = arith.constant 0 : i32
    %311 = vector.broadcast %c0_i32_85 : i32 to vector<16x1xi32>
    %312 = arith.addi %215, %311 : vector<16x1xi32>
    %c4_i32_86 = arith.constant 4 : i32
    %313 = vector.broadcast %c4_i32_86 : i32 to vector<16x1xi32>
    %314 = arith.muli %304, %313 : vector<16x1xi32>
    %315 = arith.addi %314, %308 : vector<16x1xi32>
    %c4_i32_87 = arith.constant 4 : i32
    %316 = vector.broadcast %c4_i32_87 : i32 to vector<16x1xi32>
    %317 = arith.muli %315, %316 : vector<16x1xi32>
    %318 = arith.addi %317, %312 : vector<16x1xi32>
    %319 = vector.broadcast %318 : vector<16x1xi32> to vector<16x64xi32>
    %320 = arith.cmpi eq, %31, %319 : vector<16x64xi32>
    %321 = arith.mulf %210, %212 : vector<16x1xf32>
    %322 = arith.mulf %321, %306 : vector<16x1xf32>
    %323 = arith.mulf %322, %310 : vector<16x1xf32>
    %cst_88 = arith.constant 0.000000e+00 : f32
    %324 = vector.shape_cast %323 : vector<16x1xf32> to vector<16x1xf32>
    %325 = vector.broadcast %324 : vector<16x1xf32> to vector<16x64xf32>
    %326 = vector.broadcast %cst_88 : f32 to vector<16x64xf32>
    %327 = arith.select %320, %325, %326 : vector<16x64xi1>, vector<16x64xf32>
    %328 = arith.addf %302, %327 : vector<16x64xf32>
    %c1_i32_89 = arith.constant 1 : i32
    %329 = vector.broadcast %c1_i32_89 : i32 to vector<16x1xi32>
    %330 = arith.addi %215, %329 : vector<16x1xi32>
    %c4_i32_90 = arith.constant 4 : i32
    %331 = vector.broadcast %c4_i32_90 : i32 to vector<16x1xi32>
    %332 = arith.muli %304, %331 : vector<16x1xi32>
    %333 = arith.addi %332, %308 : vector<16x1xi32>
    %c4_i32_91 = arith.constant 4 : i32
    %334 = vector.broadcast %c4_i32_91 : i32 to vector<16x1xi32>
    %335 = arith.muli %333, %334 : vector<16x1xi32>
    %336 = arith.addi %335, %330 : vector<16x1xi32>
    %337 = vector.broadcast %336 : vector<16x1xi32> to vector<16x64xi32>
    %338 = arith.cmpi eq, %31, %337 : vector<16x64xi32>
    %339 = arith.mulf %210, %212 : vector<16x1xf32>
    %340 = arith.mulf %339, %306 : vector<16x1xf32>
    %341 = arith.mulf %340, %216 : vector<16x1xf32>
    %cst_92 = arith.constant 0.000000e+00 : f32
    %342 = vector.shape_cast %341 : vector<16x1xf32> to vector<16x1xf32>
    %343 = vector.broadcast %342 : vector<16x1xf32> to vector<16x64xf32>
    %344 = vector.broadcast %cst_92 : f32 to vector<16x64xf32>
    %345 = arith.select %338, %343, %344 : vector<16x64xi1>, vector<16x64xf32>
    %346 = arith.addf %328, %345 : vector<16x64xf32>
    %c1_i32_93 = arith.constant 1 : i32
    %347 = vector.broadcast %c1_i32_93 : i32 to vector<16x1xi32>
    %348 = arith.addi %213, %347 : vector<16x1xi32>
    %cst_94 = arith.constant 1.000000e+00 : f32
    %349 = vector.broadcast %cst_94 : f32 to vector<16x1xf32>
    %350 = arith.subf %349, %216 : vector<16x1xf32>
    %c0_i32_95 = arith.constant 0 : i32
    %351 = vector.broadcast %c0_i32_95 : i32 to vector<16x1xi32>
    %352 = arith.addi %215, %351 : vector<16x1xi32>
    %c4_i32_96 = arith.constant 4 : i32
    %353 = vector.broadcast %c4_i32_96 : i32 to vector<16x1xi32>
    %354 = arith.muli %304, %353 : vector<16x1xi32>
    %355 = arith.addi %354, %348 : vector<16x1xi32>
    %c4_i32_97 = arith.constant 4 : i32
    %356 = vector.broadcast %c4_i32_97 : i32 to vector<16x1xi32>
    %357 = arith.muli %355, %356 : vector<16x1xi32>
    %358 = arith.addi %357, %352 : vector<16x1xi32>
    %359 = vector.broadcast %358 : vector<16x1xi32> to vector<16x64xi32>
    %360 = arith.cmpi eq, %31, %359 : vector<16x64xi32>
    %361 = arith.mulf %210, %212 : vector<16x1xf32>
    %362 = arith.mulf %361, %214 : vector<16x1xf32>
    %363 = arith.mulf %362, %350 : vector<16x1xf32>
    %cst_98 = arith.constant 0.000000e+00 : f32
    %364 = vector.shape_cast %363 : vector<16x1xf32> to vector<16x1xf32>
    %365 = vector.broadcast %364 : vector<16x1xf32> to vector<16x64xf32>
    %366 = vector.broadcast %cst_98 : f32 to vector<16x64xf32>
    %367 = arith.select %360, %365, %366 : vector<16x64xi1>, vector<16x64xf32>
    %368 = arith.addf %346, %367 : vector<16x64xf32>
    %c1_i32_99 = arith.constant 1 : i32
    %369 = vector.broadcast %c1_i32_99 : i32 to vector<16x1xi32>
    %370 = arith.addi %215, %369 : vector<16x1xi32>
    %c4_i32_100 = arith.constant 4 : i32
    %371 = vector.broadcast %c4_i32_100 : i32 to vector<16x1xi32>
    %372 = arith.muli %304, %371 : vector<16x1xi32>
    %373 = arith.addi %372, %348 : vector<16x1xi32>
    %c4_i32_101 = arith.constant 4 : i32
    %374 = vector.broadcast %c4_i32_101 : i32 to vector<16x1xi32>
    %375 = arith.muli %373, %374 : vector<16x1xi32>
    %376 = arith.addi %375, %370 : vector<16x1xi32>
    %377 = vector.broadcast %376 : vector<16x1xi32> to vector<16x64xi32>
    %378 = arith.cmpi eq, %31, %377 : vector<16x64xi32>
    %379 = arith.mulf %210, %212 : vector<16x1xf32>
    %380 = arith.mulf %379, %214 : vector<16x1xf32>
    %381 = arith.mulf %380, %216 : vector<16x1xf32>
    %cst_102 = arith.constant 0.000000e+00 : f32
    %382 = vector.shape_cast %381 : vector<16x1xf32> to vector<16x1xf32>
    %383 = vector.broadcast %382 : vector<16x1xf32> to vector<16x64xf32>
    %384 = vector.broadcast %cst_102 : f32 to vector<16x64xf32>
    %385 = arith.select %378, %383, %384 : vector<16x64xi1>, vector<16x64xf32>
    %386 = arith.addf %368, %385 : vector<16x64xf32>
    %387 = vector.extract_strided_slice %0 {offsets = [0, 2], sizes = [16, 1], strides = [1, 1]} : vector<16x8xf32> to vector<16x1xf32>
    %388 = vector.extract_strided_slice %9 {offsets = [0, 2], sizes = [16, 1], strides = [1, 1]} : vector<16x8xi32> to vector<16x1xi32>
    %389 = vector.extract_strided_slice %10 {offsets = [0, 2], sizes = [16, 1], strides = [1, 1]} : vector<16x8xf32> to vector<16x1xf32>
    %390 = vector.extract_strided_slice %19 {offsets = [0, 2], sizes = [16, 1], strides = [1, 1]} : vector<16x8xi32> to vector<16x1xi32>
    %391 = vector.extract_strided_slice %20 {offsets = [0, 2], sizes = [16, 1], strides = [1, 1]} : vector<16x8xf32> to vector<16x1xf32>
    %392 = vector.extract_strided_slice %29 {offsets = [0, 2], sizes = [16, 1], strides = [1, 1]} : vector<16x8xi32> to vector<16x1xi32>
    %393 = vector.extract_strided_slice %30 {offsets = [0, 2], sizes = [16, 1], strides = [1, 1]} : vector<16x8xf32> to vector<16x1xf32>
    %cst_103 = arith.constant 1.000000e+00 : f32
    %394 = vector.broadcast %cst_103 : f32 to vector<16x1xf32>
    %395 = arith.subf %394, %389 : vector<16x1xf32>
    %c0_i32_104 = arith.constant 0 : i32
    %396 = vector.broadcast %c0_i32_104 : i32 to vector<16x1xi32>
    %397 = arith.addi %388, %396 : vector<16x1xi32>
    %cst_105 = arith.constant 1.000000e+00 : f32
    %398 = vector.broadcast %cst_105 : f32 to vector<16x1xf32>
    %399 = arith.subf %398, %391 : vector<16x1xf32>
    %c0_i32_106 = arith.constant 0 : i32
    %400 = vector.broadcast %c0_i32_106 : i32 to vector<16x1xi32>
    %401 = arith.addi %390, %400 : vector<16x1xi32>
    %cst_107 = arith.constant 1.000000e+00 : f32
    %402 = vector.broadcast %cst_107 : f32 to vector<16x1xf32>
    %403 = arith.subf %402, %393 : vector<16x1xf32>
    %c0_i32_108 = arith.constant 0 : i32
    %404 = vector.broadcast %c0_i32_108 : i32 to vector<16x1xi32>
    %405 = arith.addi %392, %404 : vector<16x1xi32>
    %c4_i32_109 = arith.constant 4 : i32
    %406 = vector.broadcast %c4_i32_109 : i32 to vector<16x1xi32>
    %407 = arith.muli %397, %406 : vector<16x1xi32>
    %408 = arith.addi %407, %401 : vector<16x1xi32>
    %c4_i32_110 = arith.constant 4 : i32
    %409 = vector.broadcast %c4_i32_110 : i32 to vector<16x1xi32>
    %410 = arith.muli %408, %409 : vector<16x1xi32>
    %411 = arith.addi %410, %405 : vector<16x1xi32>
    %412 = vector.broadcast %411 : vector<16x1xi32> to vector<16x64xi32>
    %413 = arith.cmpi eq, %31, %412 : vector<16x64xi32>
    %414 = arith.mulf %387, %395 : vector<16x1xf32>
    %415 = arith.mulf %414, %399 : vector<16x1xf32>
    %416 = arith.mulf %415, %403 : vector<16x1xf32>
    %cst_111 = arith.constant 0.000000e+00 : f32
    %417 = vector.shape_cast %416 : vector<16x1xf32> to vector<16x1xf32>
    %418 = vector.broadcast %417 : vector<16x1xf32> to vector<16x64xf32>
    %419 = vector.broadcast %cst_111 : f32 to vector<16x64xf32>
    %420 = arith.select %413, %418, %419 : vector<16x64xi1>, vector<16x64xf32>
    %421 = arith.addf %386, %420 : vector<16x64xf32>
    %c1_i32_112 = arith.constant 1 : i32
    %422 = vector.broadcast %c1_i32_112 : i32 to vector<16x1xi32>
    %423 = arith.addi %392, %422 : vector<16x1xi32>
    %c4_i32_113 = arith.constant 4 : i32
    %424 = vector.broadcast %c4_i32_113 : i32 to vector<16x1xi32>
    %425 = arith.muli %397, %424 : vector<16x1xi32>
    %426 = arith.addi %425, %401 : vector<16x1xi32>
    %c4_i32_114 = arith.constant 4 : i32
    %427 = vector.broadcast %c4_i32_114 : i32 to vector<16x1xi32>
    %428 = arith.muli %426, %427 : vector<16x1xi32>
    %429 = arith.addi %428, %423 : vector<16x1xi32>
    %430 = vector.broadcast %429 : vector<16x1xi32> to vector<16x64xi32>
    %431 = arith.cmpi eq, %31, %430 : vector<16x64xi32>
    %432 = arith.mulf %387, %395 : vector<16x1xf32>
    %433 = arith.mulf %432, %399 : vector<16x1xf32>
    %434 = arith.mulf %433, %393 : vector<16x1xf32>
    %cst_115 = arith.constant 0.000000e+00 : f32
    %435 = vector.shape_cast %434 : vector<16x1xf32> to vector<16x1xf32>
    %436 = vector.broadcast %435 : vector<16x1xf32> to vector<16x64xf32>
    %437 = vector.broadcast %cst_115 : f32 to vector<16x64xf32>
    %438 = arith.select %431, %436, %437 : vector<16x64xi1>, vector<16x64xf32>
    %439 = arith.addf %421, %438 : vector<16x64xf32>
    %c1_i32_116 = arith.constant 1 : i32
    %440 = vector.broadcast %c1_i32_116 : i32 to vector<16x1xi32>
    %441 = arith.addi %390, %440 : vector<16x1xi32>
    %cst_117 = arith.constant 1.000000e+00 : f32
    %442 = vector.broadcast %cst_117 : f32 to vector<16x1xf32>
    %443 = arith.subf %442, %393 : vector<16x1xf32>
    %c0_i32_118 = arith.constant 0 : i32
    %444 = vector.broadcast %c0_i32_118 : i32 to vector<16x1xi32>
    %445 = arith.addi %392, %444 : vector<16x1xi32>
    %c4_i32_119 = arith.constant 4 : i32
    %446 = vector.broadcast %c4_i32_119 : i32 to vector<16x1xi32>
    %447 = arith.muli %397, %446 : vector<16x1xi32>
    %448 = arith.addi %447, %441 : vector<16x1xi32>
    %c4_i32_120 = arith.constant 4 : i32
    %449 = vector.broadcast %c4_i32_120 : i32 to vector<16x1xi32>
    %450 = arith.muli %448, %449 : vector<16x1xi32>
    %451 = arith.addi %450, %445 : vector<16x1xi32>
    %452 = vector.broadcast %451 : vector<16x1xi32> to vector<16x64xi32>
    %453 = arith.cmpi eq, %31, %452 : vector<16x64xi32>
    %454 = arith.mulf %387, %395 : vector<16x1xf32>
    %455 = arith.mulf %454, %391 : vector<16x1xf32>
    %456 = arith.mulf %455, %443 : vector<16x1xf32>
    %cst_121 = arith.constant 0.000000e+00 : f32
    %457 = vector.shape_cast %456 : vector<16x1xf32> to vector<16x1xf32>
    %458 = vector.broadcast %457 : vector<16x1xf32> to vector<16x64xf32>
    %459 = vector.broadcast %cst_121 : f32 to vector<16x64xf32>
    %460 = arith.select %453, %458, %459 : vector<16x64xi1>, vector<16x64xf32>
    %461 = arith.addf %439, %460 : vector<16x64xf32>
    %c1_i32_122 = arith.constant 1 : i32
    %462 = vector.broadcast %c1_i32_122 : i32 to vector<16x1xi32>
    %463 = arith.addi %392, %462 : vector<16x1xi32>
    %c4_i32_123 = arith.constant 4 : i32
    %464 = vector.broadcast %c4_i32_123 : i32 to vector<16x1xi32>
    %465 = arith.muli %397, %464 : vector<16x1xi32>
    %466 = arith.addi %465, %441 : vector<16x1xi32>
    %c4_i32_124 = arith.constant 4 : i32
    %467 = vector.broadcast %c4_i32_124 : i32 to vector<16x1xi32>
    %468 = arith.muli %466, %467 : vector<16x1xi32>
    %469 = arith.addi %468, %463 : vector<16x1xi32>
    %470 = vector.broadcast %469 : vector<16x1xi32> to vector<16x64xi32>
    %471 = arith.cmpi eq, %31, %470 : vector<16x64xi32>
    %472 = arith.mulf %387, %395 : vector<16x1xf32>
    %473 = arith.mulf %472, %391 : vector<16x1xf32>
    %474 = arith.mulf %473, %393 : vector<16x1xf32>
    %cst_125 = arith.constant 0.000000e+00 : f32
    %475 = vector.shape_cast %474 : vector<16x1xf32> to vector<16x1xf32>
    %476 = vector.broadcast %475 : vector<16x1xf32> to vector<16x64xf32>
    %477 = vector.broadcast %cst_125 : f32 to vector<16x64xf32>
    %478 = arith.select %471, %476, %477 : vector<16x64xi1>, vector<16x64xf32>
    %479 = arith.addf %461, %478 : vector<16x64xf32>
    %c1_i32_126 = arith.constant 1 : i32
    %480 = vector.broadcast %c1_i32_126 : i32 to vector<16x1xi32>
    %481 = arith.addi %388, %480 : vector<16x1xi32>
    %cst_127 = arith.constant 1.000000e+00 : f32
    %482 = vector.broadcast %cst_127 : f32 to vector<16x1xf32>
    %483 = arith.subf %482, %391 : vector<16x1xf32>
    %c0_i32_128 = arith.constant 0 : i32
    %484 = vector.broadcast %c0_i32_128 : i32 to vector<16x1xi32>
    %485 = arith.addi %390, %484 : vector<16x1xi32>
    %cst_129 = arith.constant 1.000000e+00 : f32
    %486 = vector.broadcast %cst_129 : f32 to vector<16x1xf32>
    %487 = arith.subf %486, %393 : vector<16x1xf32>
    %c0_i32_130 = arith.constant 0 : i32
    %488 = vector.broadcast %c0_i32_130 : i32 to vector<16x1xi32>
    %489 = arith.addi %392, %488 : vector<16x1xi32>
    %c4_i32_131 = arith.constant 4 : i32
    %490 = vector.broadcast %c4_i32_131 : i32 to vector<16x1xi32>
    %491 = arith.muli %481, %490 : vector<16x1xi32>
    %492 = arith.addi %491, %485 : vector<16x1xi32>
    %c4_i32_132 = arith.constant 4 : i32
    %493 = vector.broadcast %c4_i32_132 : i32 to vector<16x1xi32>
    %494 = arith.muli %492, %493 : vector<16x1xi32>
    %495 = arith.addi %494, %489 : vector<16x1xi32>
    %496 = vector.broadcast %495 : vector<16x1xi32> to vector<16x64xi32>
    %497 = arith.cmpi eq, %31, %496 : vector<16x64xi32>
    %498 = arith.mulf %387, %389 : vector<16x1xf32>
    %499 = arith.mulf %498, %483 : vector<16x1xf32>
    %500 = arith.mulf %499, %487 : vector<16x1xf32>
    %cst_133 = arith.constant 0.000000e+00 : f32
    %501 = vector.shape_cast %500 : vector<16x1xf32> to vector<16x1xf32>
    %502 = vector.broadcast %501 : vector<16x1xf32> to vector<16x64xf32>
    %503 = vector.broadcast %cst_133 : f32 to vector<16x64xf32>
    %504 = arith.select %497, %502, %503 : vector<16x64xi1>, vector<16x64xf32>
    %505 = arith.addf %479, %504 : vector<16x64xf32>
    %c1_i32_134 = arith.constant 1 : i32
    %506 = vector.broadcast %c1_i32_134 : i32 to vector<16x1xi32>
    %507 = arith.addi %392, %506 : vector<16x1xi32>
    %c4_i32_135 = arith.constant 4 : i32
    %508 = vector.broadcast %c4_i32_135 : i32 to vector<16x1xi32>
    %509 = arith.muli %481, %508 : vector<16x1xi32>
    %510 = arith.addi %509, %485 : vector<16x1xi32>
    %c4_i32_136 = arith.constant 4 : i32
    %511 = vector.broadcast %c4_i32_136 : i32 to vector<16x1xi32>
    %512 = arith.muli %510, %511 : vector<16x1xi32>
    %513 = arith.addi %512, %507 : vector<16x1xi32>
    %514 = vector.broadcast %513 : vector<16x1xi32> to vector<16x64xi32>
    %515 = arith.cmpi eq, %31, %514 : vector<16x64xi32>
    %516 = arith.mulf %387, %389 : vector<16x1xf32>
    %517 = arith.mulf %516, %483 : vector<16x1xf32>
    %518 = arith.mulf %517, %393 : vector<16x1xf32>
    %cst_137 = arith.constant 0.000000e+00 : f32
    %519 = vector.shape_cast %518 : vector<16x1xf32> to vector<16x1xf32>
    %520 = vector.broadcast %519 : vector<16x1xf32> to vector<16x64xf32>
    %521 = vector.broadcast %cst_137 : f32 to vector<16x64xf32>
    %522 = arith.select %515, %520, %521 : vector<16x64xi1>, vector<16x64xf32>
    %523 = arith.addf %505, %522 : vector<16x64xf32>
    %c1_i32_138 = arith.constant 1 : i32
    %524 = vector.broadcast %c1_i32_138 : i32 to vector<16x1xi32>
    %525 = arith.addi %390, %524 : vector<16x1xi32>
    %cst_139 = arith.constant 1.000000e+00 : f32
    %526 = vector.broadcast %cst_139 : f32 to vector<16x1xf32>
    %527 = arith.subf %526, %393 : vector<16x1xf32>
    %c0_i32_140 = arith.constant 0 : i32
    %528 = vector.broadcast %c0_i32_140 : i32 to vector<16x1xi32>
    %529 = arith.addi %392, %528 : vector<16x1xi32>
    %c4_i32_141 = arith.constant 4 : i32
    %530 = vector.broadcast %c4_i32_141 : i32 to vector<16x1xi32>
    %531 = arith.muli %481, %530 : vector<16x1xi32>
    %532 = arith.addi %531, %525 : vector<16x1xi32>
    %c4_i32_142 = arith.constant 4 : i32
    %533 = vector.broadcast %c4_i32_142 : i32 to vector<16x1xi32>
    %534 = arith.muli %532, %533 : vector<16x1xi32>
    %535 = arith.addi %534, %529 : vector<16x1xi32>
    %536 = vector.broadcast %535 : vector<16x1xi32> to vector<16x64xi32>
    %537 = arith.cmpi eq, %31, %536 : vector<16x64xi32>
    %538 = arith.mulf %387, %389 : vector<16x1xf32>
    %539 = arith.mulf %538, %391 : vector<16x1xf32>
    %540 = arith.mulf %539, %527 : vector<16x1xf32>
    %cst_143 = arith.constant 0.000000e+00 : f32
    %541 = vector.shape_cast %540 : vector<16x1xf32> to vector<16x1xf32>
    %542 = vector.broadcast %541 : vector<16x1xf32> to vector<16x64xf32>
    %543 = vector.broadcast %cst_143 : f32 to vector<16x64xf32>
    %544 = arith.select %537, %542, %543 : vector<16x64xi1>, vector<16x64xf32>
    %545 = arith.addf %523, %544 : vector<16x64xf32>
    %c1_i32_144 = arith.constant 1 : i32
    %546 = vector.broadcast %c1_i32_144 : i32 to vector<16x1xi32>
    %547 = arith.addi %392, %546 : vector<16x1xi32>
    %c4_i32_145 = arith.constant 4 : i32
    %548 = vector.broadcast %c4_i32_145 : i32 to vector<16x1xi32>
    %549 = arith.muli %481, %548 : vector<16x1xi32>
    %550 = arith.addi %549, %525 : vector<16x1xi32>
    %c4_i32_146 = arith.constant 4 : i32
    %551 = vector.broadcast %c4_i32_146 : i32 to vector<16x1xi32>
    %552 = arith.muli %550, %551 : vector<16x1xi32>
    %553 = arith.addi %552, %547 : vector<16x1xi32>
    %554 = vector.broadcast %553 : vector<16x1xi32> to vector<16x64xi32>
    %555 = arith.cmpi eq, %31, %554 : vector<16x64xi32>
    %556 = arith.mulf %387, %389 : vector<16x1xf32>
    %557 = arith.mulf %556, %391 : vector<16x1xf32>
    %558 = arith.mulf %557, %393 : vector<16x1xf32>
    %cst_147 = arith.constant 0.000000e+00 : f32
    %559 = vector.shape_cast %558 : vector<16x1xf32> to vector<16x1xf32>
    %560 = vector.broadcast %559 : vector<16x1xf32> to vector<16x64xf32>
    %561 = vector.broadcast %cst_147 : f32 to vector<16x64xf32>
    %562 = arith.select %555, %560, %561 : vector<16x64xi1>, vector<16x64xf32>
    %563 = arith.addf %545, %562 : vector<16x64xf32>
    %564 = vector.extract_strided_slice %0 {offsets = [0, 3], sizes = [16, 1], strides = [1, 1]} : vector<16x8xf32> to vector<16x1xf32>
    %565 = vector.extract_strided_slice %9 {offsets = [0, 3], sizes = [16, 1], strides = [1, 1]} : vector<16x8xi32> to vector<16x1xi32>
    %566 = vector.extract_strided_slice %10 {offsets = [0, 3], sizes = [16, 1], strides = [1, 1]} : vector<16x8xf32> to vector<16x1xf32>
    %567 = vector.extract_strided_slice %19 {offsets = [0, 3], sizes = [16, 1], strides = [1, 1]} : vector<16x8xi32> to vector<16x1xi32>
    %568 = vector.extract_strided_slice %20 {offsets = [0, 3], sizes = [16, 1], strides = [1, 1]} : vector<16x8xf32> to vector<16x1xf32>
    %569 = vector.extract_strided_slice %29 {offsets = [0, 3], sizes = [16, 1], strides = [1, 1]} : vector<16x8xi32> to vector<16x1xi32>
    %570 = vector.extract_strided_slice %30 {offsets = [0, 3], sizes = [16, 1], strides = [1, 1]} : vector<16x8xf32> to vector<16x1xf32>
    %cst_148 = arith.constant 1.000000e+00 : f32
    %571 = vector.broadcast %cst_148 : f32 to vector<16x1xf32>
    %572 = arith.subf %571, %566 : vector<16x1xf32>
    %c0_i32_149 = arith.constant 0 : i32
    %573 = vector.broadcast %c0_i32_149 : i32 to vector<16x1xi32>
    %574 = arith.addi %565, %573 : vector<16x1xi32>
    %cst_150 = arith.constant 1.000000e+00 : f32
    %575 = vector.broadcast %cst_150 : f32 to vector<16x1xf32>
    %576 = arith.subf %575, %568 : vector<16x1xf32>
    %c0_i32_151 = arith.constant 0 : i32
    %577 = vector.broadcast %c0_i32_151 : i32 to vector<16x1xi32>
    %578 = arith.addi %567, %577 : vector<16x1xi32>
    %cst_152 = arith.constant 1.000000e+00 : f32
    %579 = vector.broadcast %cst_152 : f32 to vector<16x1xf32>
    %580 = arith.subf %579, %570 : vector<16x1xf32>
    %c0_i32_153 = arith.constant 0 : i32
    %581 = vector.broadcast %c0_i32_153 : i32 to vector<16x1xi32>
    %582 = arith.addi %569, %581 : vector<16x1xi32>
    %c4_i32_154 = arith.constant 4 : i32
    %583 = vector.broadcast %c4_i32_154 : i32 to vector<16x1xi32>
    %584 = arith.muli %574, %583 : vector<16x1xi32>
    %585 = arith.addi %584, %578 : vector<16x1xi32>
    %c4_i32_155 = arith.constant 4 : i32
    %586 = vector.broadcast %c4_i32_155 : i32 to vector<16x1xi32>
    %587 = arith.muli %585, %586 : vector<16x1xi32>
    %588 = arith.addi %587, %582 : vector<16x1xi32>
    %589 = vector.broadcast %588 : vector<16x1xi32> to vector<16x64xi32>
    %590 = arith.cmpi eq, %31, %589 : vector<16x64xi32>
    %591 = arith.mulf %564, %572 : vector<16x1xf32>
    %592 = arith.mulf %591, %576 : vector<16x1xf32>
    %593 = arith.mulf %592, %580 : vector<16x1xf32>
    %cst_156 = arith.constant 0.000000e+00 : f32
    %594 = vector.shape_cast %593 : vector<16x1xf32> to vector<16x1xf32>
    %595 = vector.broadcast %594 : vector<16x1xf32> to vector<16x64xf32>
    %596 = vector.broadcast %cst_156 : f32 to vector<16x64xf32>
    %597 = arith.select %590, %595, %596 : vector<16x64xi1>, vector<16x64xf32>
    %598 = arith.addf %563, %597 : vector<16x64xf32>
    %c1_i32_157 = arith.constant 1 : i32
    %599 = vector.broadcast %c1_i32_157 : i32 to vector<16x1xi32>
    %600 = arith.addi %569, %599 : vector<16x1xi32>
    %c4_i32_158 = arith.constant 4 : i32
    %601 = vector.broadcast %c4_i32_158 : i32 to vector<16x1xi32>
    %602 = arith.muli %574, %601 : vector<16x1xi32>
    %603 = arith.addi %602, %578 : vector<16x1xi32>
    %c4_i32_159 = arith.constant 4 : i32
    %604 = vector.broadcast %c4_i32_159 : i32 to vector<16x1xi32>
    %605 = arith.muli %603, %604 : vector<16x1xi32>
    %606 = arith.addi %605, %600 : vector<16x1xi32>
    %607 = vector.broadcast %606 : vector<16x1xi32> to vector<16x64xi32>
    %608 = arith.cmpi eq, %31, %607 : vector<16x64xi32>
    %609 = arith.mulf %564, %572 : vector<16x1xf32>
    %610 = arith.mulf %609, %576 : vector<16x1xf32>
    %611 = arith.mulf %610, %570 : vector<16x1xf32>
    %cst_160 = arith.constant 0.000000e+00 : f32
    %612 = vector.shape_cast %611 : vector<16x1xf32> to vector<16x1xf32>
    %613 = vector.broadcast %612 : vector<16x1xf32> to vector<16x64xf32>
    %614 = vector.broadcast %cst_160 : f32 to vector<16x64xf32>
    %615 = arith.select %608, %613, %614 : vector<16x64xi1>, vector<16x64xf32>
    %616 = arith.addf %598, %615 : vector<16x64xf32>
    %c1_i32_161 = arith.constant 1 : i32
    %617 = vector.broadcast %c1_i32_161 : i32 to vector<16x1xi32>
    %618 = arith.addi %567, %617 : vector<16x1xi32>
    %cst_162 = arith.constant 1.000000e+00 : f32
    %619 = vector.broadcast %cst_162 : f32 to vector<16x1xf32>
    %620 = arith.subf %619, %570 : vector<16x1xf32>
    %c0_i32_163 = arith.constant 0 : i32
    %621 = vector.broadcast %c0_i32_163 : i32 to vector<16x1xi32>
    %622 = arith.addi %569, %621 : vector<16x1xi32>
    %c4_i32_164 = arith.constant 4 : i32
    %623 = vector.broadcast %c4_i32_164 : i32 to vector<16x1xi32>
    %624 = arith.muli %574, %623 : vector<16x1xi32>
    %625 = arith.addi %624, %618 : vector<16x1xi32>
    %c4_i32_165 = arith.constant 4 : i32
    %626 = vector.broadcast %c4_i32_165 : i32 to vector<16x1xi32>
    %627 = arith.muli %625, %626 : vector<16x1xi32>
    %628 = arith.addi %627, %622 : vector<16x1xi32>
    %629 = vector.broadcast %628 : vector<16x1xi32> to vector<16x64xi32>
    %630 = arith.cmpi eq, %31, %629 : vector<16x64xi32>
    %631 = arith.mulf %564, %572 : vector<16x1xf32>
    %632 = arith.mulf %631, %568 : vector<16x1xf32>
    %633 = arith.mulf %632, %620 : vector<16x1xf32>
    %cst_166 = arith.constant 0.000000e+00 : f32
    %634 = vector.shape_cast %633 : vector<16x1xf32> to vector<16x1xf32>
    %635 = vector.broadcast %634 : vector<16x1xf32> to vector<16x64xf32>
    %636 = vector.broadcast %cst_166 : f32 to vector<16x64xf32>
    %637 = arith.select %630, %635, %636 : vector<16x64xi1>, vector<16x64xf32>
    %638 = arith.addf %616, %637 : vector<16x64xf32>
    %c1_i32_167 = arith.constant 1 : i32
    %639 = vector.broadcast %c1_i32_167 : i32 to vector<16x1xi32>
    %640 = arith.addi %569, %639 : vector<16x1xi32>
    %c4_i32_168 = arith.constant 4 : i32
    %641 = vector.broadcast %c4_i32_168 : i32 to vector<16x1xi32>
    %642 = arith.muli %574, %641 : vector<16x1xi32>
    %643 = arith.addi %642, %618 : vector<16x1xi32>
    %c4_i32_169 = arith.constant 4 : i32
    %644 = vector.broadcast %c4_i32_169 : i32 to vector<16x1xi32>
    %645 = arith.muli %643, %644 : vector<16x1xi32>
    %646 = arith.addi %645, %640 : vector<16x1xi32>
    %647 = vector.broadcast %646 : vector<16x1xi32> to vector<16x64xi32>
    %648 = arith.cmpi eq, %31, %647 : vector<16x64xi32>
    %649 = arith.mulf %564, %572 : vector<16x1xf32>
    %650 = arith.mulf %649, %568 : vector<16x1xf32>
    %651 = arith.mulf %650, %570 : vector<16x1xf32>
    %cst_170 = arith.constant 0.000000e+00 : f32
    %652 = vector.shape_cast %651 : vector<16x1xf32> to vector<16x1xf32>
    %653 = vector.broadcast %652 : vector<16x1xf32> to vector<16x64xf32>
    %654 = vector.broadcast %cst_170 : f32 to vector<16x64xf32>
    %655 = arith.select %648, %653, %654 : vector<16x64xi1>, vector<16x64xf32>
    %656 = arith.addf %638, %655 : vector<16x64xf32>
    %c1_i32_171 = arith.constant 1 : i32
    %657 = vector.broadcast %c1_i32_171 : i32 to vector<16x1xi32>
    %658 = arith.addi %565, %657 : vector<16x1xi32>
    %cst_172 = arith.constant 1.000000e+00 : f32
    %659 = vector.broadcast %cst_172 : f32 to vector<16x1xf32>
    %660 = arith.subf %659, %568 : vector<16x1xf32>
    %c0_i32_173 = arith.constant 0 : i32
    %661 = vector.broadcast %c0_i32_173 : i32 to vector<16x1xi32>
    %662 = arith.addi %567, %661 : vector<16x1xi32>
    %cst_174 = arith.constant 1.000000e+00 : f32
    %663 = vector.broadcast %cst_174 : f32 to vector<16x1xf32>
    %664 = arith.subf %663, %570 : vector<16x1xf32>
    %c0_i32_175 = arith.constant 0 : i32
    %665 = vector.broadcast %c0_i32_175 : i32 to vector<16x1xi32>
    %666 = arith.addi %569, %665 : vector<16x1xi32>
    %c4_i32_176 = arith.constant 4 : i32
    %667 = vector.broadcast %c4_i32_176 : i32 to vector<16x1xi32>
    %668 = arith.muli %658, %667 : vector<16x1xi32>
    %669 = arith.addi %668, %662 : vector<16x1xi32>
    %c4_i32_177 = arith.constant 4 : i32
    %670 = vector.broadcast %c4_i32_177 : i32 to vector<16x1xi32>
    %671 = arith.muli %669, %670 : vector<16x1xi32>
    %672 = arith.addi %671, %666 : vector<16x1xi32>
    %673 = vector.broadcast %672 : vector<16x1xi32> to vector<16x64xi32>
    %674 = arith.cmpi eq, %31, %673 : vector<16x64xi32>
    %675 = arith.mulf %564, %566 : vector<16x1xf32>
    %676 = arith.mulf %675, %660 : vector<16x1xf32>
    %677 = arith.mulf %676, %664 : vector<16x1xf32>
    %cst_178 = arith.constant 0.000000e+00 : f32
    %678 = vector.shape_cast %677 : vector<16x1xf32> to vector<16x1xf32>
    %679 = vector.broadcast %678 : vector<16x1xf32> to vector<16x64xf32>
    %680 = vector.broadcast %cst_178 : f32 to vector<16x64xf32>
    %681 = arith.select %674, %679, %680 : vector<16x64xi1>, vector<16x64xf32>
    %682 = arith.addf %656, %681 : vector<16x64xf32>
    %c1_i32_179 = arith.constant 1 : i32
    %683 = vector.broadcast %c1_i32_179 : i32 to vector<16x1xi32>
    %684 = arith.addi %569, %683 : vector<16x1xi32>
    %c4_i32_180 = arith.constant 4 : i32
    %685 = vector.broadcast %c4_i32_180 : i32 to vector<16x1xi32>
    %686 = arith.muli %658, %685 : vector<16x1xi32>
    %687 = arith.addi %686, %662 : vector<16x1xi32>
    %c4_i32_181 = arith.constant 4 : i32
    %688 = vector.broadcast %c4_i32_181 : i32 to vector<16x1xi32>
    %689 = arith.muli %687, %688 : vector<16x1xi32>
    %690 = arith.addi %689, %684 : vector<16x1xi32>
    %691 = vector.broadcast %690 : vector<16x1xi32> to vector<16x64xi32>
    %692 = arith.cmpi eq, %31, %691 : vector<16x64xi32>
    %693 = arith.mulf %564, %566 : vector<16x1xf32>
    %694 = arith.mulf %693, %660 : vector<16x1xf32>
    %695 = arith.mulf %694, %570 : vector<16x1xf32>
    %cst_182 = arith.constant 0.000000e+00 : f32
    %696 = vector.shape_cast %695 : vector<16x1xf32> to vector<16x1xf32>
    %697 = vector.broadcast %696 : vector<16x1xf32> to vector<16x64xf32>
    %698 = vector.broadcast %cst_182 : f32 to vector<16x64xf32>
    %699 = arith.select %692, %697, %698 : vector<16x64xi1>, vector<16x64xf32>
    %700 = arith.addf %682, %699 : vector<16x64xf32>
    %c1_i32_183 = arith.constant 1 : i32
    %701 = vector.broadcast %c1_i32_183 : i32 to vector<16x1xi32>
    %702 = arith.addi %567, %701 : vector<16x1xi32>
    %cst_184 = arith.constant 1.000000e+00 : f32
    %703 = vector.broadcast %cst_184 : f32 to vector<16x1xf32>
    %704 = arith.subf %703, %570 : vector<16x1xf32>
    %c0_i32_185 = arith.constant 0 : i32
    %705 = vector.broadcast %c0_i32_185 : i32 to vector<16x1xi32>
    %706 = arith.addi %569, %705 : vector<16x1xi32>
    %c4_i32_186 = arith.constant 4 : i32
    %707 = vector.broadcast %c4_i32_186 : i32 to vector<16x1xi32>
    %708 = arith.muli %658, %707 : vector<16x1xi32>
    %709 = arith.addi %708, %702 : vector<16x1xi32>
    %c4_i32_187 = arith.constant 4 : i32
    %710 = vector.broadcast %c4_i32_187 : i32 to vector<16x1xi32>
    %711 = arith.muli %709, %710 : vector<16x1xi32>
    %712 = arith.addi %711, %706 : vector<16x1xi32>
    %713 = vector.broadcast %712 : vector<16x1xi32> to vector<16x64xi32>
    %714 = arith.cmpi eq, %31, %713 : vector<16x64xi32>
    %715 = arith.mulf %564, %566 : vector<16x1xf32>
    %716 = arith.mulf %715, %568 : vector<16x1xf32>
    %717 = arith.mulf %716, %704 : vector<16x1xf32>
    %cst_188 = arith.constant 0.000000e+00 : f32
    %718 = vector.shape_cast %717 : vector<16x1xf32> to vector<16x1xf32>
    %719 = vector.broadcast %718 : vector<16x1xf32> to vector<16x64xf32>
    %720 = vector.broadcast %cst_188 : f32 to vector<16x64xf32>
    %721 = arith.select %714, %719, %720 : vector<16x64xi1>, vector<16x64xf32>
    %722 = arith.addf %700, %721 : vector<16x64xf32>
    %c1_i32_189 = arith.constant 1 : i32
    %723 = vector.broadcast %c1_i32_189 : i32 to vector<16x1xi32>
    %724 = arith.addi %569, %723 : vector<16x1xi32>
    %c4_i32_190 = arith.constant 4 : i32
    %725 = vector.broadcast %c4_i32_190 : i32 to vector<16x1xi32>
    %726 = arith.muli %658, %725 : vector<16x1xi32>
    %727 = arith.addi %726, %702 : vector<16x1xi32>
    %c4_i32_191 = arith.constant 4 : i32
    %728 = vector.broadcast %c4_i32_191 : i32 to vector<16x1xi32>
    %729 = arith.muli %727, %728 : vector<16x1xi32>
    %730 = arith.addi %729, %724 : vector<16x1xi32>
    %731 = vector.broadcast %730 : vector<16x1xi32> to vector<16x64xi32>
    %732 = arith.cmpi eq, %31, %731 : vector<16x64xi32>
    %733 = arith.mulf %564, %566 : vector<16x1xf32>
    %734 = arith.mulf %733, %568 : vector<16x1xf32>
    %735 = arith.mulf %734, %570 : vector<16x1xf32>
    %cst_192 = arith.constant 0.000000e+00 : f32
    %736 = vector.shape_cast %735 : vector<16x1xf32> to vector<16x1xf32>
    %737 = vector.broadcast %736 : vector<16x1xf32> to vector<16x64xf32>
    %738 = vector.broadcast %cst_192 : f32 to vector<16x64xf32>
    %739 = arith.select %732, %737, %738 : vector<16x64xi1>, vector<16x64xf32>
    %740 = arith.addf %722, %739 : vector<16x64xf32>
    %741 = vector.extract_strided_slice %0 {offsets = [0, 4], sizes = [16, 1], strides = [1, 1]} : vector<16x8xf32> to vector<16x1xf32>
    %742 = vector.extract_strided_slice %9 {offsets = [0, 4], sizes = [16, 1], strides = [1, 1]} : vector<16x8xi32> to vector<16x1xi32>
    %743 = vector.extract_strided_slice %10 {offsets = [0, 4], sizes = [16, 1], strides = [1, 1]} : vector<16x8xf32> to vector<16x1xf32>
    %744 = vector.extract_strided_slice %19 {offsets = [0, 4], sizes = [16, 1], strides = [1, 1]} : vector<16x8xi32> to vector<16x1xi32>
    %745 = vector.extract_strided_slice %20 {offsets = [0, 4], sizes = [16, 1], strides = [1, 1]} : vector<16x8xf32> to vector<16x1xf32>
    %746 = vector.extract_strided_slice %29 {offsets = [0, 4], sizes = [16, 1], strides = [1, 1]} : vector<16x8xi32> to vector<16x1xi32>
    %747 = vector.extract_strided_slice %30 {offsets = [0, 4], sizes = [16, 1], strides = [1, 1]} : vector<16x8xf32> to vector<16x1xf32>
    %cst_193 = arith.constant 1.000000e+00 : f32
    %748 = vector.broadcast %cst_193 : f32 to vector<16x1xf32>
    %749 = arith.subf %748, %743 : vector<16x1xf32>
    %c0_i32_194 = arith.constant 0 : i32
    %750 = vector.broadcast %c0_i32_194 : i32 to vector<16x1xi32>
    %751 = arith.addi %742, %750 : vector<16x1xi32>
    %cst_195 = arith.constant 1.000000e+00 : f32
    %752 = vector.broadcast %cst_195 : f32 to vector<16x1xf32>
    %753 = arith.subf %752, %745 : vector<16x1xf32>
    %c0_i32_196 = arith.constant 0 : i32
    %754 = vector.broadcast %c0_i32_196 : i32 to vector<16x1xi32>
    %755 = arith.addi %744, %754 : vector<16x1xi32>
    %cst_197 = arith.constant 1.000000e+00 : f32
    %756 = vector.broadcast %cst_197 : f32 to vector<16x1xf32>
    %757 = arith.subf %756, %747 : vector<16x1xf32>
    %c0_i32_198 = arith.constant 0 : i32
    %758 = vector.broadcast %c0_i32_198 : i32 to vector<16x1xi32>
    %759 = arith.addi %746, %758 : vector<16x1xi32>
    %c4_i32_199 = arith.constant 4 : i32
    %760 = vector.broadcast %c4_i32_199 : i32 to vector<16x1xi32>
    %761 = arith.muli %751, %760 : vector<16x1xi32>
    %762 = arith.addi %761, %755 : vector<16x1xi32>
    %c4_i32_200 = arith.constant 4 : i32
    %763 = vector.broadcast %c4_i32_200 : i32 to vector<16x1xi32>
    %764 = arith.muli %762, %763 : vector<16x1xi32>
    %765 = arith.addi %764, %759 : vector<16x1xi32>
    %766 = vector.broadcast %765 : vector<16x1xi32> to vector<16x64xi32>
    %767 = arith.cmpi eq, %31, %766 : vector<16x64xi32>
    %768 = arith.mulf %741, %749 : vector<16x1xf32>
    %769 = arith.mulf %768, %753 : vector<16x1xf32>
    %770 = arith.mulf %769, %757 : vector<16x1xf32>
    %cst_201 = arith.constant 0.000000e+00 : f32
    %771 = vector.shape_cast %770 : vector<16x1xf32> to vector<16x1xf32>
    %772 = vector.broadcast %771 : vector<16x1xf32> to vector<16x64xf32>
    %773 = vector.broadcast %cst_201 : f32 to vector<16x64xf32>
    %774 = arith.select %767, %772, %773 : vector<16x64xi1>, vector<16x64xf32>
    %775 = arith.addf %740, %774 : vector<16x64xf32>
    %c1_i32_202 = arith.constant 1 : i32
    %776 = vector.broadcast %c1_i32_202 : i32 to vector<16x1xi32>
    %777 = arith.addi %746, %776 : vector<16x1xi32>
    %c4_i32_203 = arith.constant 4 : i32
    %778 = vector.broadcast %c4_i32_203 : i32 to vector<16x1xi32>
    %779 = arith.muli %751, %778 : vector<16x1xi32>
    %780 = arith.addi %779, %755 : vector<16x1xi32>
    %c4_i32_204 = arith.constant 4 : i32
    %781 = vector.broadcast %c4_i32_204 : i32 to vector<16x1xi32>
    %782 = arith.muli %780, %781 : vector<16x1xi32>
    %783 = arith.addi %782, %777 : vector<16x1xi32>
    %784 = vector.broadcast %783 : vector<16x1xi32> to vector<16x64xi32>
    %785 = arith.cmpi eq, %31, %784 : vector<16x64xi32>
    %786 = arith.mulf %741, %749 : vector<16x1xf32>
    %787 = arith.mulf %786, %753 : vector<16x1xf32>
    %788 = arith.mulf %787, %747 : vector<16x1xf32>
    %cst_205 = arith.constant 0.000000e+00 : f32
    %789 = vector.shape_cast %788 : vector<16x1xf32> to vector<16x1xf32>
    %790 = vector.broadcast %789 : vector<16x1xf32> to vector<16x64xf32>
    %791 = vector.broadcast %cst_205 : f32 to vector<16x64xf32>
    %792 = arith.select %785, %790, %791 : vector<16x64xi1>, vector<16x64xf32>
    %793 = arith.addf %775, %792 : vector<16x64xf32>
    %c1_i32_206 = arith.constant 1 : i32
    %794 = vector.broadcast %c1_i32_206 : i32 to vector<16x1xi32>
    %795 = arith.addi %744, %794 : vector<16x1xi32>
    %cst_207 = arith.constant 1.000000e+00 : f32
    %796 = vector.broadcast %cst_207 : f32 to vector<16x1xf32>
    %797 = arith.subf %796, %747 : vector<16x1xf32>
    %c0_i32_208 = arith.constant 0 : i32
    %798 = vector.broadcast %c0_i32_208 : i32 to vector<16x1xi32>
    %799 = arith.addi %746, %798 : vector<16x1xi32>
    %c4_i32_209 = arith.constant 4 : i32
    %800 = vector.broadcast %c4_i32_209 : i32 to vector<16x1xi32>
    %801 = arith.muli %751, %800 : vector<16x1xi32>
    %802 = arith.addi %801, %795 : vector<16x1xi32>
    %c4_i32_210 = arith.constant 4 : i32
    %803 = vector.broadcast %c4_i32_210 : i32 to vector<16x1xi32>
    %804 = arith.muli %802, %803 : vector<16x1xi32>
    %805 = arith.addi %804, %799 : vector<16x1xi32>
    %806 = vector.broadcast %805 : vector<16x1xi32> to vector<16x64xi32>
    %807 = arith.cmpi eq, %31, %806 : vector<16x64xi32>
    %808 = arith.mulf %741, %749 : vector<16x1xf32>
    %809 = arith.mulf %808, %745 : vector<16x1xf32>
    %810 = arith.mulf %809, %797 : vector<16x1xf32>
    %cst_211 = arith.constant 0.000000e+00 : f32
    %811 = vector.shape_cast %810 : vector<16x1xf32> to vector<16x1xf32>
    %812 = vector.broadcast %811 : vector<16x1xf32> to vector<16x64xf32>
    %813 = vector.broadcast %cst_211 : f32 to vector<16x64xf32>
    %814 = arith.select %807, %812, %813 : vector<16x64xi1>, vector<16x64xf32>
    %815 = arith.addf %793, %814 : vector<16x64xf32>
    %c1_i32_212 = arith.constant 1 : i32
    %816 = vector.broadcast %c1_i32_212 : i32 to vector<16x1xi32>
    %817 = arith.addi %746, %816 : vector<16x1xi32>
    %c4_i32_213 = arith.constant 4 : i32
    %818 = vector.broadcast %c4_i32_213 : i32 to vector<16x1xi32>
    %819 = arith.muli %751, %818 : vector<16x1xi32>
    %820 = arith.addi %819, %795 : vector<16x1xi32>
    %c4_i32_214 = arith.constant 4 : i32
    %821 = vector.broadcast %c4_i32_214 : i32 to vector<16x1xi32>
    %822 = arith.muli %820, %821 : vector<16x1xi32>
    %823 = arith.addi %822, %817 : vector<16x1xi32>
    %824 = vector.broadcast %823 : vector<16x1xi32> to vector<16x64xi32>
    %825 = arith.cmpi eq, %31, %824 : vector<16x64xi32>
    %826 = arith.mulf %741, %749 : vector<16x1xf32>
    %827 = arith.mulf %826, %745 : vector<16x1xf32>
    %828 = arith.mulf %827, %747 : vector<16x1xf32>
    %cst_215 = arith.constant 0.000000e+00 : f32
    %829 = vector.shape_cast %828 : vector<16x1xf32> to vector<16x1xf32>
    %830 = vector.broadcast %829 : vector<16x1xf32> to vector<16x64xf32>
    %831 = vector.broadcast %cst_215 : f32 to vector<16x64xf32>
    %832 = arith.select %825, %830, %831 : vector<16x64xi1>, vector<16x64xf32>
    %833 = arith.addf %815, %832 : vector<16x64xf32>
    %c1_i32_216 = arith.constant 1 : i32
    %834 = vector.broadcast %c1_i32_216 : i32 to vector<16x1xi32>
    %835 = arith.addi %742, %834 : vector<16x1xi32>
    %cst_217 = arith.constant 1.000000e+00 : f32
    %836 = vector.broadcast %cst_217 : f32 to vector<16x1xf32>
    %837 = arith.subf %836, %745 : vector<16x1xf32>
    %c0_i32_218 = arith.constant 0 : i32
    %838 = vector.broadcast %c0_i32_218 : i32 to vector<16x1xi32>
    %839 = arith.addi %744, %838 : vector<16x1xi32>
    %cst_219 = arith.constant 1.000000e+00 : f32
    %840 = vector.broadcast %cst_219 : f32 to vector<16x1xf32>
    %841 = arith.subf %840, %747 : vector<16x1xf32>
    %c0_i32_220 = arith.constant 0 : i32
    %842 = vector.broadcast %c0_i32_220 : i32 to vector<16x1xi32>
    %843 = arith.addi %746, %842 : vector<16x1xi32>
    %c4_i32_221 = arith.constant 4 : i32
    %844 = vector.broadcast %c4_i32_221 : i32 to vector<16x1xi32>
    %845 = arith.muli %835, %844 : vector<16x1xi32>
    %846 = arith.addi %845, %839 : vector<16x1xi32>
    %c4_i32_222 = arith.constant 4 : i32
    %847 = vector.broadcast %c4_i32_222 : i32 to vector<16x1xi32>
    %848 = arith.muli %846, %847 : vector<16x1xi32>
    %849 = arith.addi %848, %843 : vector<16x1xi32>
    %850 = vector.broadcast %849 : vector<16x1xi32> to vector<16x64xi32>
    %851 = arith.cmpi eq, %31, %850 : vector<16x64xi32>
    %852 = arith.mulf %741, %743 : vector<16x1xf32>
    %853 = arith.mulf %852, %837 : vector<16x1xf32>
    %854 = arith.mulf %853, %841 : vector<16x1xf32>
    %cst_223 = arith.constant 0.000000e+00 : f32
    %855 = vector.shape_cast %854 : vector<16x1xf32> to vector<16x1xf32>
    %856 = vector.broadcast %855 : vector<16x1xf32> to vector<16x64xf32>
    %857 = vector.broadcast %cst_223 : f32 to vector<16x64xf32>
    %858 = arith.select %851, %856, %857 : vector<16x64xi1>, vector<16x64xf32>
    %859 = arith.addf %833, %858 : vector<16x64xf32>
    %c1_i32_224 = arith.constant 1 : i32
    %860 = vector.broadcast %c1_i32_224 : i32 to vector<16x1xi32>
    %861 = arith.addi %746, %860 : vector<16x1xi32>
    %c4_i32_225 = arith.constant 4 : i32
    %862 = vector.broadcast %c4_i32_225 : i32 to vector<16x1xi32>
    %863 = arith.muli %835, %862 : vector<16x1xi32>
    %864 = arith.addi %863, %839 : vector<16x1xi32>
    %c4_i32_226 = arith.constant 4 : i32
    %865 = vector.broadcast %c4_i32_226 : i32 to vector<16x1xi32>
    %866 = arith.muli %864, %865 : vector<16x1xi32>
    %867 = arith.addi %866, %861 : vector<16x1xi32>
    %868 = vector.broadcast %867 : vector<16x1xi32> to vector<16x64xi32>
    %869 = arith.cmpi eq, %31, %868 : vector<16x64xi32>
    %870 = arith.mulf %741, %743 : vector<16x1xf32>
    %871 = arith.mulf %870, %837 : vector<16x1xf32>
    %872 = arith.mulf %871, %747 : vector<16x1xf32>
    %cst_227 = arith.constant 0.000000e+00 : f32
    %873 = vector.shape_cast %872 : vector<16x1xf32> to vector<16x1xf32>
    %874 = vector.broadcast %873 : vector<16x1xf32> to vector<16x64xf32>
    %875 = vector.broadcast %cst_227 : f32 to vector<16x64xf32>
    %876 = arith.select %869, %874, %875 : vector<16x64xi1>, vector<16x64xf32>
    %877 = arith.addf %859, %876 : vector<16x64xf32>
    %c1_i32_228 = arith.constant 1 : i32
    %878 = vector.broadcast %c1_i32_228 : i32 to vector<16x1xi32>
    %879 = arith.addi %744, %878 : vector<16x1xi32>
    %cst_229 = arith.constant 1.000000e+00 : f32
    %880 = vector.broadcast %cst_229 : f32 to vector<16x1xf32>
    %881 = arith.subf %880, %747 : vector<16x1xf32>
    %c0_i32_230 = arith.constant 0 : i32
    %882 = vector.broadcast %c0_i32_230 : i32 to vector<16x1xi32>
    %883 = arith.addi %746, %882 : vector<16x1xi32>
    %c4_i32_231 = arith.constant 4 : i32
    %884 = vector.broadcast %c4_i32_231 : i32 to vector<16x1xi32>
    %885 = arith.muli %835, %884 : vector<16x1xi32>
    %886 = arith.addi %885, %879 : vector<16x1xi32>
    %c4_i32_232 = arith.constant 4 : i32
    %887 = vector.broadcast %c4_i32_232 : i32 to vector<16x1xi32>
    %888 = arith.muli %886, %887 : vector<16x1xi32>
    %889 = arith.addi %888, %883 : vector<16x1xi32>
    %890 = vector.broadcast %889 : vector<16x1xi32> to vector<16x64xi32>
    %891 = arith.cmpi eq, %31, %890 : vector<16x64xi32>
    %892 = arith.mulf %741, %743 : vector<16x1xf32>
    %893 = arith.mulf %892, %745 : vector<16x1xf32>
    %894 = arith.mulf %893, %881 : vector<16x1xf32>
    %cst_233 = arith.constant 0.000000e+00 : f32
    %895 = vector.shape_cast %894 : vector<16x1xf32> to vector<16x1xf32>
    %896 = vector.broadcast %895 : vector<16x1xf32> to vector<16x64xf32>
    %897 = vector.broadcast %cst_233 : f32 to vector<16x64xf32>
    %898 = arith.select %891, %896, %897 : vector<16x64xi1>, vector<16x64xf32>
    %899 = arith.addf %877, %898 : vector<16x64xf32>
    %c1_i32_234 = arith.constant 1 : i32
    %900 = vector.broadcast %c1_i32_234 : i32 to vector<16x1xi32>
    %901 = arith.addi %746, %900 : vector<16x1xi32>
    %c4_i32_235 = arith.constant 4 : i32
    %902 = vector.broadcast %c4_i32_235 : i32 to vector<16x1xi32>
    %903 = arith.muli %835, %902 : vector<16x1xi32>
    %904 = arith.addi %903, %879 : vector<16x1xi32>
    %c4_i32_236 = arith.constant 4 : i32
    %905 = vector.broadcast %c4_i32_236 : i32 to vector<16x1xi32>
    %906 = arith.muli %904, %905 : vector<16x1xi32>
    %907 = arith.addi %906, %901 : vector<16x1xi32>
    %908 = vector.broadcast %907 : vector<16x1xi32> to vector<16x64xi32>
    %909 = arith.cmpi eq, %31, %908 : vector<16x64xi32>
    %910 = arith.mulf %741, %743 : vector<16x1xf32>
    %911 = arith.mulf %910, %745 : vector<16x1xf32>
    %912 = arith.mulf %911, %747 : vector<16x1xf32>
    %cst_237 = arith.constant 0.000000e+00 : f32
    %913 = vector.shape_cast %912 : vector<16x1xf32> to vector<16x1xf32>
    %914 = vector.broadcast %913 : vector<16x1xf32> to vector<16x64xf32>
    %915 = vector.broadcast %cst_237 : f32 to vector<16x64xf32>
    %916 = arith.select %909, %914, %915 : vector<16x64xi1>, vector<16x64xf32>
    %917 = arith.addf %899, %916 : vector<16x64xf32>
    %918 = vector.extract_strided_slice %0 {offsets = [0, 5], sizes = [16, 1], strides = [1, 1]} : vector<16x8xf32> to vector<16x1xf32>
    %919 = vector.extract_strided_slice %9 {offsets = [0, 5], sizes = [16, 1], strides = [1, 1]} : vector<16x8xi32> to vector<16x1xi32>
    %920 = vector.extract_strided_slice %10 {offsets = [0, 5], sizes = [16, 1], strides = [1, 1]} : vector<16x8xf32> to vector<16x1xf32>
    %921 = vector.extract_strided_slice %19 {offsets = [0, 5], sizes = [16, 1], strides = [1, 1]} : vector<16x8xi32> to vector<16x1xi32>
    %922 = vector.extract_strided_slice %20 {offsets = [0, 5], sizes = [16, 1], strides = [1, 1]} : vector<16x8xf32> to vector<16x1xf32>
    %923 = vector.extract_strided_slice %29 {offsets = [0, 5], sizes = [16, 1], strides = [1, 1]} : vector<16x8xi32> to vector<16x1xi32>
    %924 = vector.extract_strided_slice %30 {offsets = [0, 5], sizes = [16, 1], strides = [1, 1]} : vector<16x8xf32> to vector<16x1xf32>
    %cst_238 = arith.constant 1.000000e+00 : f32
    %925 = vector.broadcast %cst_238 : f32 to vector<16x1xf32>
    %926 = arith.subf %925, %920 : vector<16x1xf32>
    %c0_i32_239 = arith.constant 0 : i32
    %927 = vector.broadcast %c0_i32_239 : i32 to vector<16x1xi32>
    %928 = arith.addi %919, %927 : vector<16x1xi32>
    %cst_240 = arith.constant 1.000000e+00 : f32
    %929 = vector.broadcast %cst_240 : f32 to vector<16x1xf32>
    %930 = arith.subf %929, %922 : vector<16x1xf32>
    %c0_i32_241 = arith.constant 0 : i32
    %931 = vector.broadcast %c0_i32_241 : i32 to vector<16x1xi32>
    %932 = arith.addi %921, %931 : vector<16x1xi32>
    %cst_242 = arith.constant 1.000000e+00 : f32
    %933 = vector.broadcast %cst_242 : f32 to vector<16x1xf32>
    %934 = arith.subf %933, %924 : vector<16x1xf32>
    %c0_i32_243 = arith.constant 0 : i32
    %935 = vector.broadcast %c0_i32_243 : i32 to vector<16x1xi32>
    %936 = arith.addi %923, %935 : vector<16x1xi32>
    %c4_i32_244 = arith.constant 4 : i32
    %937 = vector.broadcast %c4_i32_244 : i32 to vector<16x1xi32>
    %938 = arith.muli %928, %937 : vector<16x1xi32>
    %939 = arith.addi %938, %932 : vector<16x1xi32>
    %c4_i32_245 = arith.constant 4 : i32
    %940 = vector.broadcast %c4_i32_245 : i32 to vector<16x1xi32>
    %941 = arith.muli %939, %940 : vector<16x1xi32>
    %942 = arith.addi %941, %936 : vector<16x1xi32>
    %943 = vector.broadcast %942 : vector<16x1xi32> to vector<16x64xi32>
    %944 = arith.cmpi eq, %31, %943 : vector<16x64xi32>
    %945 = arith.mulf %918, %926 : vector<16x1xf32>
    %946 = arith.mulf %945, %930 : vector<16x1xf32>
    %947 = arith.mulf %946, %934 : vector<16x1xf32>
    %cst_246 = arith.constant 0.000000e+00 : f32
    %948 = vector.shape_cast %947 : vector<16x1xf32> to vector<16x1xf32>
    %949 = vector.broadcast %948 : vector<16x1xf32> to vector<16x64xf32>
    %950 = vector.broadcast %cst_246 : f32 to vector<16x64xf32>
    %951 = arith.select %944, %949, %950 : vector<16x64xi1>, vector<16x64xf32>
    %952 = arith.addf %917, %951 : vector<16x64xf32>
    %c1_i32_247 = arith.constant 1 : i32
    %953 = vector.broadcast %c1_i32_247 : i32 to vector<16x1xi32>
    %954 = arith.addi %923, %953 : vector<16x1xi32>
    %c4_i32_248 = arith.constant 4 : i32
    %955 = vector.broadcast %c4_i32_248 : i32 to vector<16x1xi32>
    %956 = arith.muli %928, %955 : vector<16x1xi32>
    %957 = arith.addi %956, %932 : vector<16x1xi32>
    %c4_i32_249 = arith.constant 4 : i32
    %958 = vector.broadcast %c4_i32_249 : i32 to vector<16x1xi32>
    %959 = arith.muli %957, %958 : vector<16x1xi32>
    %960 = arith.addi %959, %954 : vector<16x1xi32>
    %961 = vector.broadcast %960 : vector<16x1xi32> to vector<16x64xi32>
    %962 = arith.cmpi eq, %31, %961 : vector<16x64xi32>
    %963 = arith.mulf %918, %926 : vector<16x1xf32>
    %964 = arith.mulf %963, %930 : vector<16x1xf32>
    %965 = arith.mulf %964, %924 : vector<16x1xf32>
    %cst_250 = arith.constant 0.000000e+00 : f32
    %966 = vector.shape_cast %965 : vector<16x1xf32> to vector<16x1xf32>
    %967 = vector.broadcast %966 : vector<16x1xf32> to vector<16x64xf32>
    %968 = vector.broadcast %cst_250 : f32 to vector<16x64xf32>
    %969 = arith.select %962, %967, %968 : vector<16x64xi1>, vector<16x64xf32>
    %970 = arith.addf %952, %969 : vector<16x64xf32>
    %c1_i32_251 = arith.constant 1 : i32
    %971 = vector.broadcast %c1_i32_251 : i32 to vector<16x1xi32>
    %972 = arith.addi %921, %971 : vector<16x1xi32>
    %cst_252 = arith.constant 1.000000e+00 : f32
    %973 = vector.broadcast %cst_252 : f32 to vector<16x1xf32>
    %974 = arith.subf %973, %924 : vector<16x1xf32>
    %c0_i32_253 = arith.constant 0 : i32
    %975 = vector.broadcast %c0_i32_253 : i32 to vector<16x1xi32>
    %976 = arith.addi %923, %975 : vector<16x1xi32>
    %c4_i32_254 = arith.constant 4 : i32
    %977 = vector.broadcast %c4_i32_254 : i32 to vector<16x1xi32>
    %978 = arith.muli %928, %977 : vector<16x1xi32>
    %979 = arith.addi %978, %972 : vector<16x1xi32>
    %c4_i32_255 = arith.constant 4 : i32
    %980 = vector.broadcast %c4_i32_255 : i32 to vector<16x1xi32>
    %981 = arith.muli %979, %980 : vector<16x1xi32>
    %982 = arith.addi %981, %976 : vector<16x1xi32>
    %983 = vector.broadcast %982 : vector<16x1xi32> to vector<16x64xi32>
    %984 = arith.cmpi eq, %31, %983 : vector<16x64xi32>
    %985 = arith.mulf %918, %926 : vector<16x1xf32>
    %986 = arith.mulf %985, %922 : vector<16x1xf32>
    %987 = arith.mulf %986, %974 : vector<16x1xf32>
    %cst_256 = arith.constant 0.000000e+00 : f32
    %988 = vector.shape_cast %987 : vector<16x1xf32> to vector<16x1xf32>
    %989 = vector.broadcast %988 : vector<16x1xf32> to vector<16x64xf32>
    %990 = vector.broadcast %cst_256 : f32 to vector<16x64xf32>
    %991 = arith.select %984, %989, %990 : vector<16x64xi1>, vector<16x64xf32>
    %992 = arith.addf %970, %991 : vector<16x64xf32>
    %c1_i32_257 = arith.constant 1 : i32
    %993 = vector.broadcast %c1_i32_257 : i32 to vector<16x1xi32>
    %994 = arith.addi %923, %993 : vector<16x1xi32>
    %c4_i32_258 = arith.constant 4 : i32
    %995 = vector.broadcast %c4_i32_258 : i32 to vector<16x1xi32>
    %996 = arith.muli %928, %995 : vector<16x1xi32>
    %997 = arith.addi %996, %972 : vector<16x1xi32>
    %c4_i32_259 = arith.constant 4 : i32
    %998 = vector.broadcast %c4_i32_259 : i32 to vector<16x1xi32>
    %999 = arith.muli %997, %998 : vector<16x1xi32>
    %1000 = arith.addi %999, %994 : vector<16x1xi32>
    %1001 = vector.broadcast %1000 : vector<16x1xi32> to vector<16x64xi32>
    %1002 = arith.cmpi eq, %31, %1001 : vector<16x64xi32>
    %1003 = arith.mulf %918, %926 : vector<16x1xf32>
    %1004 = arith.mulf %1003, %922 : vector<16x1xf32>
    %1005 = arith.mulf %1004, %924 : vector<16x1xf32>
    %cst_260 = arith.constant 0.000000e+00 : f32
    %1006 = vector.shape_cast %1005 : vector<16x1xf32> to vector<16x1xf32>
    %1007 = vector.broadcast %1006 : vector<16x1xf32> to vector<16x64xf32>
    %1008 = vector.broadcast %cst_260 : f32 to vector<16x64xf32>
    %1009 = arith.select %1002, %1007, %1008 : vector<16x64xi1>, vector<16x64xf32>
    %1010 = arith.addf %992, %1009 : vector<16x64xf32>
    %c1_i32_261 = arith.constant 1 : i32
    %1011 = vector.broadcast %c1_i32_261 : i32 to vector<16x1xi32>
    %1012 = arith.addi %919, %1011 : vector<16x1xi32>
    %cst_262 = arith.constant 1.000000e+00 : f32
    %1013 = vector.broadcast %cst_262 : f32 to vector<16x1xf32>
    %1014 = arith.subf %1013, %922 : vector<16x1xf32>
    %c0_i32_263 = arith.constant 0 : i32
    %1015 = vector.broadcast %c0_i32_263 : i32 to vector<16x1xi32>
    %1016 = arith.addi %921, %1015 : vector<16x1xi32>
    %cst_264 = arith.constant 1.000000e+00 : f32
    %1017 = vector.broadcast %cst_264 : f32 to vector<16x1xf32>
    %1018 = arith.subf %1017, %924 : vector<16x1xf32>
    %c0_i32_265 = arith.constant 0 : i32
    %1019 = vector.broadcast %c0_i32_265 : i32 to vector<16x1xi32>
    %1020 = arith.addi %923, %1019 : vector<16x1xi32>
    %c4_i32_266 = arith.constant 4 : i32
    %1021 = vector.broadcast %c4_i32_266 : i32 to vector<16x1xi32>
    %1022 = arith.muli %1012, %1021 : vector<16x1xi32>
    %1023 = arith.addi %1022, %1016 : vector<16x1xi32>
    %c4_i32_267 = arith.constant 4 : i32
    %1024 = vector.broadcast %c4_i32_267 : i32 to vector<16x1xi32>
    %1025 = arith.muli %1023, %1024 : vector<16x1xi32>
    %1026 = arith.addi %1025, %1020 : vector<16x1xi32>
    %1027 = vector.broadcast %1026 : vector<16x1xi32> to vector<16x64xi32>
    %1028 = arith.cmpi eq, %31, %1027 : vector<16x64xi32>
    %1029 = arith.mulf %918, %920 : vector<16x1xf32>
    %1030 = arith.mulf %1029, %1014 : vector<16x1xf32>
    %1031 = arith.mulf %1030, %1018 : vector<16x1xf32>
    %cst_268 = arith.constant 0.000000e+00 : f32
    %1032 = vector.shape_cast %1031 : vector<16x1xf32> to vector<16x1xf32>
    %1033 = vector.broadcast %1032 : vector<16x1xf32> to vector<16x64xf32>
    %1034 = vector.broadcast %cst_268 : f32 to vector<16x64xf32>
    %1035 = arith.select %1028, %1033, %1034 : vector<16x64xi1>, vector<16x64xf32>
    %1036 = arith.addf %1010, %1035 : vector<16x64xf32>
    %c1_i32_269 = arith.constant 1 : i32
    %1037 = vector.broadcast %c1_i32_269 : i32 to vector<16x1xi32>
    %1038 = arith.addi %923, %1037 : vector<16x1xi32>
    %c4_i32_270 = arith.constant 4 : i32
    %1039 = vector.broadcast %c4_i32_270 : i32 to vector<16x1xi32>
    %1040 = arith.muli %1012, %1039 : vector<16x1xi32>
    %1041 = arith.addi %1040, %1016 : vector<16x1xi32>
    %c4_i32_271 = arith.constant 4 : i32
    %1042 = vector.broadcast %c4_i32_271 : i32 to vector<16x1xi32>
    %1043 = arith.muli %1041, %1042 : vector<16x1xi32>
    %1044 = arith.addi %1043, %1038 : vector<16x1xi32>
    %1045 = vector.broadcast %1044 : vector<16x1xi32> to vector<16x64xi32>
    %1046 = arith.cmpi eq, %31, %1045 : vector<16x64xi32>
    %1047 = arith.mulf %918, %920 : vector<16x1xf32>
    %1048 = arith.mulf %1047, %1014 : vector<16x1xf32>
    %1049 = arith.mulf %1048, %924 : vector<16x1xf32>
    %cst_272 = arith.constant 0.000000e+00 : f32
    %1050 = vector.shape_cast %1049 : vector<16x1xf32> to vector<16x1xf32>
    %1051 = vector.broadcast %1050 : vector<16x1xf32> to vector<16x64xf32>
    %1052 = vector.broadcast %cst_272 : f32 to vector<16x64xf32>
    %1053 = arith.select %1046, %1051, %1052 : vector<16x64xi1>, vector<16x64xf32>
    %1054 = arith.addf %1036, %1053 : vector<16x64xf32>
    %c1_i32_273 = arith.constant 1 : i32
    %1055 = vector.broadcast %c1_i32_273 : i32 to vector<16x1xi32>
    %1056 = arith.addi %921, %1055 : vector<16x1xi32>
    %cst_274 = arith.constant 1.000000e+00 : f32
    %1057 = vector.broadcast %cst_274 : f32 to vector<16x1xf32>
    %1058 = arith.subf %1057, %924 : vector<16x1xf32>
    %c0_i32_275 = arith.constant 0 : i32
    %1059 = vector.broadcast %c0_i32_275 : i32 to vector<16x1xi32>
    %1060 = arith.addi %923, %1059 : vector<16x1xi32>
    %c4_i32_276 = arith.constant 4 : i32
    %1061 = vector.broadcast %c4_i32_276 : i32 to vector<16x1xi32>
    %1062 = arith.muli %1012, %1061 : vector<16x1xi32>
    %1063 = arith.addi %1062, %1056 : vector<16x1xi32>
    %c4_i32_277 = arith.constant 4 : i32
    %1064 = vector.broadcast %c4_i32_277 : i32 to vector<16x1xi32>
    %1065 = arith.muli %1063, %1064 : vector<16x1xi32>
    %1066 = arith.addi %1065, %1060 : vector<16x1xi32>
    %1067 = vector.broadcast %1066 : vector<16x1xi32> to vector<16x64xi32>
    %1068 = arith.cmpi eq, %31, %1067 : vector<16x64xi32>
    %1069 = arith.mulf %918, %920 : vector<16x1xf32>
    %1070 = arith.mulf %1069, %922 : vector<16x1xf32>
    %1071 = arith.mulf %1070, %1058 : vector<16x1xf32>
    %cst_278 = arith.constant 0.000000e+00 : f32
    %1072 = vector.shape_cast %1071 : vector<16x1xf32> to vector<16x1xf32>
    %1073 = vector.broadcast %1072 : vector<16x1xf32> to vector<16x64xf32>
    %1074 = vector.broadcast %cst_278 : f32 to vector<16x64xf32>
    %1075 = arith.select %1068, %1073, %1074 : vector<16x64xi1>, vector<16x64xf32>
    %1076 = arith.addf %1054, %1075 : vector<16x64xf32>
    %c1_i32_279 = arith.constant 1 : i32
    %1077 = vector.broadcast %c1_i32_279 : i32 to vector<16x1xi32>
    %1078 = arith.addi %923, %1077 : vector<16x1xi32>
    %c4_i32_280 = arith.constant 4 : i32
    %1079 = vector.broadcast %c4_i32_280 : i32 to vector<16x1xi32>
    %1080 = arith.muli %1012, %1079 : vector<16x1xi32>
    %1081 = arith.addi %1080, %1056 : vector<16x1xi32>
    %c4_i32_281 = arith.constant 4 : i32
    %1082 = vector.broadcast %c4_i32_281 : i32 to vector<16x1xi32>
    %1083 = arith.muli %1081, %1082 : vector<16x1xi32>
    %1084 = arith.addi %1083, %1078 : vector<16x1xi32>
    %1085 = vector.broadcast %1084 : vector<16x1xi32> to vector<16x64xi32>
    %1086 = arith.cmpi eq, %31, %1085 : vector<16x64xi32>
    %1087 = arith.mulf %918, %920 : vector<16x1xf32>
    %1088 = arith.mulf %1087, %922 : vector<16x1xf32>
    %1089 = arith.mulf %1088, %924 : vector<16x1xf32>
    %cst_282 = arith.constant 0.000000e+00 : f32
    %1090 = vector.shape_cast %1089 : vector<16x1xf32> to vector<16x1xf32>
    %1091 = vector.broadcast %1090 : vector<16x1xf32> to vector<16x64xf32>
    %1092 = vector.broadcast %cst_282 : f32 to vector<16x64xf32>
    %1093 = arith.select %1086, %1091, %1092 : vector<16x64xi1>, vector<16x64xf32>
    %1094 = arith.addf %1076, %1093 : vector<16x64xf32>
    %1095 = vector.extract_strided_slice %0 {offsets = [0, 6], sizes = [16, 1], strides = [1, 1]} : vector<16x8xf32> to vector<16x1xf32>
    %1096 = vector.extract_strided_slice %9 {offsets = [0, 6], sizes = [16, 1], strides = [1, 1]} : vector<16x8xi32> to vector<16x1xi32>
    %1097 = vector.extract_strided_slice %10 {offsets = [0, 6], sizes = [16, 1], strides = [1, 1]} : vector<16x8xf32> to vector<16x1xf32>
    %1098 = vector.extract_strided_slice %19 {offsets = [0, 6], sizes = [16, 1], strides = [1, 1]} : vector<16x8xi32> to vector<16x1xi32>
    %1099 = vector.extract_strided_slice %20 {offsets = [0, 6], sizes = [16, 1], strides = [1, 1]} : vector<16x8xf32> to vector<16x1xf32>
    %1100 = vector.extract_strided_slice %29 {offsets = [0, 6], sizes = [16, 1], strides = [1, 1]} : vector<16x8xi32> to vector<16x1xi32>
    %1101 = vector.extract_strided_slice %30 {offsets = [0, 6], sizes = [16, 1], strides = [1, 1]} : vector<16x8xf32> to vector<16x1xf32>
    %cst_283 = arith.constant 1.000000e+00 : f32
    %1102 = vector.broadcast %cst_283 : f32 to vector<16x1xf32>
    %1103 = arith.subf %1102, %1097 : vector<16x1xf32>
    %c0_i32_284 = arith.constant 0 : i32
    %1104 = vector.broadcast %c0_i32_284 : i32 to vector<16x1xi32>
    %1105 = arith.addi %1096, %1104 : vector<16x1xi32>
    %cst_285 = arith.constant 1.000000e+00 : f32
    %1106 = vector.broadcast %cst_285 : f32 to vector<16x1xf32>
    %1107 = arith.subf %1106, %1099 : vector<16x1xf32>
    %c0_i32_286 = arith.constant 0 : i32
    %1108 = vector.broadcast %c0_i32_286 : i32 to vector<16x1xi32>
    %1109 = arith.addi %1098, %1108 : vector<16x1xi32>
    %cst_287 = arith.constant 1.000000e+00 : f32
    %1110 = vector.broadcast %cst_287 : f32 to vector<16x1xf32>
    %1111 = arith.subf %1110, %1101 : vector<16x1xf32>
    %c0_i32_288 = arith.constant 0 : i32
    %1112 = vector.broadcast %c0_i32_288 : i32 to vector<16x1xi32>
    %1113 = arith.addi %1100, %1112 : vector<16x1xi32>
    %c4_i32_289 = arith.constant 4 : i32
    %1114 = vector.broadcast %c4_i32_289 : i32 to vector<16x1xi32>
    %1115 = arith.muli %1105, %1114 : vector<16x1xi32>
    %1116 = arith.addi %1115, %1109 : vector<16x1xi32>
    %c4_i32_290 = arith.constant 4 : i32
    %1117 = vector.broadcast %c4_i32_290 : i32 to vector<16x1xi32>
    %1118 = arith.muli %1116, %1117 : vector<16x1xi32>
    %1119 = arith.addi %1118, %1113 : vector<16x1xi32>
    %1120 = vector.broadcast %1119 : vector<16x1xi32> to vector<16x64xi32>
    %1121 = arith.cmpi eq, %31, %1120 : vector<16x64xi32>
    %1122 = arith.mulf %1095, %1103 : vector<16x1xf32>
    %1123 = arith.mulf %1122, %1107 : vector<16x1xf32>
    %1124 = arith.mulf %1123, %1111 : vector<16x1xf32>
    %cst_291 = arith.constant 0.000000e+00 : f32
    %1125 = vector.shape_cast %1124 : vector<16x1xf32> to vector<16x1xf32>
    %1126 = vector.broadcast %1125 : vector<16x1xf32> to vector<16x64xf32>
    %1127 = vector.broadcast %cst_291 : f32 to vector<16x64xf32>
    %1128 = arith.select %1121, %1126, %1127 : vector<16x64xi1>, vector<16x64xf32>
    %1129 = arith.addf %1094, %1128 : vector<16x64xf32>
    %c1_i32_292 = arith.constant 1 : i32
    %1130 = vector.broadcast %c1_i32_292 : i32 to vector<16x1xi32>
    %1131 = arith.addi %1100, %1130 : vector<16x1xi32>
    %c4_i32_293 = arith.constant 4 : i32
    %1132 = vector.broadcast %c4_i32_293 : i32 to vector<16x1xi32>
    %1133 = arith.muli %1105, %1132 : vector<16x1xi32>
    %1134 = arith.addi %1133, %1109 : vector<16x1xi32>
    %c4_i32_294 = arith.constant 4 : i32
    %1135 = vector.broadcast %c4_i32_294 : i32 to vector<16x1xi32>
    %1136 = arith.muli %1134, %1135 : vector<16x1xi32>
    %1137 = arith.addi %1136, %1131 : vector<16x1xi32>
    %1138 = vector.broadcast %1137 : vector<16x1xi32> to vector<16x64xi32>
    %1139 = arith.cmpi eq, %31, %1138 : vector<16x64xi32>
    %1140 = arith.mulf %1095, %1103 : vector<16x1xf32>
    %1141 = arith.mulf %1140, %1107 : vector<16x1xf32>
    %1142 = arith.mulf %1141, %1101 : vector<16x1xf32>
    %cst_295 = arith.constant 0.000000e+00 : f32
    %1143 = vector.shape_cast %1142 : vector<16x1xf32> to vector<16x1xf32>
    %1144 = vector.broadcast %1143 : vector<16x1xf32> to vector<16x64xf32>
    %1145 = vector.broadcast %cst_295 : f32 to vector<16x64xf32>
    %1146 = arith.select %1139, %1144, %1145 : vector<16x64xi1>, vector<16x64xf32>
    %1147 = arith.addf %1129, %1146 : vector<16x64xf32>
    %c1_i32_296 = arith.constant 1 : i32
    %1148 = vector.broadcast %c1_i32_296 : i32 to vector<16x1xi32>
    %1149 = arith.addi %1098, %1148 : vector<16x1xi32>
    %cst_297 = arith.constant 1.000000e+00 : f32
    %1150 = vector.broadcast %cst_297 : f32 to vector<16x1xf32>
    %1151 = arith.subf %1150, %1101 : vector<16x1xf32>
    %c0_i32_298 = arith.constant 0 : i32
    %1152 = vector.broadcast %c0_i32_298 : i32 to vector<16x1xi32>
    %1153 = arith.addi %1100, %1152 : vector<16x1xi32>
    %c4_i32_299 = arith.constant 4 : i32
    %1154 = vector.broadcast %c4_i32_299 : i32 to vector<16x1xi32>
    %1155 = arith.muli %1105, %1154 : vector<16x1xi32>
    %1156 = arith.addi %1155, %1149 : vector<16x1xi32>
    %c4_i32_300 = arith.constant 4 : i32
    %1157 = vector.broadcast %c4_i32_300 : i32 to vector<16x1xi32>
    %1158 = arith.muli %1156, %1157 : vector<16x1xi32>
    %1159 = arith.addi %1158, %1153 : vector<16x1xi32>
    %1160 = vector.broadcast %1159 : vector<16x1xi32> to vector<16x64xi32>
    %1161 = arith.cmpi eq, %31, %1160 : vector<16x64xi32>
    %1162 = arith.mulf %1095, %1103 : vector<16x1xf32>
    %1163 = arith.mulf %1162, %1099 : vector<16x1xf32>
    %1164 = arith.mulf %1163, %1151 : vector<16x1xf32>
    %cst_301 = arith.constant 0.000000e+00 : f32
    %1165 = vector.shape_cast %1164 : vector<16x1xf32> to vector<16x1xf32>
    %1166 = vector.broadcast %1165 : vector<16x1xf32> to vector<16x64xf32>
    %1167 = vector.broadcast %cst_301 : f32 to vector<16x64xf32>
    %1168 = arith.select %1161, %1166, %1167 : vector<16x64xi1>, vector<16x64xf32>
    %1169 = arith.addf %1147, %1168 : vector<16x64xf32>
    %c1_i32_302 = arith.constant 1 : i32
    %1170 = vector.broadcast %c1_i32_302 : i32 to vector<16x1xi32>
    %1171 = arith.addi %1100, %1170 : vector<16x1xi32>
    %c4_i32_303 = arith.constant 4 : i32
    %1172 = vector.broadcast %c4_i32_303 : i32 to vector<16x1xi32>
    %1173 = arith.muli %1105, %1172 : vector<16x1xi32>
    %1174 = arith.addi %1173, %1149 : vector<16x1xi32>
    %c4_i32_304 = arith.constant 4 : i32
    %1175 = vector.broadcast %c4_i32_304 : i32 to vector<16x1xi32>
    %1176 = arith.muli %1174, %1175 : vector<16x1xi32>
    %1177 = arith.addi %1176, %1171 : vector<16x1xi32>
    %1178 = vector.broadcast %1177 : vector<16x1xi32> to vector<16x64xi32>
    %1179 = arith.cmpi eq, %31, %1178 : vector<16x64xi32>
    %1180 = arith.mulf %1095, %1103 : vector<16x1xf32>
    %1181 = arith.mulf %1180, %1099 : vector<16x1xf32>
    %1182 = arith.mulf %1181, %1101 : vector<16x1xf32>
    %cst_305 = arith.constant 0.000000e+00 : f32
    %1183 = vector.shape_cast %1182 : vector<16x1xf32> to vector<16x1xf32>
    %1184 = vector.broadcast %1183 : vector<16x1xf32> to vector<16x64xf32>
    %1185 = vector.broadcast %cst_305 : f32 to vector<16x64xf32>
    %1186 = arith.select %1179, %1184, %1185 : vector<16x64xi1>, vector<16x64xf32>
    %1187 = arith.addf %1169, %1186 : vector<16x64xf32>
    %c1_i32_306 = arith.constant 1 : i32
    %1188 = vector.broadcast %c1_i32_306 : i32 to vector<16x1xi32>
    %1189 = arith.addi %1096, %1188 : vector<16x1xi32>
    %cst_307 = arith.constant 1.000000e+00 : f32
    %1190 = vector.broadcast %cst_307 : f32 to vector<16x1xf32>
    %1191 = arith.subf %1190, %1099 : vector<16x1xf32>
    %c0_i32_308 = arith.constant 0 : i32
    %1192 = vector.broadcast %c0_i32_308 : i32 to vector<16x1xi32>
    %1193 = arith.addi %1098, %1192 : vector<16x1xi32>
    %cst_309 = arith.constant 1.000000e+00 : f32
    %1194 = vector.broadcast %cst_309 : f32 to vector<16x1xf32>
    %1195 = arith.subf %1194, %1101 : vector<16x1xf32>
    %c0_i32_310 = arith.constant 0 : i32
    %1196 = vector.broadcast %c0_i32_310 : i32 to vector<16x1xi32>
    %1197 = arith.addi %1100, %1196 : vector<16x1xi32>
    %c4_i32_311 = arith.constant 4 : i32
    %1198 = vector.broadcast %c4_i32_311 : i32 to vector<16x1xi32>
    %1199 = arith.muli %1189, %1198 : vector<16x1xi32>
    %1200 = arith.addi %1199, %1193 : vector<16x1xi32>
    %c4_i32_312 = arith.constant 4 : i32
    %1201 = vector.broadcast %c4_i32_312 : i32 to vector<16x1xi32>
    %1202 = arith.muli %1200, %1201 : vector<16x1xi32>
    %1203 = arith.addi %1202, %1197 : vector<16x1xi32>
    %1204 = vector.broadcast %1203 : vector<16x1xi32> to vector<16x64xi32>
    %1205 = arith.cmpi eq, %31, %1204 : vector<16x64xi32>
    %1206 = arith.mulf %1095, %1097 : vector<16x1xf32>
    %1207 = arith.mulf %1206, %1191 : vector<16x1xf32>
    %1208 = arith.mulf %1207, %1195 : vector<16x1xf32>
    %cst_313 = arith.constant 0.000000e+00 : f32
    %1209 = vector.shape_cast %1208 : vector<16x1xf32> to vector<16x1xf32>
    %1210 = vector.broadcast %1209 : vector<16x1xf32> to vector<16x64xf32>
    %1211 = vector.broadcast %cst_313 : f32 to vector<16x64xf32>
    %1212 = arith.select %1205, %1210, %1211 : vector<16x64xi1>, vector<16x64xf32>
    %1213 = arith.addf %1187, %1212 : vector<16x64xf32>
    %c1_i32_314 = arith.constant 1 : i32
    %1214 = vector.broadcast %c1_i32_314 : i32 to vector<16x1xi32>
    %1215 = arith.addi %1100, %1214 : vector<16x1xi32>
    %c4_i32_315 = arith.constant 4 : i32
    %1216 = vector.broadcast %c4_i32_315 : i32 to vector<16x1xi32>
    %1217 = arith.muli %1189, %1216 : vector<16x1xi32>
    %1218 = arith.addi %1217, %1193 : vector<16x1xi32>
    %c4_i32_316 = arith.constant 4 : i32
    %1219 = vector.broadcast %c4_i32_316 : i32 to vector<16x1xi32>
    %1220 = arith.muli %1218, %1219 : vector<16x1xi32>
    %1221 = arith.addi %1220, %1215 : vector<16x1xi32>
    %1222 = vector.broadcast %1221 : vector<16x1xi32> to vector<16x64xi32>
    %1223 = arith.cmpi eq, %31, %1222 : vector<16x64xi32>
    %1224 = arith.mulf %1095, %1097 : vector<16x1xf32>
    %1225 = arith.mulf %1224, %1191 : vector<16x1xf32>
    %1226 = arith.mulf %1225, %1101 : vector<16x1xf32>
    %cst_317 = arith.constant 0.000000e+00 : f32
    %1227 = vector.shape_cast %1226 : vector<16x1xf32> to vector<16x1xf32>
    %1228 = vector.broadcast %1227 : vector<16x1xf32> to vector<16x64xf32>
    %1229 = vector.broadcast %cst_317 : f32 to vector<16x64xf32>
    %1230 = arith.select %1223, %1228, %1229 : vector<16x64xi1>, vector<16x64xf32>
    %1231 = arith.addf %1213, %1230 : vector<16x64xf32>
    %c1_i32_318 = arith.constant 1 : i32
    %1232 = vector.broadcast %c1_i32_318 : i32 to vector<16x1xi32>
    %1233 = arith.addi %1098, %1232 : vector<16x1xi32>
    %cst_319 = arith.constant 1.000000e+00 : f32
    %1234 = vector.broadcast %cst_319 : f32 to vector<16x1xf32>
    %1235 = arith.subf %1234, %1101 : vector<16x1xf32>
    %c0_i32_320 = arith.constant 0 : i32
    %1236 = vector.broadcast %c0_i32_320 : i32 to vector<16x1xi32>
    %1237 = arith.addi %1100, %1236 : vector<16x1xi32>
    %c4_i32_321 = arith.constant 4 : i32
    %1238 = vector.broadcast %c4_i32_321 : i32 to vector<16x1xi32>
    %1239 = arith.muli %1189, %1238 : vector<16x1xi32>
    %1240 = arith.addi %1239, %1233 : vector<16x1xi32>
    %c4_i32_322 = arith.constant 4 : i32
    %1241 = vector.broadcast %c4_i32_322 : i32 to vector<16x1xi32>
    %1242 = arith.muli %1240, %1241 : vector<16x1xi32>
    %1243 = arith.addi %1242, %1237 : vector<16x1xi32>
    %1244 = vector.broadcast %1243 : vector<16x1xi32> to vector<16x64xi32>
    %1245 = arith.cmpi eq, %31, %1244 : vector<16x64xi32>
    %1246 = arith.mulf %1095, %1097 : vector<16x1xf32>
    %1247 = arith.mulf %1246, %1099 : vector<16x1xf32>
    %1248 = arith.mulf %1247, %1235 : vector<16x1xf32>
    %cst_323 = arith.constant 0.000000e+00 : f32
    %1249 = vector.shape_cast %1248 : vector<16x1xf32> to vector<16x1xf32>
    %1250 = vector.broadcast %1249 : vector<16x1xf32> to vector<16x64xf32>
    %1251 = vector.broadcast %cst_323 : f32 to vector<16x64xf32>
    %1252 = arith.select %1245, %1250, %1251 : vector<16x64xi1>, vector<16x64xf32>
    %1253 = arith.addf %1231, %1252 : vector<16x64xf32>
    %c1_i32_324 = arith.constant 1 : i32
    %1254 = vector.broadcast %c1_i32_324 : i32 to vector<16x1xi32>
    %1255 = arith.addi %1100, %1254 : vector<16x1xi32>
    %c4_i32_325 = arith.constant 4 : i32
    %1256 = vector.broadcast %c4_i32_325 : i32 to vector<16x1xi32>
    %1257 = arith.muli %1189, %1256 : vector<16x1xi32>
    %1258 = arith.addi %1257, %1233 : vector<16x1xi32>
    %c4_i32_326 = arith.constant 4 : i32
    %1259 = vector.broadcast %c4_i32_326 : i32 to vector<16x1xi32>
    %1260 = arith.muli %1258, %1259 : vector<16x1xi32>
    %1261 = arith.addi %1260, %1255 : vector<16x1xi32>
    %1262 = vector.broadcast %1261 : vector<16x1xi32> to vector<16x64xi32>
    %1263 = arith.cmpi eq, %31, %1262 : vector<16x64xi32>
    %1264 = arith.mulf %1095, %1097 : vector<16x1xf32>
    %1265 = arith.mulf %1264, %1099 : vector<16x1xf32>
    %1266 = arith.mulf %1265, %1101 : vector<16x1xf32>
    %cst_327 = arith.constant 0.000000e+00 : f32
    %1267 = vector.shape_cast %1266 : vector<16x1xf32> to vector<16x1xf32>
    %1268 = vector.broadcast %1267 : vector<16x1xf32> to vector<16x64xf32>
    %1269 = vector.broadcast %cst_327 : f32 to vector<16x64xf32>
    %1270 = arith.select %1263, %1268, %1269 : vector<16x64xi1>, vector<16x64xf32>
    %1271 = arith.addf %1253, %1270 : vector<16x64xf32>
    %1272 = vector.extract_strided_slice %0 {offsets = [0, 7], sizes = [16, 1], strides = [1, 1]} : vector<16x8xf32> to vector<16x1xf32>
    %1273 = vector.extract_strided_slice %9 {offsets = [0, 7], sizes = [16, 1], strides = [1, 1]} : vector<16x8xi32> to vector<16x1xi32>
    %1274 = vector.extract_strided_slice %10 {offsets = [0, 7], sizes = [16, 1], strides = [1, 1]} : vector<16x8xf32> to vector<16x1xf32>
    %1275 = vector.extract_strided_slice %19 {offsets = [0, 7], sizes = [16, 1], strides = [1, 1]} : vector<16x8xi32> to vector<16x1xi32>
    %1276 = vector.extract_strided_slice %20 {offsets = [0, 7], sizes = [16, 1], strides = [1, 1]} : vector<16x8xf32> to vector<16x1xf32>
    %1277 = vector.extract_strided_slice %29 {offsets = [0, 7], sizes = [16, 1], strides = [1, 1]} : vector<16x8xi32> to vector<16x1xi32>
    %1278 = vector.extract_strided_slice %30 {offsets = [0, 7], sizes = [16, 1], strides = [1, 1]} : vector<16x8xf32> to vector<16x1xf32>
    %cst_328 = arith.constant 1.000000e+00 : f32
    %1279 = vector.broadcast %cst_328 : f32 to vector<16x1xf32>
    %1280 = arith.subf %1279, %1274 : vector<16x1xf32>
    %c0_i32_329 = arith.constant 0 : i32
    %1281 = vector.broadcast %c0_i32_329 : i32 to vector<16x1xi32>
    %1282 = arith.addi %1273, %1281 : vector<16x1xi32>
    %cst_330 = arith.constant 1.000000e+00 : f32
    %1283 = vector.broadcast %cst_330 : f32 to vector<16x1xf32>
    %1284 = arith.subf %1283, %1276 : vector<16x1xf32>
    %c0_i32_331 = arith.constant 0 : i32
    %1285 = vector.broadcast %c0_i32_331 : i32 to vector<16x1xi32>
    %1286 = arith.addi %1275, %1285 : vector<16x1xi32>
    %cst_332 = arith.constant 1.000000e+00 : f32
    %1287 = vector.broadcast %cst_332 : f32 to vector<16x1xf32>
    %1288 = arith.subf %1287, %1278 : vector<16x1xf32>
    %c0_i32_333 = arith.constant 0 : i32
    %1289 = vector.broadcast %c0_i32_333 : i32 to vector<16x1xi32>
    %1290 = arith.addi %1277, %1289 : vector<16x1xi32>
    %c4_i32_334 = arith.constant 4 : i32
    %1291 = vector.broadcast %c4_i32_334 : i32 to vector<16x1xi32>
    %1292 = arith.muli %1282, %1291 : vector<16x1xi32>
    %1293 = arith.addi %1292, %1286 : vector<16x1xi32>
    %c4_i32_335 = arith.constant 4 : i32
    %1294 = vector.broadcast %c4_i32_335 : i32 to vector<16x1xi32>
    %1295 = arith.muli %1293, %1294 : vector<16x1xi32>
    %1296 = arith.addi %1295, %1290 : vector<16x1xi32>
    %1297 = vector.broadcast %1296 : vector<16x1xi32> to vector<16x64xi32>
    %1298 = arith.cmpi eq, %31, %1297 : vector<16x64xi32>
    %1299 = arith.mulf %1272, %1280 : vector<16x1xf32>
    %1300 = arith.mulf %1299, %1284 : vector<16x1xf32>
    %1301 = arith.mulf %1300, %1288 : vector<16x1xf32>
    %cst_336 = arith.constant 0.000000e+00 : f32
    %1302 = vector.shape_cast %1301 : vector<16x1xf32> to vector<16x1xf32>
    %1303 = vector.broadcast %1302 : vector<16x1xf32> to vector<16x64xf32>
    %1304 = vector.broadcast %cst_336 : f32 to vector<16x64xf32>
    %1305 = arith.select %1298, %1303, %1304 : vector<16x64xi1>, vector<16x64xf32>
    %1306 = arith.addf %1271, %1305 : vector<16x64xf32>
    %c1_i32_337 = arith.constant 1 : i32
    %1307 = vector.broadcast %c1_i32_337 : i32 to vector<16x1xi32>
    %1308 = arith.addi %1277, %1307 : vector<16x1xi32>
    %c4_i32_338 = arith.constant 4 : i32
    %1309 = vector.broadcast %c4_i32_338 : i32 to vector<16x1xi32>
    %1310 = arith.muli %1282, %1309 : vector<16x1xi32>
    %1311 = arith.addi %1310, %1286 : vector<16x1xi32>
    %c4_i32_339 = arith.constant 4 : i32
    %1312 = vector.broadcast %c4_i32_339 : i32 to vector<16x1xi32>
    %1313 = arith.muli %1311, %1312 : vector<16x1xi32>
    %1314 = arith.addi %1313, %1308 : vector<16x1xi32>
    %1315 = vector.broadcast %1314 : vector<16x1xi32> to vector<16x64xi32>
    %1316 = arith.cmpi eq, %31, %1315 : vector<16x64xi32>
    %1317 = arith.mulf %1272, %1280 : vector<16x1xf32>
    %1318 = arith.mulf %1317, %1284 : vector<16x1xf32>
    %1319 = arith.mulf %1318, %1278 : vector<16x1xf32>
    %cst_340 = arith.constant 0.000000e+00 : f32
    %1320 = vector.shape_cast %1319 : vector<16x1xf32> to vector<16x1xf32>
    %1321 = vector.broadcast %1320 : vector<16x1xf32> to vector<16x64xf32>
    %1322 = vector.broadcast %cst_340 : f32 to vector<16x64xf32>
    %1323 = arith.select %1316, %1321, %1322 : vector<16x64xi1>, vector<16x64xf32>
    %1324 = arith.addf %1306, %1323 : vector<16x64xf32>
    %c1_i32_341 = arith.constant 1 : i32
    %1325 = vector.broadcast %c1_i32_341 : i32 to vector<16x1xi32>
    %1326 = arith.addi %1275, %1325 : vector<16x1xi32>
    %cst_342 = arith.constant 1.000000e+00 : f32
    %1327 = vector.broadcast %cst_342 : f32 to vector<16x1xf32>
    %1328 = arith.subf %1327, %1278 : vector<16x1xf32>
    %c0_i32_343 = arith.constant 0 : i32
    %1329 = vector.broadcast %c0_i32_343 : i32 to vector<16x1xi32>
    %1330 = arith.addi %1277, %1329 : vector<16x1xi32>
    %c4_i32_344 = arith.constant 4 : i32
    %1331 = vector.broadcast %c4_i32_344 : i32 to vector<16x1xi32>
    %1332 = arith.muli %1282, %1331 : vector<16x1xi32>
    %1333 = arith.addi %1332, %1326 : vector<16x1xi32>
    %c4_i32_345 = arith.constant 4 : i32
    %1334 = vector.broadcast %c4_i32_345 : i32 to vector<16x1xi32>
    %1335 = arith.muli %1333, %1334 : vector<16x1xi32>
    %1336 = arith.addi %1335, %1330 : vector<16x1xi32>
    %1337 = vector.broadcast %1336 : vector<16x1xi32> to vector<16x64xi32>
    %1338 = arith.cmpi eq, %31, %1337 : vector<16x64xi32>
    %1339 = arith.mulf %1272, %1280 : vector<16x1xf32>
    %1340 = arith.mulf %1339, %1276 : vector<16x1xf32>
    %1341 = arith.mulf %1340, %1328 : vector<16x1xf32>
    %cst_346 = arith.constant 0.000000e+00 : f32
    %1342 = vector.shape_cast %1341 : vector<16x1xf32> to vector<16x1xf32>
    %1343 = vector.broadcast %1342 : vector<16x1xf32> to vector<16x64xf32>
    %1344 = vector.broadcast %cst_346 : f32 to vector<16x64xf32>
    %1345 = arith.select %1338, %1343, %1344 : vector<16x64xi1>, vector<16x64xf32>
    %1346 = arith.addf %1324, %1345 : vector<16x64xf32>
    %c1_i32_347 = arith.constant 1 : i32
    %1347 = vector.broadcast %c1_i32_347 : i32 to vector<16x1xi32>
    %1348 = arith.addi %1277, %1347 : vector<16x1xi32>
    %c4_i32_348 = arith.constant 4 : i32
    %1349 = vector.broadcast %c4_i32_348 : i32 to vector<16x1xi32>
    %1350 = arith.muli %1282, %1349 : vector<16x1xi32>
    %1351 = arith.addi %1350, %1326 : vector<16x1xi32>
    %c4_i32_349 = arith.constant 4 : i32
    %1352 = vector.broadcast %c4_i32_349 : i32 to vector<16x1xi32>
    %1353 = arith.muli %1351, %1352 : vector<16x1xi32>
    %1354 = arith.addi %1353, %1348 : vector<16x1xi32>
    %1355 = vector.broadcast %1354 : vector<16x1xi32> to vector<16x64xi32>
    %1356 = arith.cmpi eq, %31, %1355 : vector<16x64xi32>
    %1357 = arith.mulf %1272, %1280 : vector<16x1xf32>
    %1358 = arith.mulf %1357, %1276 : vector<16x1xf32>
    %1359 = arith.mulf %1358, %1278 : vector<16x1xf32>
    %cst_350 = arith.constant 0.000000e+00 : f32
    %1360 = vector.shape_cast %1359 : vector<16x1xf32> to vector<16x1xf32>
    %1361 = vector.broadcast %1360 : vector<16x1xf32> to vector<16x64xf32>
    %1362 = vector.broadcast %cst_350 : f32 to vector<16x64xf32>
    %1363 = arith.select %1356, %1361, %1362 : vector<16x64xi1>, vector<16x64xf32>
    %1364 = arith.addf %1346, %1363 : vector<16x64xf32>
    %c1_i32_351 = arith.constant 1 : i32
    %1365 = vector.broadcast %c1_i32_351 : i32 to vector<16x1xi32>
    %1366 = arith.addi %1273, %1365 : vector<16x1xi32>
    %cst_352 = arith.constant 1.000000e+00 : f32
    %1367 = vector.broadcast %cst_352 : f32 to vector<16x1xf32>
    %1368 = arith.subf %1367, %1276 : vector<16x1xf32>
    %c0_i32_353 = arith.constant 0 : i32
    %1369 = vector.broadcast %c0_i32_353 : i32 to vector<16x1xi32>
    %1370 = arith.addi %1275, %1369 : vector<16x1xi32>
    %cst_354 = arith.constant 1.000000e+00 : f32
    %1371 = vector.broadcast %cst_354 : f32 to vector<16x1xf32>
    %1372 = arith.subf %1371, %1278 : vector<16x1xf32>
    %c0_i32_355 = arith.constant 0 : i32
    %1373 = vector.broadcast %c0_i32_355 : i32 to vector<16x1xi32>
    %1374 = arith.addi %1277, %1373 : vector<16x1xi32>
    %c4_i32_356 = arith.constant 4 : i32
    %1375 = vector.broadcast %c4_i32_356 : i32 to vector<16x1xi32>
    %1376 = arith.muli %1366, %1375 : vector<16x1xi32>
    %1377 = arith.addi %1376, %1370 : vector<16x1xi32>
    %c4_i32_357 = arith.constant 4 : i32
    %1378 = vector.broadcast %c4_i32_357 : i32 to vector<16x1xi32>
    %1379 = arith.muli %1377, %1378 : vector<16x1xi32>
    %1380 = arith.addi %1379, %1374 : vector<16x1xi32>
    %1381 = vector.broadcast %1380 : vector<16x1xi32> to vector<16x64xi32>
    %1382 = arith.cmpi eq, %31, %1381 : vector<16x64xi32>
    %1383 = arith.mulf %1272, %1274 : vector<16x1xf32>
    %1384 = arith.mulf %1383, %1368 : vector<16x1xf32>
    %1385 = arith.mulf %1384, %1372 : vector<16x1xf32>
    %cst_358 = arith.constant 0.000000e+00 : f32
    %1386 = vector.shape_cast %1385 : vector<16x1xf32> to vector<16x1xf32>
    %1387 = vector.broadcast %1386 : vector<16x1xf32> to vector<16x64xf32>
    %1388 = vector.broadcast %cst_358 : f32 to vector<16x64xf32>
    %1389 = arith.select %1382, %1387, %1388 : vector<16x64xi1>, vector<16x64xf32>
    %1390 = arith.addf %1364, %1389 : vector<16x64xf32>
    %c1_i32_359 = arith.constant 1 : i32
    %1391 = vector.broadcast %c1_i32_359 : i32 to vector<16x1xi32>
    %1392 = arith.addi %1277, %1391 : vector<16x1xi32>
    %c4_i32_360 = arith.constant 4 : i32
    %1393 = vector.broadcast %c4_i32_360 : i32 to vector<16x1xi32>
    %1394 = arith.muli %1366, %1393 : vector<16x1xi32>
    %1395 = arith.addi %1394, %1370 : vector<16x1xi32>
    %c4_i32_361 = arith.constant 4 : i32
    %1396 = vector.broadcast %c4_i32_361 : i32 to vector<16x1xi32>
    %1397 = arith.muli %1395, %1396 : vector<16x1xi32>
    %1398 = arith.addi %1397, %1392 : vector<16x1xi32>
    %1399 = vector.broadcast %1398 : vector<16x1xi32> to vector<16x64xi32>
    %1400 = arith.cmpi eq, %31, %1399 : vector<16x64xi32>
    %1401 = arith.mulf %1272, %1274 : vector<16x1xf32>
    %1402 = arith.mulf %1401, %1368 : vector<16x1xf32>
    %1403 = arith.mulf %1402, %1278 : vector<16x1xf32>
    %cst_362 = arith.constant 0.000000e+00 : f32
    %1404 = vector.shape_cast %1403 : vector<16x1xf32> to vector<16x1xf32>
    %1405 = vector.broadcast %1404 : vector<16x1xf32> to vector<16x64xf32>
    %1406 = vector.broadcast %cst_362 : f32 to vector<16x64xf32>
    %1407 = arith.select %1400, %1405, %1406 : vector<16x64xi1>, vector<16x64xf32>
    %1408 = arith.addf %1390, %1407 : vector<16x64xf32>
    %c1_i32_363 = arith.constant 1 : i32
    %1409 = vector.broadcast %c1_i32_363 : i32 to vector<16x1xi32>
    %1410 = arith.addi %1275, %1409 : vector<16x1xi32>
    %cst_364 = arith.constant 1.000000e+00 : f32
    %1411 = vector.broadcast %cst_364 : f32 to vector<16x1xf32>
    %1412 = arith.subf %1411, %1278 : vector<16x1xf32>
    %c0_i32_365 = arith.constant 0 : i32
    %1413 = vector.broadcast %c0_i32_365 : i32 to vector<16x1xi32>
    %1414 = arith.addi %1277, %1413 : vector<16x1xi32>
    %c4_i32_366 = arith.constant 4 : i32
    %1415 = vector.broadcast %c4_i32_366 : i32 to vector<16x1xi32>
    %1416 = arith.muli %1366, %1415 : vector<16x1xi32>
    %1417 = arith.addi %1416, %1410 : vector<16x1xi32>
    %c4_i32_367 = arith.constant 4 : i32
    %1418 = vector.broadcast %c4_i32_367 : i32 to vector<16x1xi32>
    %1419 = arith.muli %1417, %1418 : vector<16x1xi32>
    %1420 = arith.addi %1419, %1414 : vector<16x1xi32>
    %1421 = vector.broadcast %1420 : vector<16x1xi32> to vector<16x64xi32>
    %1422 = arith.cmpi eq, %31, %1421 : vector<16x64xi32>
    %1423 = arith.mulf %1272, %1274 : vector<16x1xf32>
    %1424 = arith.mulf %1423, %1276 : vector<16x1xf32>
    %1425 = arith.mulf %1424, %1412 : vector<16x1xf32>
    %cst_368 = arith.constant 0.000000e+00 : f32
    %1426 = vector.shape_cast %1425 : vector<16x1xf32> to vector<16x1xf32>
    %1427 = vector.broadcast %1426 : vector<16x1xf32> to vector<16x64xf32>
    %1428 = vector.broadcast %cst_368 : f32 to vector<16x64xf32>
    %1429 = arith.select %1422, %1427, %1428 : vector<16x64xi1>, vector<16x64xf32>
    %1430 = arith.addf %1408, %1429 : vector<16x64xf32>
    %c1_i32_369 = arith.constant 1 : i32
    %1431 = vector.broadcast %c1_i32_369 : i32 to vector<16x1xi32>
    %1432 = arith.addi %1277, %1431 : vector<16x1xi32>
    %c4_i32_370 = arith.constant 4 : i32
    %1433 = vector.broadcast %c4_i32_370 : i32 to vector<16x1xi32>
    %1434 = arith.muli %1366, %1433 : vector<16x1xi32>
    %1435 = arith.addi %1434, %1410 : vector<16x1xi32>
    %c4_i32_371 = arith.constant 4 : i32
    %1436 = vector.broadcast %c4_i32_371 : i32 to vector<16x1xi32>
    %1437 = arith.muli %1435, %1436 : vector<16x1xi32>
    %1438 = arith.addi %1437, %1432 : vector<16x1xi32>
    %1439 = vector.broadcast %1438 : vector<16x1xi32> to vector<16x64xi32>
    %1440 = arith.cmpi eq, %31, %1439 : vector<16x64xi32>
    %1441 = arith.mulf %1272, %1274 : vector<16x1xf32>
    %1442 = arith.mulf %1441, %1276 : vector<16x1xf32>
    %1443 = arith.mulf %1442, %1278 : vector<16x1xf32>
    %cst_372 = arith.constant 0.000000e+00 : f32
    %1444 = vector.shape_cast %1443 : vector<16x1xf32> to vector<16x1xf32>
    %1445 = vector.broadcast %1444 : vector<16x1xf32> to vector<16x64xf32>
    %1446 = vector.broadcast %cst_372 : f32 to vector<16x64xf32>
    %1447 = arith.select %1440, %1445, %1446 : vector<16x64xi1>, vector<16x64xf32>
    %1448 = arith.addf %1430, %1447 : vector<16x64xf32>
    %c0_373 = arith.constant 0 : index
    %c0_374 = arith.constant 0 : index
    %1449 = vector.load %arg5[%c0_373, %c0_374] : memref<16x64xf32, #tpu.memory_space<vmem>>, vector<16x64xf32>
    tpu.vector_store %arg5[%c0_373, %c0_374], %1448 {strides = array<i32>} : memref<16x64xf32, #tpu.memory_space<vmem>>, vector<16x64xf32>,
    return
  }
  func.func @transform_0(%arg0: i32) -> (i32, i32) {
    %c0_i32 = arith.constant 0 : i32
    %c0_i32_0 = arith.constant 0 : i32
    return %arg0, %c0_i32 : i32, i32
  }
  func.func @transform_1(%arg0: i32) -> (i32, i32) {
    %c0_i32 = arith.constant 0 : i32
    %c0_i32_0 = arith.constant 0 : i32
    return %arg0, %c0_i32 : i32, i32
  }
  func.func @transform_2(%arg0: i32) -> (i32, i32) {
    %c0_i32 = arith.constant 0 : i32
    %c0_i32_0 = arith.constant 0 : i32
    return %arg0, %c0_i32 : i32, i32
  }
  func.func @transform_3(%arg0: i32) -> (i32, i32) {
    %c0_i32 = arith.constant 0 : i32
    %c0_i32_0 = arith.constant 0 : i32
    return %arg0, %c0_i32 : i32, i32
  }
  func.func @transform_4(%arg0: i32) -> (i32, i32) {
    %c0_i32 = arith.constant 0 : i32
    %c0_i32_0 = arith.constant 0 : i32
    return %arg0, %c0_i32 : i32, i32
  }
}

</mosaic_0001>

<bundles_post_ra>
// kernel: tpu_custom_call.1
= control target key start
LH: loop header
LB: loop body
LE: loop exit
PB: predicated region body
PF: predicated region fallthrough
CT: control target
= control target key end

     0   :  { %v1516_v2 = vmov 0   ;;  %s2586_s0 = inlined_call_operand.vmem [shape: f32[16,8], index: 0, kind: input, shape index: {}]   ;;  %s2587_s1 = inlined_call_operand.vmem [shape: f32[16,8], index: 1, kind: input, shape index: {}]   ;;  %s2588_s2 = inlined_call_operand.vmem [shape: f32[16,8], index: 2, kind: input, shape index: {}]   ;;  %s2589_s3 = inlined_call_operand.vmem [shape: f32[16,8], index: 3, kind: input, shape index: {}]   ;;  %s2590_s4 = inlined_call_operand.hbm [shape: f32[16,64], index: 4, kind: output, shape index: {}]  }
   0x1   :  { %v20_v0 = vld [vmem:[%s2587_s1] sm:$0xff]  ;;  %1479 = vset.pattern.permute.xlu0 %v1516_v2  ;;  %1478 = vset.pattern.permute.xlu1 %v1516_v2  ;;  %v21_v6 = vld [vmem:[%s2587_s1 + $0x8] sm:$0xff] }
   0x2   :  { %v34_v1 = vld [vmem:[%s2588_s2] sm:$0xff]  ;;  %v22_v3 = vmax.f32 %v20_v0, -2.0  ;;  %v23_v8 = vmax.f32 %v21_v6, -2.0  ;;  %v35_v9 = vld [vmem:[%s2588_s2 + $0x8] sm:$0xff] }
   0x3   :  { %v36_v4 = vmax.f32 %v34_v1, -2.0  ;;  %v48_v5 = vld [vmem:[%s2589_s3] sm:$0xff]  ;;  %v49_v10 = vld [vmem:[%s2589_s3 + $0x8] sm:$0xff] }
   0x4   :  { %v50_v7 = vmax.f32 %v48_v5, -2.0 }
   0x5   :  { %9 = vsyncpa [#allocation3], 0  ;;  %v24_v11 = vmin.f32 %v22_v3, 1.0  ;;  %v38_v12 = vmin.f32 %v36_v4, 1.0  ;;  %v37_v13 = vmax.f32 %v35_v9, -2.0  ;;  %v51_v14 = vmax.f32 %v49_v10, -2.0 }
   0x6   :  { %v52_v15 = vmin.f32 %v50_v7, 1.0  ;;  %v25_v16 = vmin.f32 %v23_v8, 1.0  ;;  %v1577_v33 = vld [vmem:[%s2586_s0] sm:$0xff]  ;;  %v1588_v40 = vld [vmem:[%s2586_s0 + $0x8] sm:$0xff]  ;;  %s1524_s0 = smov [#allocation2]  }
   0x7   :  { %v26_v17 = vadd.f32 2.0, %v24_v11  ;;  %v40_v18 = vadd.f32 2.0, %v38_v12  ;;  %v39_v19 = vmin.f32 %v37_v13, 1.0  ;;  %v53_v20 = vmin.f32 %v51_v14, 1.0  ;;  %s1444_s28 = sshll.u32 %s1524_s0, 4  ;;  %s1445_s28 = int_to_ptr.vmem [resolvable:$true] %s1444_s28 }
   0x8   :  { %v54_v21 = vadd.f32 2.0, %v52_v15  ;;  %v27_v22 = vadd.f32 2.0, %v25_v16  ;;  %s1494_s29 = scalar_lea.vmem %s1445_s28, 256  ;;  %p1499_p1 = scmp.lt.s32.totalorder %s1445_s28, %s1445_s28 }
   0x9   :  { %v28_v23 = vfloor.f32 %v26_v17  ;;  %v42_v24 = vfloor.f32 %v40_v18  ;;  %v41_v25 = vadd.f32 2.0, %v39_v19  ;;  %v55_v26 = vadd.f32 2.0, %v53_v20  ;;  %p1495_p0 = scmp.ne.s32.totalorder %s1445_s28, %s1494_s29  ;;  %p1500_p2 = scmp.lt.s32.totalorder %s1494_s29, %s1494_s29 }
   0xa   :  { %v56_v27 = vfloor.f32 %v54_v21  ;;  %v29_v28 = vfloor.f32 %v27_v22 }
   0xb   :  { %v1570_v29 = vsub.f32 %v26_v17, %v28_v23  ;;  %v1572_v30 = vsub.f32 %v40_v18, %v42_v24  ;;  %v43_v31 = vfloor.f32 %v41_v25  ;;  %v57_v32 = vfloor.f32 %v55_v26  ;;  %p1501_p3 = por %p1500_p2, %p1499_p1 }
   0xc   :  { %v1579_v34 = vsub.f32 %v54_v21, %v56_v27  ;;  %v1581_v35 = vsub.f32 %v27_v22, %v29_v28  ;;  %v1455_v36 = vtrunc.f32 %v28_v23  ;;  %v1459_v37 = vtrunc.f32 %v42_v24 }
   0xd   :  { %v64_v38 = vsub.f32 1.0, %v1570_v29  ;;  %v66_v39 = vsub.f32 1.0, %v1572_v30  ;;  %v1590_v41 = vsub.f32 %v41_v25, %v43_v31  ;;  %v1592_v42 = vsub.f32 %v55_v26, %v57_v32  ;;  %p1502_p4 = pnand %p1501_p3, %p1495_p0 }
   0xe   :  { %v65_v43 = vsub.f32 1.0, %v1581_v35  ;;  %v1456_v44 = vcvt.f32.s32 %v1455_v36  ;;  %v1460_v45 = vcvt.f32.s32 %v1459_v37  ;;  %v1597_v47 = vsub.f32 1.0, %v1579_v34 }
   0xf   :  { %v86_v46 = vmul.f32 %v64_v38, %v1577_v33  ;;  %v67_v48 = vsub.f32 1.0, %v1590_v41  ;;  %v1457_v51 = vtrunc.f32 %v29_v28  ;;  %v1461_v52 = vtrunc.f32 %v43_v31 }
  0x10   :  { %v87_v49 = vmul.f32 %v65_v43, %v1588_v40  ;;  %v70_v50 = vmul.u32 4, %v1456_v44  ;;  %v1605_v55 = vsub.f32 1.0, %v1592_v42  ;;  %v1463_v56 = vtrunc.f32 %v56_v27 }
  0x11   :  { %v88_v53 = vmul.f32 %v86_v46, %v66_v39  ;;  %v150_v54 = vmul.f32 %v86_v46, %v1572_v30  ;;  %v1458_v59 = vcvt.f32.s32 %v1457_v51  ;;  %v1462_v60 = vcvt.f32.s32 %v1461_v52 }
  0x12   :  { %v89_v57 = vmul.f32 %v87_v49, %v67_v48  ;;  %v72_v58 = vadd.s32 %v1460_v45, %v70_v50  ;;  %v1465_v63 = vtrunc.f32 %v57_v32  ;;  %v1623_v3 = vcvt.f32.s32 %v1463_v56 }
  0x13   :  { %v1610_v61 = vmul.f32 %v88_v53, %v1579_v34  ;;  %v1613_v62 = vmul.f32 %v88_v53, %v1597_v47  ;;  %v71_v0 = vmul.u32 4, %v1458_v59  ;;  %v1618_v1 = vmul.f32 %v150_v54, %v1597_v47 }
  0x14   :  { %v1621_v2 = vmul.f32 %v89_v57, %v1605_v55  ;;  %v74_v4 = vmul.u32 4, %v72_v58  ;;  %v1626_v6 = vmul.f32 %v89_v57, %v1592_v42  ;;  %v1628_v7 = vcvt.f32.s32 %v1465_v63 }
  0x15   :  { %2623 = vst [vmem:[#allocation5_spill] sm:$0xff] %v1610_v61  ;;  %2624 = vst [vmem:[#allocation6_spill] sm:$0xff] %v1613_v62  ;;  %122 = vperm.xlu0 %1479, %v1610_v61   ;;  %94 = vperm.xlu1 %1478, %v1613_v62   ;;  %v73_v5 = vadd.s32 %v1462_v60, %v71_v0  ;;  %v151_v8 = vmul.f32 %v87_v49, %v1590_v41  ;;  %v134_v11 = vadd.s32 1, %v1460_v45 }
  0x16   :  { %2625 = vst [vmem:[#allocation7_spill] sm:$0xff] %v1618_v1  ;;  %v1634_v9 = vadd.s32 %v1623_v3, %v74_v4  ;;  %v135_v12 = vadd.s32 1, %v1462_v60  ;;  %v1640_v14 = vadd.s32 1, %v1623_v3  ;;  %v1648_v16 = vadd.s32 1, %v1628_v7 }
  0x17   :  { %v75_v10 = vmul.u32 4, %v73_v5  ;;  %v1637_v13 = vmul.f32 %v151_v8, %v1605_v55  ;;  %v136_v17 = vadd.s32 %v134_v11, %v70_v50  ;;  %v194_v20 = vadd.s32 1, %v1456_v44 }
  0x18   :  { %v137_v18 = vadd.s32 %v135_v12, %v71_v0  ;;  %v1651_v19 = vadd.s32 %v1640_v14, %v74_v4  ;;  %v195_v24 = vadd.s32 1, %v1458_v59  ;;  %v1675_v38 = vmul.f32 %v150_v54, %v1579_v34 }
  0x19   :  { %156 = vperm.xlu0 %1479, %v1618_v1   ;;  %99 = vperm.xlu1 %1478, %v1621_v2   ;;  %v1645_v15 = vadd.s32 %v1628_v7, %v75_v10  ;;  %v1656_v21 = vadd.s32 %v1648_v16, %v75_v10  ;;  %v138_v22 = vmul.u32 4, %v136_v17  ;;  %v196_v27 = vmul.u32 4, %v194_v20 }
  0x1a   :  { %2627 = vst [vmem:[#allocation9_spill] sm:$0xff] %v1651_v19  ;;  %v139_v23 = vmul.u32 4, %v137_v18  ;;  %v197_v28 = vmul.u32 4, %v195_v24  ;;  %2632 = vst [vmem:[#allocation14_spill] sm:$0xff] %v1675_v38  ;;  %v212_v43 = vmul.f32 %v1570_v29, %v1577_v33  ;;  %v1682_v44 = vmul.f32 %v151_v8, %v1592_v42 }
  0x1b   :  { %2626 = vst [vmem:[#allocation8_spill] sm:$0xff] %v1645_v15  ;;  %v1661_v25 = vadd.s32 %v1623_v3, %v138_v22  ;;  %v1667_v31 = vadd.s32 %v138_v22, %v1640_v14  ;;  %v198_v36 = vadd.s32 %v1460_v45, %v196_v27  ;;  %v213_v50 = vmul.f32 %v1581_v35, %v1588_v40 }
  0x1c   :  { %v1664_v26 = vadd.s32 %v1628_v7, %v139_v23  ;;  %v1672_v32 = vadd.s32 %v139_v23, %v1648_v16  ;;  %v199_v37 = vadd.s32 %v1462_v60, %v197_v28  ;;  %2633 = vst [vmem:[#allocation15_spill] sm:$0xff] %v1682_v44  ;;  %v214_v45 = vmul.f32 %v212_v43, %v66_v39 }
  0x1d   :  { %79 = vperm.xlu0 %1479, %v1634_v9   ;;  %127 = vperm.xlu1 %1478, %v1626_v6   ;;  %2628 = vst [vmem:[#allocation10_spill] sm:$0xff] %v1661_v25  ;;  %2630 = vst [vmem:[#allocation12_spill] sm:$0xff] %v1667_v31  ;;  %v200_v46 = vmul.u32 4, %v198_v36  ;;  %v215_v51 = vmul.f32 %v213_v50, %v67_v48  ;;  %v258_v40 = vadd.s32 %v196_v27, %v134_v11  ;;  %v1518_v10 = vmov 2  }
  0x1e   :  { %2629 = vst [vmem:[#allocation11_spill] sm:$0xff] %v1664_v26  ;;  %2631 = vst [vmem:[#allocation13_spill] sm:$0xff] %v1672_v32  ;;  %v201_v49 = vmul.u32 4, %v199_v37  ;;  %v1701_v35 = vmul.f32 %v214_v45, %v1597_v47  ;;  %v259_v53 = vadd.s32 %v197_v28, %v135_v12  ;;  %v1717_v54 = vmul.f32 %v214_v45, %v1579_v34 }
  0x1f   :  { %v1691_v29 = vadd.s32 %v1623_v3, %v200_v46  ;;  %v1704_v39 = vmul.f32 %v215_v51, %v1605_v55  ;;  %v1709_v52 = vadd.s32 %v200_v46, %v1640_v14  ;;  %v1720_v56 = vmul.f32 %v215_v51, %v1592_v42 }
  0x20   :  { %v1694_v33 = vadd.s32 %v1628_v7, %v201_v49  ;;  %2636 = vst [vmem:[#allocation18_spill] sm:$0xff] %v1701_v35  ;;  %v1712_v48 = vadd.s32 %v201_v49, %v1648_v16  ;;  %v260_v57 = vmul.u32 4, %v258_v40  ;;  %v261_v58 = vmul.u32 4, %v259_v53 }
  0x21   :  { %82 = vperm.xlu0 %1479, %v1645_v15   ;;  %161 = vperm.xlu1 %1478, %v1637_v13   ;;  %2634 = vst [vmem:[#allocation16_spill] sm:$0xff] %v1691_v29  ;;  %2637 = vst [vmem:[#allocation19_spill] sm:$0xff] %v1704_v39  ;;  %v272_v59 = vmul.f32 %v212_v43, %v1572_v30  ;;  %v273_v0 = vmul.f32 %v213_v50, %v1590_v41 }
  0x22   :  { %2635 = vst [vmem:[#allocation17_spill] sm:$0xff] %v1694_v33  ;;  %2638 = vst [vmem:[#allocation20_spill] sm:$0xff] %v1709_v52  ;;  %v1726_v60 = vadd.s32 %v1623_v3, %v260_v57  ;;  %v1729_v63 = vadd.s32 %v1628_v7, %v261_v58  ;;  %v1743_v3 = vadd.s32 %v260_v57, %v1640_v14 }
  0x23   :  { %2639 = vst [vmem:[#allocation21_spill] sm:$0xff] %v1712_v48  ;;  %2640 = vst [vmem:[#allocation22_spill] sm:$0xff] %v1720_v56  ;;  %v1735_v4 = vmul.f32 %v272_v59, %v1597_v47  ;;  %v1738_v30 = vmul.f32 %v273_v0, %v1605_v55  ;;  %v1746_v5 = vadd.s32 %v261_v58, %v1648_v16  ;;  %v1517_v55 = vmov 1  }
  0x24   :  { %2641 = vst [vmem:[#allocation23_spill] sm:$0xff] %v1729_v63  ;;  %v1751_v41 = vmul.f32 %v272_v59, %v1579_v34  ;;  %v1754_v47 = vmul.f32 %v273_v0, %v1592_v42 }
  0x25   :  { %111 = vperm.xlu0 %1479, %v1651_v19   ;;  %114 = vperm.xlu1 %1478, %v1656_v21   ;;  %2642 = vst [vmem:[#allocation24_spill] sm:$0xff] %v1738_v30  ;;  %2643 = vst [vmem:[#allocation25_spill] sm:$0xff] %v1746_v5 }
  0x26   :  { %2644 = vst [vmem:[#allocation26_spill] sm:$0xff] %v1754_v47 }
  0x29   :  { %143 = vperm.xlu0 %1479, %v1661_v25   ;;  %146 = vperm.xlu1 %1478, %v1664_v26  }
  0x2d   :  { %171 = vperm.xlu0 %1479, %v1667_v31   ;;  %174 = vperm.xlu1 %1478, %v1672_v32  }
  0x31   :  { %182 = vperm.xlu0 %1479, %v1675_v38   ;;  %187 = vperm.xlu1 %1478, %v1682_v44  }
  0x35   :  { %205 = vperm.xlu0 %1479, %v1691_v29   ;;  %208 = vperm.xlu1 %1478, %v1694_v33  }
  0x39   :  { %220 = vperm.xlu0 %1479, %v1701_v35   ;;  %225 = vperm.xlu1 %1478, %v1704_v39  }
  0x3d   :  { %235 = vperm.xlu0 %1479, %v1709_v52   ;;  %238 = vperm.xlu1 %1478, %v1712_v48  }
  0x41   :  { %246 = vperm.xlu0 %1479, %v1717_v54   ;;  %251 = vperm.xlu1 %1478, %v1720_v56  }
  0x45   :  { %265 = vperm.xlu0 %1479, %v1726_v60   ;;  %268 = vperm.xlu1 %1478, %v1729_v63  }
  0x49   :  { %278 = vperm.xlu0 %1479, %v1735_v4   ;;  %283 = vperm.xlu1 %1478, %v1738_v30  }
  0x4d   :  { %293 = vperm.xlu0 %1479, %v1743_v3   ;;  %296 = vperm.xlu1 %1478, %v1746_v5  }
  0x51   :  { %304 = vperm.xlu0 %1479, %v1751_v41   ;;  %309 = vperm.xlu1 %1478, %v1754_v47  }
  0x55   :  { %1480 = vset.pattern.permute.xlu0 %v1517_v55  ;;  %1481 = vset.pattern.permute.xlu1 %v1517_v55 }
  0x56   :  { %317 = vperm.xlu0 %1480, %v1634_v9   ;;  %320 = vperm.xlu1 %1481, %v1645_v15  }
  0x5a   :  { %329 = vperm.xlu0 %1480, %v1621_v2   ;;  %325 = vperm.xlu1 %1481, %v1613_v62  }
  0x5e   :  { %340 = vperm.xlu0 %1480, %v1656_v21   ;;  %337 = vperm.xlu1 %1481, %v1651_v19  }
  0x62   :  { %349 = vperm.xlu0 %1480, %v1626_v6   ;;  %345 = vperm.xlu1 %1481, %v1610_v61  }
  0x66   :  { %360 = vperm.xlu0 %1480, %v1664_v26   ;;  %357 = vperm.xlu1 %1481, %v1661_v25  }
  0x6a   :  { %369 = vperm.xlu0 %1480, %v1637_v13   ;;  %365 = vperm.xlu1 %1481, %v1618_v1  }
  0x6e   :  { %380 = vperm.xlu0 %1480, %v1672_v32   ;;  %377 = vperm.xlu1 %1481, %v1667_v31  }
  0x72   :  { %389 = vperm.xlu0 %1480, %v1682_v44   ;;  %385 = vperm.xlu1 %1481, %v1675_v38  }
  0x76   :  { %400 = vperm.xlu0 %1480, %v1694_v33   ;;  %397 = vperm.xlu1 %1481, %v1691_v29  }
  0x7a   :  { %409 = vperm.xlu0 %1480, %v1704_v39   ;;  %405 = vperm.xlu1 %1481, %v1701_v35  }
  0x7e   :  { %420 = vperm.xlu0 %1480, %v1712_v48   ;;  %417 = vperm.xlu1 %1481, %v1709_v52  }
  0x82   :  { %429 = vperm.xlu0 %1480, %v1720_v56   ;;  %425 = vperm.xlu1 %1481, %v1717_v54  }
  0x86   :  { %440 = vperm.xlu0 %1480, %v1729_v63   ;;  %437 = vperm.xlu1 %1481, %v1726_v60  }
  0x8a   :  { %449 = vperm.xlu0 %1480, %v1738_v30   ;;  %445 = vperm.xlu1 %1481, %v1735_v4  }
  0x8e   :  { %460 = vperm.xlu0 %1480, %v1746_v5   ;;  %457 = vperm.xlu1 %1481, %v1743_v3  }
  0x90   :  { %v1788_v34 = vpop.permute.xlu0 %122  ;;  %v1790_v42 = vpop.permute.xlu1 %94 }
  0x92   :  { %469 = vperm.xlu0 %1480, %v1754_v47   ;;  %465 = vperm.xlu1 %1481, %v1751_v41  }
  0x94   :  { %v1794_v7 = vpop.permute.xlu0 %156  ;;  %v1796_v8 = vpop.permute.xlu1 %99 }
  0x96   :  { %1483 = vset.pattern.permute.xlu0 %v1518_v10  ;;  %1482 = vset.pattern.permute.xlu1 %v1518_v10 }
  0x97   :  { %480 = vperm.xlu0 %1483, %v1645_v15   ;;  %477 = vperm.xlu1 %1482, %v1634_v9  }
  0x98   :  { %v1800_v11 = vpop.permute.xlu0 %79  ;;  %v1802_v12 = vpop.permute.xlu1 %127 }
  0x9b   :  { %497 = vperm.xlu0 %1483, %v1651_v19   ;;  %485 = vperm.xlu1 %1482, %v1613_v62  }
  0x9c   :  { %v1806_v14 = vpop.permute.xlu0 %82  ;;  %v1808_v16 = vpop.permute.xlu1 %161 }
  0x9f   :  { %505 = vperm.xlu0 %1483, %v1610_v61   ;;  %489 = vperm.xlu1 %1482, %v1621_v2  }
  0xa0   :  { %v1812_v17 = vpop.permute.xlu0 %111  ;;  %v1814_v18 = vpop.permute.xlu1 %114 }
  0xa3   :  { %517 = vperm.xlu0 %1483, %v1661_v25   ;;  %500 = vperm.xlu1 %1482, %v1656_v21  }
  0xa4   :  { %v1818_v20 = vpop.permute.xlu0 %143  ;;  %v1820_v22 = vpop.permute.xlu1 %146 }
  0xa7   :  { %525 = vperm.xlu0 %1483, %v1618_v1   ;;  %509 = vperm.xlu1 %1482, %v1626_v6  }
  0xa8   :  { %v1824_v23 = vpop.permute.xlu0 %171  ;;  %v1826_v24 = vpop.permute.xlu1 %174 }
  0xab   :  { %537 = vperm.xlu0 %1483, %v1667_v31   ;;  %520 = vperm.xlu1 %1482, %v1664_v26  }
  0xac   :  { %v1830_v27 = vpop.permute.xlu0 %182  ;;  %v1832_v28 = vpop.permute.xlu1 %187 }
  0xaf   :  { %545 = vperm.xlu0 %1483, %v1675_v38   ;;  %529 = vperm.xlu1 %1482, %v1637_v13  }
  0xb0   :  { %v1836_v36 = vpop.permute.xlu0 %205  ;;  %v1838_v37 = vpop.permute.xlu1 %208 }
  0xb3   :  { %557 = vperm.xlu0 %1483, %v1691_v29   ;;  %540 = vperm.xlu1 %1482, %v1672_v32  }
  0xb4   :  { %v1842_v43 = vpop.permute.xlu0 %220  ;;  %v1844_v46 = vpop.permute.xlu1 %225 }
  0xb7   :  { %565 = vperm.xlu0 %1483, %v1701_v35   ;;  %549 = vperm.xlu1 %1482, %v1682_v44  }
  0xb8   :  { %v1848_v49 = vpop.permute.xlu0 %235  ;;  %v1850_v50 = vpop.permute.xlu1 %238 }
  0xbb   :  { %577 = vperm.xlu0 %1483, %v1709_v52   ;;  %560 = vperm.xlu1 %1482, %v1694_v33  }
  0xbc   :  { %v1854_v45 = vpop.permute.xlu0 %246  ;;  %v1856_v51 = vpop.permute.xlu1 %251 }
  0xbf   :  { %585 = vperm.xlu0 %1483, %v1717_v54   ;;  %569 = vperm.xlu1 %1482, %v1704_v39  }
  0xc0   :  { %v1860_v40 = vpop.permute.xlu0 %265  ;;  %v1862_v53 = vpop.permute.xlu1 %268 }
  0xc1   :  { %2645 = vst [vmem:[#allocation27_spill] sm:$0xff] %v1860_v40  ;;  %v1519_v40 = vmov 3  }
  0xc3   :  { %597 = vperm.xlu0 %1483, %v1726_v60   ;;  %580 = vperm.xlu1 %1482, %v1712_v48  }
  0xc4   :  { %v1866_v57 = vpop.permute.xlu0 %278  ;;  %v1868_v58 = vpop.permute.xlu1 %283 }
  0xc5   :  { %2646 = vst [vmem:[#allocation28_spill] sm:$0xff] %v1866_v57  ;;  %2647 = vst [vmem:[#allocation29_spill] sm:$0xff] %v1868_v58 }
  0xc7   :  { %605 = vperm.xlu0 %1483, %v1735_v4   ;;  %589 = vperm.xlu1 %1482, %v1720_v56  }
  0xc8   :  { %v1872_v59 = vpop.permute.xlu0 %293  ;;  %v1874_v0 = vpop.permute.xlu1 %296 }
  0xc9   :  { %2648 = vst [vmem:[#allocation30_spill] sm:$0xff] %v1872_v59  ;;  %2649 = vst [vmem:[#allocation31_spill] sm:$0xff] %v1874_v0 }
  0xcb   :  { %617 = vperm.xlu0 %1483, %v1743_v3   ;;  %600 = vperm.xlu1 %1482, %v1729_v63  }
  0xcc   :  { %v1878_v55 = vpop.permute.xlu0 %304  ;;  %v1880_v10 = vpop.permute.xlu1 %309 }
  0xcd   :  { %2650 = vst [vmem:[#allocation32_spill] sm:$0xff] %v1878_v55  ;;  %2651 = vst [vmem:[#allocation33_spill] sm:$0xff] %v1880_v10 }
  0xcf   :  { %625 = vperm.xlu0 %1483, %v1751_v41   ;;  %609 = vperm.xlu1 %1482, %v1738_v30  }
  0xd1   :  { %v1884_v57 = vpop.permute.xlu0 %317  ;;  %v1886_v58 = vpop.permute.xlu1 %320 }
  0xd2   :  { %2652 = vst [vmem:[#allocation34_spill] sm:$0xff] %v1884_v57  ;;  %2653 = vst [vmem:[#allocation35_spill] sm:$0xff] %v1886_v58 }
  0xd3   :  { %1484 = vset.pattern.permute.xlu0 %v1519_v40  ;;  %620 = vperm.xlu1 %1482, %v1746_v5  }
  0xd4   :  { %637 = vperm.xlu0 %1484, %v1634_v9  }
  0xd5   :  { %v1890_v59 = vpop.permute.xlu0 %329  ;;  %v1892_v0 = vpop.permute.xlu1 %325 }
  0xd6   :  { %2654 = vst [vmem:[#allocation36_spill] sm:$0xff] %v1890_v59  ;;  %2655 = vst [vmem:[#allocation37_spill] sm:$0xff] %v1892_v0 }
  0xd7   :  { %629 = vperm.xlu1 %1482, %v1754_v47  }
  0xd8   :  { %649 = vperm.xlu0 %1484, %v1621_v2  }
  0xd9   :  { %v1896_v55 = vpop.permute.xlu0 %340  ;;  %v1898_v10 = vpop.permute.xlu1 %337 }
  0xda   :  { %2656 = vst [vmem:[#allocation38_spill] sm:$0xff] %v1896_v55  ;;  %2657 = vst [vmem:[#allocation39_spill] sm:$0xff] %v1898_v10  ;;  %v1520_v55 = vmov 4  }
  0xdb   :  { %1485 = vset.pattern.permute.xlu1 %v1519_v40 }
  0xdc   :  { %660 = vperm.xlu0 %1484, %v1656_v21   ;;  %640 = vperm.xlu1 %1485, %v1645_v15  }
  0xdd   :  { %v1902_v58 = vpop.permute.xlu0 %349  ;;  %v1904_v57 = vpop.permute.xlu1 %345 }
  0xde   :  { %2658 = vst [vmem:[#allocation40_spill] sm:$0xff] %v1902_v58  ;;  %2659 = vst [vmem:[#allocation41_spill] sm:$0xff] %v1904_v57 }
  0xe0   :  { %669 = vperm.xlu0 %1484, %v1626_v6   ;;  %645 = vperm.xlu1 %1485, %v1613_v62  }
  0xe1   :  { %v1908_v0 = vpop.permute.xlu0 %360  ;;  %v1910_v59 = vpop.permute.xlu1 %357 }
  0xe2   :  { %2660 = vst [vmem:[#allocation42_spill] sm:$0xff] %v1908_v0  ;;  %2661 = vst [vmem:[#allocation43_spill] sm:$0xff] %v1910_v59 }
  0xe4   :  { %680 = vperm.xlu0 %1484, %v1664_v26   ;;  %657 = vperm.xlu1 %1485, %v1651_v19  }
  0xe5   :  { %v1914_v40 = vpop.permute.xlu0 %369  ;;  %v1916_v10 = vpop.permute.xlu1 %365 }
  0xe6   :  { %2662 = vst [vmem:[#allocation44_spill] sm:$0xff] %v1914_v40  ;;  %2663 = vst [vmem:[#allocation45_spill] sm:$0xff] %v1916_v10 }
  0xe8   :  { %689 = vperm.xlu0 %1484, %v1637_v13   ;;  %665 = vperm.xlu1 %1485, %v1610_v61  }
  0xe9   :  { %v1920_v57 = vpop.permute.xlu0 %380  ;;  %v1922_v58 = vpop.permute.xlu1 %377 }
  0xea   :  { %2664 = vst [vmem:[#allocation46_spill] sm:$0xff] %v1920_v57  ;;  %2665 = vst [vmem:[#allocation47_spill] sm:$0xff] %v1922_v58 }
  0xec   :  { %700 = vperm.xlu0 %1484, %v1672_v32   ;;  %677 = vperm.xlu1 %1485, %v1661_v25  }
  0xed   :  { %v1926_v59 = vpop.permute.xlu0 %389  ;;  %v1928_v0 = vpop.permute.xlu1 %385 }
  0xee   :  { %2666 = vst [vmem:[#allocation48_spill] sm:$0xff] %v1926_v59  ;;  %2667 = vst [vmem:[#allocation49_spill] sm:$0xff] %v1928_v0 }
  0xf0   :  { %709 = vperm.xlu0 %1484, %v1682_v44   ;;  %685 = vperm.xlu1 %1485, %v1618_v1  }
  0xf1   :  { %v1932_v10 = vpop.permute.xlu0 %400  ;;  %v1934_v40 = vpop.permute.xlu1 %397 }
  0xf2   :  { %2668 = vst [vmem:[#allocation50_spill] sm:$0xff] %v1932_v10  ;;  %2669 = vst [vmem:[#allocation51_spill] sm:$0xff] %v1934_v40 }
  0xf4   :  { %720 = vperm.xlu0 %1484, %v1694_v33   ;;  %697 = vperm.xlu1 %1485, %v1667_v31  }
  0xf5   :  { %v1938_v58 = vpop.permute.xlu0 %409  ;;  %v1940_v57 = vpop.permute.xlu1 %405 }
  0xf6   :  { %2670 = vst [vmem:[#allocation52_spill] sm:$0xff] %v1938_v58  ;;  %2671 = vst [vmem:[#allocation53_spill] sm:$0xff] %v1940_v57 }
  0xf8   :  { %729 = vperm.xlu0 %1484, %v1704_v39   ;;  %705 = vperm.xlu1 %1485, %v1675_v38  }
  0xf9   :  { %v1944_v0 = vpop.permute.xlu0 %420  ;;  %v1946_v59 = vpop.permute.xlu1 %417 }
  0xfa   :  { %2672 = vst [vmem:[#allocation54_spill] sm:$0xff] %v1944_v0  ;;  %2673 = vst [vmem:[#allocation55_spill] sm:$0xff] %v1946_v59 }
  0xfc   :  { %740 = vperm.xlu0 %1484, %v1712_v48   ;;  %717 = vperm.xlu1 %1485, %v1691_v29  }
  0xfd   :  { %v1950_v40 = vpop.permute.xlu0 %429  ;;  %v1952_v10 = vpop.permute.xlu1 %425 }
  0xfe   :  { %2674 = vst [vmem:[#allocation56_spill] sm:$0xff] %v1950_v40  ;;  %2675 = vst [vmem:[#allocation57_spill] sm:$0xff] %v1952_v10 }
 0x100   :  { %749 = vperm.xlu0 %1484, %v1720_v56   ;;  %725 = vperm.xlu1 %1485, %v1701_v35  }
 0x101   :  { %v1956_v57 = vpop.permute.xlu0 %440  ;;  %v1958_v58 = vpop.permute.xlu1 %437 }
 0x102   :  { %2676 = vst [vmem:[#allocation58_spill] sm:$0xff] %v1956_v57  ;;  %2677 = vst [vmem:[#allocation59_spill] sm:$0xff] %v1958_v58 }
 0x104   :  { %760 = vperm.xlu0 %1484, %v1729_v63   ;;  %737 = vperm.xlu1 %1485, %v1709_v52  }
 0x105   :  { %v1962_v59 = vpop.permute.xlu0 %449  ;;  %v1964_v0 = vpop.permute.xlu1 %445 }
 0x106   :  { %2678 = vst [vmem:[#allocation60_spill] sm:$0xff] %v1962_v59  ;;  %2679 = vst [vmem:[#allocation61_spill] sm:$0xff] %v1964_v0 }
 0x108   :  { %769 = vperm.xlu0 %1484, %v1738_v30   ;;  %745 = vperm.xlu1 %1485, %v1717_v54  }
 0x109   :  { %v1968_v10 = vpop.permute.xlu0 %460  ;;  %v1970_v40 = vpop.permute.xlu1 %457 }
 0x10a   :  { %2680 = vst [vmem:[#allocation62_spill] sm:$0xff] %v1968_v10  ;;  %2681 = vst [vmem:[#allocation63_spill] sm:$0xff] %v1970_v40 }
 0x10c   :  { %780 = vperm.xlu0 %1484, %v1746_v5   ;;  %757 = vperm.xlu1 %1485, %v1726_v60  }
 0x10d   :  { %v1974_v58 = vpop.permute.xlu0 %469  ;;  %v1976_v57 = vpop.permute.xlu1 %465 }
 0x10e   :  { %2682 = vst [vmem:[#allocation64_spill] sm:$0xff] %v1974_v58  ;;  %2683 = vst [vmem:[#allocation65_spill] sm:$0xff] %v1976_v57 }
 0x110   :  { %789 = vperm.xlu0 %1484, %v1754_v47   ;;  %765 = vperm.xlu1 %1485, %v1735_v4  }
 0x112   :  { %v1980_v0 = vpop.permute.xlu0 %480  ;;  %v1982_v59 = vpop.permute.xlu1 %477 }
 0x113   :  { %2684 = vst [vmem:[#allocation66_spill] sm:$0xff] %v1980_v0  ;;  %2685 = vst [vmem:[#allocation67_spill] sm:$0xff] %v1982_v59 }
 0x114   :  { %1487 = vset.pattern.permute.xlu0 %v1520_v55  ;;  %777 = vperm.xlu1 %1485, %v1743_v3  }
 0x115   :  { %800 = vperm.xlu0 %1487, %v1645_v15  }
 0x116   :  { %v1986_v40 = vpop.permute.xlu0 %497  ;;  %v1988_v10 = vpop.permute.xlu1 %485 }
 0x117   :  { %2686 = vst [vmem:[#allocation68_spill] sm:$0xff] %v1986_v40  ;;  %2687 = vst [vmem:[#allocation69_spill] sm:$0xff] %v1988_v10 }
 0x118   :  { %785 = vperm.xlu1 %1485, %v1751_v41  }
 0x119   :  { %817 = vperm.xlu0 %1487, %v1651_v19  }
 0x11a   :  { %v1992_v57 = vpop.permute.xlu0 %505  ;;  %v1994_v58 = vpop.permute.xlu1 %489 }
 0x11b   :  { %2688 = vst [vmem:[#allocation70_spill] sm:$0xff] %v1992_v57  ;;  %2689 = vst [vmem:[#allocation71_spill] sm:$0xff] %v1994_v58  ;;  %v1521_v58 = vmov 5  }
 0x11c   :  { %1486 = vset.pattern.permute.xlu1 %v1520_v55 }
 0x11d   :  { %825 = vperm.xlu0 %1487, %v1610_v61   ;;  %797 = vperm.xlu1 %1486, %v1634_v9  }
 0x11e   :  { %v1998_v59 = vpop.permute.xlu0 %517  ;;  %v2000_v0 = vpop.permute.xlu1 %500 }
 0x11f   :  { %2690 = vst [vmem:[#allocation72_spill] sm:$0xff] %v1998_v59  ;;  %2691 = vst [vmem:[#allocation73_spill] sm:$0xff] %v2000_v0 }
 0x121   :  { %837 = vperm.xlu0 %1487, %v1661_v25   ;;  %805 = vperm.xlu1 %1486, %v1613_v62  }
 0x122   :  { %v2004_v10 = vpop.permute.xlu0 %525  ;;  %v2006_v40 = vpop.permute.xlu1 %509 }
 0x123   :  { %2692 = vst [vmem:[#allocation74_spill] sm:$0xff] %v2004_v10  ;;  %2693 = vst [vmem:[#allocation75_spill] sm:$0xff] %v2006_v40 }
 0x125   :  { %845 = vperm.xlu0 %1487, %v1618_v1   ;;  %809 = vperm.xlu1 %1486, %v1621_v2  }
 0x126   :  { %v2010_v55 = vpop.permute.xlu0 %537  ;;  %v2012_v57 = vpop.permute.xlu1 %520 }
 0x127   :  { %2694 = vst [vmem:[#allocation76_spill] sm:$0xff] %v2010_v55  ;;  %2695 = vst [vmem:[#allocation77_spill] sm:$0xff] %v2012_v57 }
 0x129   :  { %857 = vperm.xlu0 %1487, %v1667_v31   ;;  %820 = vperm.xlu1 %1486, %v1656_v21  }
 0x12a   :  { %v2016_v59 = vpop.permute.xlu0 %545  ;;  %v2018_v0 = vpop.permute.xlu1 %529 }
 0x12b   :  { %2696 = vst [vmem:[#allocation78_spill] sm:$0xff] %v2016_v59  ;;  %2697 = vst [vmem:[#allocation79_spill] sm:$0xff] %v2018_v0 }
 0x12d   :  { %865 = vperm.xlu0 %1487, %v1675_v38   ;;  %829 = vperm.xlu1 %1486, %v1626_v6  }
 0x12e   :  { %v2022_v10 = vpop.permute.xlu0 %557  ;;  %v2024_v40 = vpop.permute.xlu1 %540 }
 0x12f   :  { %2698 = vst [vmem:[#allocation80_spill] sm:$0xff] %v2022_v10  ;;  %2699 = vst [vmem:[#allocation81_spill] sm:$0xff] %v2024_v40 }
 0x131   :  { %877 = vperm.xlu0 %1487, %v1691_v29   ;;  %840 = vperm.xlu1 %1486, %v1664_v26  }
 0x132   :  { %v2028_v55 = vpop.permute.xlu0 %565  ;;  %v2030_v57 = vpop.permute.xlu1 %549 }
 0x133   :  { %2700 = vst [vmem:[#allocation82_spill] sm:$0xff] %v2028_v55  ;;  %2701 = vst [vmem:[#allocation83_spill] sm:$0xff] %v2030_v57 }
 0x135   :  { %885 = vperm.xlu0 %1487, %v1701_v35   ;;  %849 = vperm.xlu1 %1486, %v1637_v13  }
 0x136   :  { %v2034_v59 = vpop.permute.xlu0 %577  ;;  %v2036_v0 = vpop.permute.xlu1 %560 }
 0x137   :  { %2702 = vst [vmem:[#allocation84_spill] sm:$0xff] %v2034_v59  ;;  %2703 = vst [vmem:[#allocation85_spill] sm:$0xff] %v2036_v0 }
 0x139   :  { %897 = vperm.xlu0 %1487, %v1709_v52   ;;  %860 = vperm.xlu1 %1486, %v1672_v32  }
 0x13a   :  { %v2040_v10 = vpop.permute.xlu0 %585  ;;  %v2042_v40 = vpop.permute.xlu1 %569 }
 0x13b   :  { %2704 = vst [vmem:[#allocation86_spill] sm:$0xff] %v2040_v10  ;;  %2705 = vst [vmem:[#allocation87_spill] sm:$0xff] %v2042_v40 }
 0x13d   :  { %905 = vperm.xlu0 %1487, %v1717_v54   ;;  %869 = vperm.xlu1 %1486, %v1682_v44  }
 0x13e   :  { %v2046_v55 = vpop.permute.xlu0 %597  ;;  %v2048_v57 = vpop.permute.xlu1 %580 }
 0x13f   :  { %2706 = vst [vmem:[#allocation88_spill] sm:$0xff] %v2046_v55  ;;  %2707 = vst [vmem:[#allocation89_spill] sm:$0xff] %v2048_v57 }
 0x141   :  { %917 = vperm.xlu0 %1487, %v1726_v60   ;;  %880 = vperm.xlu1 %1486, %v1694_v33  }
 0x142   :  { %v2052_v59 = vpop.permute.xlu0 %605  ;;  %v2054_v0 = vpop.permute.xlu1 %589 }
 0x143   :  { %2708 = vst [vmem:[#allocation90_spill] sm:$0xff] %v2052_v59  ;;  %2709 = vst [vmem:[#allocation91_spill] sm:$0xff] %v2054_v0 }
 0x145   :  { %925 = vperm.xlu0 %1487, %v1735_v4   ;;  %889 = vperm.xlu1 %1486, %v1704_v39  }
 0x146   :  { %v2058_v10 = vpop.permute.xlu0 %617  ;;  %v2060_v40 = vpop.permute.xlu1 %600 }
 0x147   :  { %2710 = vst [vmem:[#allocation92_spill] sm:$0xff] %v2058_v10  ;;  %2711 = vst [vmem:[#allocation93_spill] sm:$0xff] %v2060_v40 }
 0x149   :  { %937 = vperm.xlu0 %1487, %v1743_v3   ;;  %900 = vperm.xlu1 %1486, %v1712_v48  }
 0x14a   :  { %v2064_v55 = vpop.permute.xlu0 %625  ;;  %v2066_v57 = vpop.permute.xlu1 %609 }
 0x14b   :  { %2712 = vst [vmem:[#allocation94_spill] sm:$0xff] %v2064_v55  ;;  %2713 = vst [vmem:[#allocation95_spill] sm:$0xff] %v2066_v57 }
 0x14d   :  { %945 = vperm.xlu0 %1487, %v1751_v41   ;;  %909 = vperm.xlu1 %1486, %v1720_v56  }
 0x14e   :  { %v2070_v59 = vpop.permute.xlu1 %620 }
 0x14f   :  { %2714 = vst [vmem:[#allocation96_spill] sm:$0xff] %v2070_v59  ;;  %v2072_v0 = vpop.permute.xlu0 %637 }
 0x150   :  { %2715 = vst [vmem:[#allocation97_spill] sm:$0xff] %v2072_v0 }
 0x151   :  { %1488 = vset.pattern.permute.xlu0 %v1521_v58  ;;  %920 = vperm.xlu1 %1486, %v1729_v63  }
 0x152   :  { %957 = vperm.xlu0 %1488, %v1634_v9   ;;  %v2076_v10 = vpop.permute.xlu1 %629 }
 0x153   :  { %2716 = vst [vmem:[#allocation98_spill] sm:$0xff] %v2076_v10  ;;  %v2078_v40 = vpop.permute.xlu0 %649 }
 0x154   :  { %2717 = vst [vmem:[#allocation99_spill] sm:$0xff] %v2078_v40 }
 0x155   :  { %929 = vperm.xlu1 %1486, %v1738_v30  }
 0x156   :  { %969 = vperm.xlu0 %1488, %v1621_v2  }
 0x157   :  { %v2082_v55 = vpop.permute.xlu0 %660  ;;  %v2084_v57 = vpop.permute.xlu1 %640 }
 0x158   :  { %2718 = vst [vmem:[#allocation100_spill] sm:$0xff] %v2082_v55  ;;  %2719 = vst [vmem:[#allocation101_spill] sm:$0xff] %v2084_v57 }
 0x159   :  { %940 = vperm.xlu1 %1486, %v1746_v5  }
 0x15a   :  { %980 = vperm.xlu0 %1488, %v1656_v21  }
 0x15b   :  { %v2088_v0 = vpop.permute.xlu0 %669  ;;  %v2090_v59 = vpop.permute.xlu1 %645 }
 0x15c   :  { %2720 = vst [vmem:[#allocation102_spill] sm:$0xff] %v2088_v0  ;;  %2721 = vst [vmem:[#allocation103_spill] sm:$0xff] %v2090_v59 }
 0x15d   :  { %949 = vperm.xlu1 %1486, %v1754_v47  }
 0x15e   :  { %989 = vperm.xlu0 %1488, %v1626_v6  }
 0x15f   :  { %v2094_v40 = vpop.permute.xlu0 %680  ;;  %v2096_v10 = vpop.permute.xlu1 %657 }
 0x160   :  { %2722 = vst [vmem:[#allocation104_spill] sm:$0xff] %v2094_v40 }
 0x161   :  { %1489 = vset.pattern.permute.xlu1 %v1521_v58 }
 0x162   :  { %1000 = vperm.xlu0 %1488, %v1664_v26   ;;  %960 = vperm.xlu1 %1489, %v1645_v15  }
 0x163   :  { %v2100_v55 = vpop.permute.xlu0 %689  ;;  %v2102_v57 = vpop.permute.xlu1 %665 }
 0x164   :  { %2723 = vst [vmem:[#allocation105_spill] sm:$0xff] %v2100_v55  ;;  %2724 = vst [vmem:[#allocation106_spill] sm:$0xff] %v2102_v57 }
 0x166   :  { %1009 = vperm.xlu0 %1488, %v1637_v13   ;;  %965 = vperm.xlu1 %1489, %v1613_v62  }
 0x167   :  { %v2106_v0 = vpop.permute.xlu0 %700  ;;  %v2108_v59 = vpop.permute.xlu1 %677 }
 0x168   :  { %2725 = vst [vmem:[#allocation107_spill] sm:$0xff] %v2106_v0 }
 0x16a   :  { %1020 = vperm.xlu0 %1488, %v1672_v32   ;;  %977 = vperm.xlu1 %1489, %v1651_v19  }
 0x16b   :  { %v2112_v58 = vpop.permute.xlu0 %709  ;;  %v2114_v40 = vpop.permute.xlu1 %685 }
 0x16c   :  { %2726 = vst [vmem:[#allocation108_spill] sm:$0xff] %v2112_v58 }
 0x16e   :  { %1029 = vperm.xlu0 %1488, %v1682_v44   ;;  %985 = vperm.xlu1 %1489, %v1610_v61  }
 0x16f   :  { %v2118_v55 = vpop.permute.xlu0 %720  ;;  %v2120_v57 = vpop.permute.xlu1 %697 }
 0x170   :  { %2727 = vst [vmem:[#allocation109_spill] sm:$0xff] %v2118_v55 }
 0x172   :  { %1040 = vperm.xlu0 %1488, %v1694_v33   ;;  %997 = vperm.xlu1 %1489, %v1661_v25  }
 0x173   :  { %v2124_v0 = vpop.permute.xlu0 %729  ;;  %v2126_v32 = vpop.permute.xlu1 %705 }
 0x174   :  { %2728 = vst [vmem:[#allocation110_spill] sm:$0xff] %v2124_v0 }
 0x176   :  { %1049 = vperm.xlu0 %1488, %v1704_v39   ;;  %1005 = vperm.xlu1 %1489, %v1618_v1  }
 0x177   :  { %v2130_v58 = vpop.permute.xlu0 %740  ;;  %v2132_v44 = vpop.permute.xlu1 %717 }
 0x178   :  { %2729 = vst [vmem:[#allocation111_spill] sm:$0xff] %v2130_v58  ;;  %2730 = vst [vmem:[#allocation112_spill] sm:$0xff] %v2132_v44  ;;  %v62_v44 = vlaneseq }
 0x17a   :  { %1060 = vperm.xlu0 %1488, %v1712_v48   ;;  %1017 = vperm.xlu1 %1489, %v1667_v31  }
 0x17b   :  { %v2136_v55 = vpop.permute.xlu0 %749  ;;  %v2138_v33 = vpop.permute.xlu1 %725 }
 0x17c   :  { %2731 = vst [vmem:[#allocation113_spill] sm:$0xff] %v2136_v55 }
 0x17e   :  { %1069 = vperm.xlu0 %1488, %v1720_v56   ;;  %1025 = vperm.xlu1 %1489, %v1675_v38  }
 0x17f   :  { %v2142_v0 = vpop.permute.xlu0 %760  ;;  %v2144_v39 = vpop.permute.xlu1 %737 }
 0x180   :  { %2732 = vst [vmem:[#allocation114_spill] sm:$0xff] %v2142_v0  ;;  %v2158_v0 = vand.u32 127, %v62_v44 }
 0x182   :  { %1080 = vperm.xlu0 %1488, %v1729_v63   ;;  %1037 = vperm.xlu1 %1489, %v1691_v29   ;;  %vm117_vm0 = vcmp.eq.s32.totalorder %v2158_v0, %v1814_v18  ;;  %vm116_vm1 = vcmp.eq.s32.totalorder %v2158_v0, %v1812_v17  ;;  %vm85_vm2 = vcmp.eq.s32.totalorder %v2158_v0, %v1806_v14 }
 0x183   :  { %v2148_v58 = vpop.permute.xlu0 %769  ;;  %v2150_v48 = vpop.permute.xlu1 %745  ;;  %vm149_vm3 = vcmp.eq.s32.totalorder %v2158_v0, %v1820_v22  ;;  %vm84_vm4 = vcmp.eq.s32.totalorder %v2158_v0, %v1800_v11  ;;  %v131_v44 = vsel %vm117_vm0, %v1802_v12, 0.0  ;;  %vm148_vm5 = vcmp.eq.s32.totalorder %v2158_v0, %v1818_v20 }
 0x184   :  { %v130_v17 = vsel %vm116_vm1, %v1788_v34, 0.0  ;;  %v103_v18 = vsel %vm85_vm2, %v1796_v8, 0.0  ;;  %v165_v14 = vsel %vm149_vm3, %v1808_v16, 0.0  ;;  %v102_v22 = vsel %vm84_vm4, %v1790_v42, 0.0 }
 0x185   :  { %v133_v11 = vadd.f32 %v131_v44, %v103_v18  ;;  %v164_v12 = vsel %vm148_vm5, %v1794_v7, 0.0  ;;  %vm177_vm6 = vcmp.eq.s32.totalorder %v2158_v0, %v1826_v24  ;;  %v132_v34 = vadd.f32 %v130_v17, %v102_v22 }
 0x186   :  { %1089 = vperm.xlu0 %1488, %v1738_v30   ;;  %1045 = vperm.xlu1 %1489, %v1701_v35   ;;  %vm176_vm7 = vcmp.eq.s32.totalorder %v2158_v0, %v1824_v23  ;;  %v191_v8 = vsel %vm177_vm6, %v1832_v28, 0.0  ;;  %vm211_vm8 = vcmp.eq.s32.totalorder %v2158_v0, %v1838_v37  ;;  %v1522_v42 = vmov 6  }
 0x187   :  { %v2154_v56 = vpop.permute.xlu0 %780  ;;  %v2156_v55 = vpop.permute.xlu1 %757  ;;  %v190_v16 = vsel %vm176_vm7, %v1830_v27, 0.0  ;;  %v166_v7 = vadd.f32 %v164_v12, %v132_v34  ;;  %vm210_vm9 = vcmp.eq.s32.totalorder %v2158_v0, %v1836_v36  ;;  %v229_v24 = vsel %vm211_vm8, %v1844_v46, 0.0  ;;  %v2737_v12 = vld [vmem:[#allocation30_spill] sm:$0xff]  ;;  %v2738_v34 = vld [vmem:[#allocation33_spill] sm:$0xff] }
 0x188   :  { %v228_v27 = vsel %vm210_vm9, %v1842_v43, 0.0  ;;  %vm241_vm10 = vcmp.eq.s32.totalorder %v2158_v0, %v1850_v50  ;;  %vm240_vm11 = vcmp.eq.s32.totalorder %v2158_v0, %v1848_v49  ;;  %vm271_vm12 = vcmp.eq.s32.totalorder %v2158_v0, %v1862_v53  ;;  %v2733_v43 = vld [vmem:[#allocation27_spill] sm:$0xff]  ;;  %v2734_v50 = vld [vmem:[#allocation29_spill] sm:$0xff]  ;;  %v2735_v49 = vld [vmem:[#allocation28_spill] sm:$0xff] }
 0x189   :  { %v192_v44 = vadd.f32 %v190_v16, %v166_v7  ;;  %v255_v36 = vsel %vm241_vm10, %v1856_v51, 0.0  ;;  %v254_v46 = vsel %vm240_vm11, %v1854_v45, 0.0  ;;  %vm270_vm13 = vcmp.eq.s32.totalorder %v2158_v0, %v2733_v43  ;;  %v2736_v51 = vld [vmem:[#allocation31_spill] sm:$0xff]  ;;  %v2739_v16 = vld [vmem:[#allocation34_spill] sm:$0xff]  ;;  %v2744_v43 = vld [vmem:[#allocation37_spill] sm:$0xff] }
 0x18a   :  { %1100 = vperm.xlu0 %1488, %v1746_v5   ;;  %1057 = vperm.xlu1 %1489, %v1709_v52   ;;  %v287_v18 = vsel %vm271_vm12, %v2734_v50, 0.0  ;;  %v286_v22 = vsel %vm270_vm13, %v2735_v49, 0.0  ;;  %vm299_vm14 = vcmp.eq.s32.totalorder %v2158_v0, %v2736_v51  ;;  %vm298_vm15 = vcmp.eq.s32.totalorder %v2158_v0, %v2737_v12  ;;  %v2745_v49 = vld [vmem:[#allocation42_spill] sm:$0xff]  ;;  %v2746_v12 = vld [vmem:[#allocation39_spill] sm:$0xff] }
 0x18b   :  { %v2166_v63 = vpop.permute.xlu0 %789  ;;  %v2168_v30 = vpop.permute.xlu1 %765  ;;  %vm322_vm0 = vcmp.eq.s32.totalorder %v2158_v0, %v2739_v16  ;;  %vm363_vm3 = vcmp.eq.s32.totalorder %v2158_v0, %v2745_v49  ;;  %vm342_vm4 = vcmp.eq.s32.totalorder %v2158_v0, %v2746_v12  ;;  %v2748_v16 = vld [vmem:[#allocation41_spill] sm:$0xff]  ;;  %v2753_v12 = vld [vmem:[#allocation47_spill] sm:$0xff] }
 0x18c   :  { %v332_v50 = vsel %vm322_vm0, %v2744_v43, 0.0  ;;  %v2752_v43 = vld [vmem:[#allocation46_spill] sm:$0xff]  ;;  %vm382_vm7 = vcmp.eq.s32.totalorder %v2158_v0, %v2753_v12 }
 0x18d   :  { %vm383_vm6 = vcmp.eq.s32.totalorder %v2158_v0, %v2752_v43 }
 0x18e   :  { %1109 = vperm.xlu0 %1488, %v1754_v47   ;;  %1065 = vperm.xlu1 %1489, %v1717_v54   ;;  %v167_v47 = vadd.f32 %v165_v14, %v133_v11 }
 0x18f   :  { %v2184_v5 = vpop.permute.xlu1 %777 }
 0x190   :  { %v2190_v20 = vpop.permute.xlu0 %800  ;;  %v193_v28 = vadd.f32 %v191_v8, %v167_v47  ;;  %v230_v47 = vadd.f32 %v228_v27, %v192_v44  ;;  %v313_v8 = vsel %vm299_vm14, %v2738_v34, 0.0  ;;  %v2741_v27 = vld [vmem:[#allocation35_spill] sm:$0xff]  ;;  %v2742_v44 = vld [vmem:[#allocation38_spill] sm:$0xff]  ;;  %v2747_v34 = vld [vmem:[#allocation40_spill] sm:$0xff] }
 0x191   :  { %vm323_vm1 = vcmp.eq.s32.totalorder %v2158_v0, %v2741_v27  ;;  %vm343_vm2 = vcmp.eq.s32.totalorder %v2158_v0, %v2742_v44  ;;  %v2750_v27 = vld [vmem:[#allocation44_spill] sm:$0xff] }
 0x192   :  { %1491 = vset.pattern.permute.xlu0 %v1522_v42  ;;  %1077 = vperm.xlu1 %1489, %v1726_v60   ;;  %v231_v17 = vadd.f32 %v229_v24, %v193_v28  ;;  %v256_v53 = vadd.f32 %v254_v46, %v230_v47  ;;  %v2740_v24 = vld [vmem:[#allocation32_spill] sm:$0xff]  ;;  %v373_v44 = vsel %vm363_vm3, %v2750_v27, 0.0  ;;  %v2756_v27 = vld [vmem:[#allocation50_spill] sm:$0xff] }
 0x193   :  { %1120 = vperm.xlu0 %1491, %v1645_v15   ;;  %v2204_v23 = vpop.permute.xlu1 %785  ;;  %v312_v28 = vsel %vm298_vm15, %v2740_v24, 0.0  ;;  %v352_v24 = vsel %vm342_vm4, %v2748_v16, 0.0  ;;  %v2755_v16 = vld [vmem:[#allocation49_spill] sm:$0xff]  ;;  %vm403_vm8 = vcmp.eq.s32.totalorder %v2158_v0, %v2756_v27 }
 0x194   :  { %v2209_v37 = vpop.permute.xlu0 %817  ;;  %v257_v14 = vadd.f32 %v255_v36, %v231_v17  ;;  %v288_v36 = vadd.f32 %v286_v22, %v256_v53  ;;  %v2743_v17 = vld [vmem:[#allocation36_spill] sm:$0xff]  ;;  %v353_v22 = vsel %vm343_vm2, %v2747_v34, 0.0 }
 0x195   :  { %v333_v46 = vsel %vm323_vm1, %v2743_v17, 0.0 }
 0x196   :  { %1085 = vperm.xlu1 %1489, %v1735_v4   ;;  %v289_v7 = vadd.f32 %v287_v18, %v257_v14  ;;  %v314_v51 = vadd.f32 %v312_v28, %v288_v36  ;;  %v2751_v28 = vld [vmem:[#allocation45_spill] sm:$0xff] }
 0x197   :  { %1137 = vperm.xlu0 %1491, %v1651_v19   ;;  %v2788_v19 = vld [vmem:[#allocation85_spill] sm:$0xff] }
 0x198   :  { %v2225_v45 = vpop.permute.xlu0 %825  ;;  %v2227_v11 = vpop.permute.xlu1 %797  ;;  %v315_v47 = vadd.f32 %v313_v8, %v289_v7  ;;  %v334_v8 = vadd.f32 %v332_v50, %v314_v51  ;;  %v2749_v7 = vld [vmem:[#allocation43_spill] sm:$0xff]  ;;  %v2754_v50 = vld [vmem:[#allocation48_spill] sm:$0xff] }
 0x199   :  { %vm362_vm5 = vcmp.eq.s32.totalorder %v2158_v0, %v2749_v7  ;;  %v393_v51 = vsel %vm383_vm6, %v2754_v50, 0.0  ;;  %v392_v7 = vsel %vm382_vm7, %v2755_v16, 0.0 }
 0x19a   :  { %1097 = vperm.xlu1 %1489, %v1743_v3   ;;  %v335_v53 = vadd.f32 %v333_v46, %v315_v47  ;;  %v372_v36 = vsel %vm362_vm5, %v2751_v28, 0.0  ;;  %v354_v47 = vadd.f32 %v352_v24, %v334_v8  ;;  %v2758_v28 = vld [vmem:[#allocation52_spill] sm:$0xff]  ;;  %v2759_v8 = vld [vmem:[#allocation53_spill] sm:$0xff] }
 0x19b   :  { %1145 = vperm.xlu0 %1491, %v1610_v61   ;;  %v413_v43 = vsel %vm403_vm8, %v2758_v28, 0.0  ;;  %v2781_v61 = vld [vmem:[#allocation77_spill] sm:$0xff]  ;;  %vm563_vm8 = vcmp.eq.s32.totalorder %v2158_v0, %v2788_v19 }
 0x19c   :  { %v2245_v18 = vpop.permute.xlu0 %837  ;;  %v2247_v14 = vpop.permute.xlu1 %805  ;;  %v355_v17 = vadd.f32 %v353_v22, %v335_v53  ;;  %v374_v22 = vadd.f32 %v372_v36, %v354_v47  ;;  %v2757_v53 = vld [vmem:[#allocation51_spill] sm:$0xff]  ;;  %v2762_v47 = vld [vmem:[#allocation56_spill] sm:$0xff]  ;;  %vm523_vm5 = vcmp.eq.s32.totalorder %v2158_v0, %v2781_v61 }
 0x19d   :  { %vm402_vm9 = vcmp.eq.s32.totalorder %v2158_v0, %v2757_v53  ;;  %v2761_v36 = vld [vmem:[#allocation55_spill] sm:$0xff]  ;;  %v2763_v53 = vld [vmem:[#allocation57_spill] sm:$0xff] }
 0x19e   :  { %1105 = vperm.xlu1 %1489, %v1751_v41   ;;  %v375_v34 = vadd.f32 %v373_v44, %v355_v17  ;;  %v412_v44 = vsel %vm402_vm9, %v2759_v8, 0.0  ;;  %v2760_v17 = vld [vmem:[#allocation54_spill] sm:$0xff]  ;;  %vm422_vm11 = vcmp.eq.s32.totalorder %v2158_v0, %v2761_v36  ;;  %v2766_v8 = vld [vmem:[#allocation60_spill] sm:$0xff] }
 0x19f   :  { %1157 = vperm.xlu0 %1491, %v1661_v25   ;;  %vm423_vm10 = vcmp.eq.s32.totalorder %v2158_v0, %v2760_v17  ;;  %v432_v28 = vsel %vm422_vm11, %v2763_v53, 0.0  ;;  %v2771_v53 = vld [vmem:[#allocation64_spill] sm:$0xff] }
 0x1a0   :  { %v2261_v49 = vpop.permute.xlu0 %845  ;;  %v2263_v46 = vpop.permute.xlu1 %809  ;;  %v395_v24 = vadd.f32 %v393_v51, %v375_v34  ;;  %v433_v16 = vsel %vm423_vm10, %v2762_v47, 0.0  ;;  %v2765_v34 = vld [vmem:[#allocation59_spill] sm:$0xff]  ;;  %v2768_v47 = vld [vmem:[#allocation62_spill] sm:$0xff] }
 0x1a1   :  { %vm442_vm13 = vcmp.eq.s32.totalorder %v2158_v0, %v2765_v34  ;;  %vm463_vm14 = vcmp.eq.s32.totalorder %v2158_v0, %v2768_v47  ;;  %v2774_v47 = vld [vmem:[#allocation68_spill] sm:$0xff] }
 0x1a2   :  { %1490 = vset.pattern.permute.xlu1 %v1522_v42  ;;  %v394_v42 = vadd.f32 %v392_v7, %v374_v22  ;;  %v415_v27 = vadd.f32 %v413_v43, %v395_v24  ;;  %v2767_v22 = vld [vmem:[#allocation61_spill] sm:$0xff]  ;;  %v2769_v43 = vld [vmem:[#allocation66_spill] sm:$0xff]  ;;  %v473_v34 = vsel %vm463_vm14, %v2771_v53, 0.0  ;;  %vm502_vm2 = vcmp.eq.s32.totalorder %v2158_v0, %v2774_v47 }
 0x1a3   :  { %1165 = vperm.xlu0 %1491, %v1618_v1   ;;  %1117 = vperm.xlu1 %1490, %v1634_v9   ;;  %v2764_v1 = vld [vmem:[#allocation58_spill] sm:$0xff]  ;;  %v452_v36 = vsel %vm442_vm13, %v2767_v22, 0.0  ;;  %vm483_vm15 = vcmp.eq.s32.totalorder %v2158_v0, %v2769_v43  ;;  %v2775_v43 = vld [vmem:[#allocation71_spill] sm:$0xff]  ;;  %v2777_v53 = vld [vmem:[#allocation73_spill] sm:$0xff] }
 0x1a4   :  { %v2280_v12 = vpop.permute.xlu0 %857  ;;  %v2282_v50 = vpop.permute.xlu1 %820  ;;  %vm443_vm12 = vcmp.eq.s32.totalorder %v2158_v0, %v2764_v1  ;;  %v414_v51 = vadd.f32 %v412_v44, %v394_v42  ;;  %v435_v7 = vadd.f32 %v433_v16, %v415_v27  ;;  %v2770_v42 = vld [vmem:[#allocation63_spill] sm:$0xff]  ;;  %v2772_v16 = vld [vmem:[#allocation65_spill] sm:$0xff]  ;;  %v493_v25 = vsel %vm483_vm15, %v2775_v43, 0.0  ;;  %v2780_v47 = vld [vmem:[#allocation70_spill] sm:$0xff] }
 0x1a5   :  { %v453_v17 = vsel %vm443_vm12, %v2766_v8, 0.0  ;;  %vm462_vm0 = vcmp.eq.s32.totalorder %v2158_v0, %v2770_v42  ;;  %vm503_vm3 = vcmp.eq.s32.totalorder %v2158_v0, %v2777_v53  ;;  %v512_v43 = vsel %vm502_vm2, %v2780_v47, 0.0  ;;  %v2787_v47 = vld [vmem:[#allocation78_spill] sm:$0xff] }
 0x1a6   :  { %v434_v44 = vadd.f32 %v432_v28, %v414_v51  ;;  %v455_v8 = vadd.f32 %v453_v17, %v435_v7  ;;  %v472_v27 = vsel %vm462_vm0, %v2772_v16, 0.0  ;;  %v2776_v51 = vld [vmem:[#allocation69_spill] sm:$0xff] }
 0x1a7   :  { %1177 = vperm.xlu0 %1491, %v1667_v31   ;;  %1125 = vperm.xlu1 %1490, %v1613_v62   ;;  %v2773_v31 = vld [vmem:[#allocation67_spill] sm:$0xff]  ;;  %v2789_v62 = vld [vmem:[#allocation80_spill] sm:$0xff] }
 0x1a8   :  { %v2300_v1 = vpop.permute.xlu0 %865  ;;  %v2302_v24 = vpop.permute.xlu1 %829  ;;  %v454_v22 = vadd.f32 %v452_v36, %v434_v44  ;;  %vm482_vm1 = vcmp.eq.s32.totalorder %v2158_v0, %v2773_v31  ;;  %v475_v28 = vadd.f32 %v473_v34, %v455_v8  ;;  %v2778_v36 = vld [vmem:[#allocation72_spill] sm:$0xff]  ;;  %v2779_v44 = vld [vmem:[#allocation75_spill] sm:$0xff]  ;;  %vm562_vm9 = vcmp.eq.s32.totalorder %v2158_v0, %v2789_v62 }
 0x1a9   :  { %v492_v42 = vsel %vm482_vm1, %v2776_v51, 0.0  ;;  %vm522_vm4 = vcmp.eq.s32.totalorder %v2158_v0, %v2778_v36  ;;  %v513_v16 = vsel %vm503_vm3, %v2779_v44, 0.0  ;;  %v2782_v8 = vld [vmem:[#allocation76_spill] sm:$0xff]  ;;  %v2783_v51 = vld [vmem:[#allocation79_spill] sm:$0xff]  ;;  %v2785_v44 = vld [vmem:[#allocation81_spill] sm:$0xff]  ;;  %vm662_vm3 = vcmp.eq.s32.totalorder %v2158_v0, %v2096_v10 }
 0x1aa   :  { %v474_v31 = vadd.f32 %v472_v27, %v454_v22  ;;  %vm542_vm6 = vcmp.eq.s32.totalorder %v2158_v0, %v2782_v8  ;;  %v533_v53 = vsel %vm523_vm5, %v2783_v51, 0.0  ;;  %v2784_v27 = vld [vmem:[#allocation74_spill] sm:$0xff]  ;;  %vm543_vm7 = vcmp.eq.s32.totalorder %v2158_v0, %v2785_v44  ;;  %v2792_v44 = vld [vmem:[#allocation89_spill] sm:$0xff]  ;;  %v2794_v62 = vld [vmem:[#allocation91_spill] sm:$0xff] }
 0x1ab   :  { %1185 = vperm.xlu0 %1491, %v1675_v38   ;;  %1129 = vperm.xlu1 %1490, %v1621_v2   ;;  %v495_v38 = vadd.f32 %v493_v25, %v475_v28  ;;  %v532_v22 = vsel %vm522_vm4, %v2784_v27, 0.0  ;;  %v552_v8 = vsel %vm542_vm6, %v2787_v47, 0.0  ;;  %v2791_v27 = vld [vmem:[#allocation82_spill] sm:$0xff]  ;;  %vm583_vm10 = vcmp.eq.s32.totalorder %v2158_v0, %v2792_v44  ;;  %v2813_v10 = vld [vmem:[#allocation105_spill] sm:$0xff] }
 0x1ac   :  { %v2318_v17 = vpop.permute.xlu0 %877  ;;  %v2320_v7 = vpop.permute.xlu1 %840  ;;  %v494_v34 = vadd.f32 %v492_v42, %v474_v31  ;;  %v2786_v42 = vld [vmem:[#allocation83_spill] sm:$0xff]  ;;  %vm682_vm5 = vcmp.eq.s32.totalorder %v2158_v0, %v2108_v59  ;;  %vm702_vm6 = vcmp.eq.s32.totalorder %v2158_v0, %v2120_v57 }
 0x1ad   :  { %v515_v36 = vadd.f32 %v513_v16, %v495_v38  ;;  %v553_v31 = vsel %vm543_vm7, %v2786_v42, 0.0  ;;  %v2790_v38 = vld [vmem:[#allocation87_spill] sm:$0xff]  ;;  %v2795_v42 = vld [vmem:[#allocation86_spill] sm:$0xff]  ;;  %v712_v59 = vsel %vm702_vm6, %v2126_v32, 0.0  ;;  %vm842_vm6 = vcmp.eq.s32.totalorder %v2158_v0, %v2245_v18 }
 0x1ae   :  { %v514_v61 = vadd.f32 %v512_v43, %v494_v34  ;;  %v573_v16 = vsel %vm563_vm8, %v2790_v38, 0.0  ;;  %v572_v43 = vsel %vm562_vm9, %v2791_v27, 0.0  ;;  %v2798_v27 = vld [vmem:[#allocation95_spill] sm:$0xff]  ;;  %v2819_v32 = vld [vmem:[#allocation110_spill] sm:$0xff] }
 0x1af   :  { %1197 = vperm.xlu0 %1491, %v1691_v29   ;;  %1140 = vperm.xlu1 %1490, %v1656_v21   ;;  %v535_v51 = vadd.f32 %v533_v53, %v515_v36 }
 0x1b0   :  { %v2336_v25 = vpop.permute.xlu0 %885  ;;  %v2338_v28 = vpop.permute.xlu1 %849  ;;  %v534_v29 = vadd.f32 %v532_v22, %v514_v61  ;;  %v2793_v22 = vld [vmem:[#allocation84_spill] sm:$0xff]  ;;  %v593_v61 = vsel %vm583_vm10, %v2794_v62, 0.0  ;;  %vm742_vm10 = vcmp.eq.s32.totalorder %v2158_v0, %v2144_v39 }
 0x1b1   :  { %v555_v34 = vadd.f32 %v553_v31, %v535_v51  ;;  %vm582_vm11 = vcmp.eq.s32.totalorder %v2158_v0, %v2793_v22  ;;  %v2797_v51 = vld [vmem:[#allocation88_spill] sm:$0xff] }
 0x1b2   :  { %v554_v19 = vadd.f32 %v552_v8, %v534_v29  ;;  %v592_v47 = vsel %vm582_vm11, %v2795_v42, 0.0  ;;  %vm602_vm13 = vcmp.eq.s32.totalorder %v2158_v0, %v2797_v51  ;;  %v2799_v29 = vld [vmem:[#allocation90_spill] sm:$0xff]  ;;  %v2800_v62 = vld [vmem:[#allocation96_spill] sm:$0xff]  ;;  %v2803_v42 = vld [vmem:[#allocation97_spill] sm:$0xff] }
 0x1b3   :  { %1205 = vperm.xlu0 %1491, %v1701_v35   ;;  %1149 = vperm.xlu1 %1490, %v1626_v6   ;;  %v575_v38 = vadd.f32 %v573_v16, %v555_v34  ;;  %v2796_v35 = vld [vmem:[#allocation93_spill] sm:$0xff]  ;;  %v612_v8 = vsel %vm602_vm13, %v2799_v29, 0.0  ;;  %vm623_vm14 = vcmp.eq.s32.totalorder %v2158_v0, %v2800_v62  ;;  %vm642_vm1 = vcmp.eq.s32.totalorder %v2158_v0, %v2803_v42  ;;  %v2804_v51 = vld [vmem:[#allocation98_spill] sm:$0xff] }
 0x1b4   :  { %v2352_v53 = vpop.permute.xlu0 %897  ;;  %v2354_v36 = vpop.permute.xlu1 %860  ;;  %vm603_vm12 = vcmp.eq.s32.totalorder %v2158_v0, %v2796_v35  ;;  %v574_v31 = vadd.f32 %v572_v43, %v554_v19  ;;  %v2801_v16 = vld [vmem:[#allocation101_spill] sm:$0xff]  ;;  %v2802_v19 = vld [vmem:[#allocation92_spill] sm:$0xff] }
 0x1b5   :  { %v613_v44 = vsel %vm603_vm12, %v2798_v27, 0.0  ;;  %v595_v22 = vadd.f32 %v593_v61, %v575_v38  ;;  %vm643_vm15 = vcmp.eq.s32.totalorder %v2158_v0, %v2801_v16  ;;  %vm622_vm0 = vcmp.eq.s32.totalorder %v2158_v0, %v2802_v19  ;;  %v2805_v61 = vld [vmem:[#allocation94_spill] sm:$0xff] }
 0x1b6   :  { %v594_v34 = vadd.f32 %v592_v47, %v574_v31  ;;  %v633_v27 = vsel %vm623_vm14, %v2804_v51, 0.0  ;;  %v632_v38 = vsel %vm622_vm0, %v2805_v61, 0.0  ;;  %v2807_v47 = vld [vmem:[#allocation100_spill] sm:$0xff]  ;;  %v2808_v31 = vld [vmem:[#allocation103_spill] sm:$0xff]  ;;  %vm762_vm12 = vcmp.eq.s32.totalorder %v2158_v0, %v2156_v55 }
 0x1b7   :  { %1217 = vperm.xlu0 %1491, %v1709_v52   ;;  %1160 = vperm.xlu1 %1490, %v1664_v26   ;;  %v615_v29 = vadd.f32 %v613_v44, %v595_v22  ;;  %v2806_v52 = vld [vmem:[#allocation99_spill] sm:$0xff]  ;;  %vm663_vm2 = vcmp.eq.s32.totalorder %v2158_v0, %v2807_v47  ;;  %v652_v19 = vsel %vm642_vm1, %v2808_v31, 0.0  ;;  %v772_v39 = vsel %vm762_vm12, %v2168_v30, 0.0 }
 0x1b8   :  { %v2372_v35 = vpop.permute.xlu0 %905  ;;  %v2374_v43 = vpop.permute.xlu1 %869  ;;  %v614_v62 = vadd.f32 %v612_v8, %v594_v34  ;;  %v653_v15 = vsel %vm643_vm15, %v2806_v52, 0.0  ;;  %v2809_v52 = vld [vmem:[#allocation104_spill] sm:$0xff]  ;;  %v2810_v8 = vld [vmem:[#allocation106_spill] sm:$0xff]  ;;  %vm782_vm15 = vcmp.eq.s32.totalorder %v2158_v0, %v2184_v5  ;;  %vm783_vm0 = vcmp.eq.s32.totalorder %v2158_v0, %v2154_v56  ;;  %v2824_v5 = vld [vmem:[#allocation19_spill] sm:$0xff] }
 0x1b9   :  { %v635_v16 = vadd.f32 %v633_v27, %v615_v29  ;;  %vm683_vm4 = vcmp.eq.s32.totalorder %v2158_v0, %v2809_v52  ;;  %v672_v22 = vsel %vm662_vm3, %v2810_v8, 0.0  ;;  %v2811_v34 = vld [vmem:[#allocation102_spill] sm:$0xff]  ;;  %v2812_v29 = vld [vmem:[#allocation13_spill] sm:$0xff]  ;;  %vm803_vm1 = vcmp.eq.s32.totalorder %v2158_v0, %v2190_v20 }
 0x1ba   :  { %v634_v51 = vadd.f32 %v632_v38, %v614_v62  ;;  %v673_v27 = vsel %vm663_vm2, %v2811_v34, 0.0  ;;  %v692_v38 = vsel %vm682_vm5, %v2114_v40, 0.0  ;;  %v2816_v40 = vld [vmem:[#allocation112_spill] sm:$0xff]  ;;  %v2817_v34 = vld [vmem:[#allocation15_spill] sm:$0xff]  ;;  %v792_v30 = vsel %vm782_vm15, %v2204_v23, 0.0 }
 0x1bb   :  { %1225 = vperm.xlu0 %1491, %v1717_v54   ;;  %1169 = vperm.xlu1 %1490, %v1637_v13   ;;  %v655_v44 = vadd.f32 %v653_v15, %v635_v16  ;;  %v693_v16 = vsel %vm683_vm4, %v2813_v10, 0.0  ;;  %vm722_vm8 = vcmp.eq.s32.totalorder %v2158_v0, %v2816_v40  ;;  %vm802_vm2 = vcmp.eq.s32.totalorder %v2158_v0, %v2227_v11 }
 0x1bc   :  { %v2388_v26 = vpop.permute.xlu0 %917  ;;  %v2390_v42 = vpop.permute.xlu1 %880  ;;  %v654_v61 = vadd.f32 %v652_v19, %v634_v51  ;;  %v2814_v19 = vld [vmem:[#allocation107_spill] sm:$0xff]  ;;  %v2815_v51 = vld [vmem:[#allocation108_spill] sm:$0xff]  ;;  %v732_v57 = vsel %vm722_vm8, %v2138_v33, 0.0  ;;  %v2822_v33 = vld [vmem:[#allocation17_spill] sm:$0xff]  ;;  %vm822_vm3 = vcmp.eq.s32.totalorder %v2158_v0, %v2209_v37  ;;  %v813_v20 = vsel %vm803_vm1, %v2263_v46, 0.0 }
 0x1bd   :  { %v675_v31 = vadd.f32 %v673_v27, %v655_v44  ;;  %vm703_vm7 = vcmp.eq.s32.totalorder %v2158_v0, %v2814_v19  ;;  %vm823_vm4 = vcmp.eq.s32.totalorder %v2158_v0, %v2282_v50  ;;  %vm843_vm5 = vcmp.eq.s32.totalorder %v2158_v0, %v2320_v7  ;;  %v2826_v7 = vld [vmem:[#allocation22_spill] sm:$0xff] }
 0x1be   :  { %v674_v47 = vadd.f32 %v672_v22, %v654_v61  ;;  %v713_v52 = vsel %vm703_vm7, %v2815_v51, 0.0  ;;  %v2818_v61 = vld [vmem:[#allocation109_spill] sm:$0xff]  ;;  %v853_v46 = vsel %vm843_vm5, %v2338_v28, 0.0  ;;  %vm863_vm7 = vcmp.eq.s32.totalorder %v2158_v0, %v2354_v36 }
 0x1bf   :  { %1237 = vperm.xlu0 %1491, %v1726_v60   ;;  %1180 = vperm.xlu1 %1490, %v2812_v29   ;;  %v695_v22 = vadd.f32 %v693_v16, %v675_v31  ;;  %vm723_vm9 = vcmp.eq.s32.totalorder %v2158_v0, %v2818_v61  ;;  %v752_v16 = vsel %vm742_vm10, %v2150_v48, 0.0  ;;  %v2821_v31 = vld [vmem:[#allocation113_spill] sm:$0xff]  ;;  %vm862_vm8 = vcmp.eq.s32.totalorder %v2158_v0, %v2280_v12 }
 0x1c0   :  { %v2403_v62 = vpop.permute.xlu0 %925  ;;  %v2405_v15 = vpop.permute.xlu1 %889  ;;  %v694_v8 = vadd.f32 %v692_v38, %v674_v47  ;;  %v733_v10 = vsel %vm723_vm9, %v2819_v32, 0.0  ;;  %v2820_v47 = vld [vmem:[#allocation111_spill] sm:$0xff]  ;;  %vm883_vm9 = vcmp.eq.s32.totalorder %v2158_v0, %v2390_v42 }
 0x1c1   :  { %v715_v38 = vadd.f32 %v713_v52, %v695_v22  ;;  %vm743_vm11 = vcmp.eq.s32.totalorder %v2158_v0, %v2820_v47  ;;  %v1523_v47 = vmov 7   ;;  %v893_v28 = vsel %vm883_vm9, %v2405_v15, 0.0 }
 0x1c2   :  { %v714_v19 = vadd.f32 %v712_v59, %v694_v8  ;;  %v753_v51 = vsel %vm743_vm11, %v2821_v31, 0.0  ;;  %v2823_v8 = vld [vmem:[#allocation114_spill] sm:$0xff]  ;;  %vm882_vm11 = vcmp.eq.s32.totalorder %v2158_v0, %v2318_v17 }
 0x1c3   :  { %1245 = vperm.xlu0 %1491, %v1735_v4   ;;  %1189 = vperm.xlu1 %1490, %v2817_v34   ;;  %v735_v59 = vadd.f32 %v733_v10, %v715_v38  ;;  %vm763_vm13 = vcmp.eq.s32.totalorder %v2158_v0, %v2823_v8  ;;  %v812_v10 = vsel %vm802_vm2, %v2247_v14, 0.0  ;;  %v833_v38 = vsel %vm823_vm4, %v2302_v24, 0.0  ;;  %v2825_v14 = vld [vmem:[#allocation21_spill] sm:$0xff] }
 0x1c4   :  { %v938_v44 = vpop.permute.xlu0 %937  ;;  %v2421_v27 = vpop.permute.xlu1 %900  ;;  %v734_v40 = vadd.f32 %v732_v57, %v714_v19  ;;  %v773_v22 = vsel %vm763_vm13, %v2148_v58, 0.0 }
 0x1c5   :  { %vm942_vm14 = vcmp.eq.s32.totalorder %v2158_v0, %v938_v44  ;;  %v755_v57 = vadd.f32 %v753_v51, %v735_v59  ;;  %v793_v44 = vsel %vm783_vm0, %v2166_v63, 0.0  ;;  %v872_v59 = vsel %vm862_vm8, %v2300_v1, 0.0 }
 0x1c6   :  { %v754_v61 = vadd.f32 %v752_v16, %v734_v40  ;;  %v832_v16 = vsel %vm822_vm3, %v2225_v45, 0.0  ;;  %v873_v45 = vsel %vm863_vm7, %v2374_v43, 0.0  ;;  %vm903_vm10 = vcmp.eq.s32.totalorder %v2158_v0, %v2421_v27  ;;  %v2827_v43 = vld [vmem:[#allocation23_spill] sm:$0xff] }
 0x1c7   :  { %1257 = vperm.xlu0 %1491, %v1743_v3   ;;  %1200 = vperm.xlu1 %1490, %v2822_v33   ;;  %v775_v58 = vadd.f32 %v773_v22, %v755_v57  ;;  %vm922_vm0 = vcmp.eq.s32.totalorder %v2158_v0, %v2388_v26 }
 0x1c8   :  { %v946_v52 = vpop.permute.xlu0 %945  ;;  %v910_v48 = vpop.permute.xlu1 %909  ;;  %v774_v32 = vadd.f32 %v772_v39, %v754_v61  ;;  %v2828_v61 = vld [vmem:[#allocation24_spill] sm:$0xff] }
 0x1c9   :  { %v2441_v55 = vsel %vm942_vm14, %v946_v52, 0.0  ;;  %v795_v63 = vadd.f32 %v793_v44, %v775_v58  ;;  %vm902_vm14 = vcmp.eq.s32.totalorder %v2158_v0, %v2352_v53  ;;  %v2829_v58 = vld [vmem:[#allocation25_spill] sm:$0xff] }
 0x1ca   :  { %v794_v56 = vadd.f32 %v792_v30, %v774_v32  ;;  %v912_v17 = vsel %vm902_vm14, %v2372_v35, 0.0 }
 0x1cb   :  { %1265 = vperm.xlu0 %1491, %v1751_v41   ;;  %1209 = vperm.xlu1 %1490, %v2824_v5   ;;  %v815_v31 = vadd.f32 %v813_v20, %v795_v63 }
 0x1cc   :  { %v921_v19 = vpop.permute.xlu1 %920  ;;  %v814_v11 = vadd.f32 %v812_v10, %v794_v56 }
 0x1cd   :  { %v2457_v23 = vpop.permute.xlu0 %957  ;;  %v835_v24 = vadd.f32 %v833_v38, %v815_v31  ;;  %vm923_vm13 = vcmp.eq.s32.totalorder %v2158_v0, %v921_v19 }
 0x1ce   :  { %v834_v51 = vadd.f32 %v832_v16, %v814_v11  ;;  %vm962_vm2 = vcmp.eq.s32.totalorder %v2158_v0, %v2457_v23  ;;  %v2831_v16 = vld [vmem:[#allocation26_spill] sm:$0xff] }
 0x1cf   :  { %1492 = vset.pattern.permute.xlu0 %v1523_v47  ;;  %1220 = vperm.xlu1 %1490, %v2825_v14   ;;  %v855_v40 = vadd.f32 %v853_v46, %v835_v24  ;;  %v2832_v46 = vld [vmem:[#allocation8_spill] sm:$0xff] }
 0x1d0   :  { %1277 = vperm.xlu0 %1492, %v1634_v9   ;;  %v930_v37 = vpop.permute.xlu1 %929  ;;  %v852_v9 = vsel %vm842_vm6, %v2261_v49, 0.0  ;;  %v913_v49 = vsel %vm903_vm10, %v910_v48, 0.0 }
 0x1d1   :  { %v970_v50 = vpop.permute.xlu0 %969  ;;  %v875_v8 = vadd.f32 %v873_v45, %v855_v40  ;;  %v854_v12 = vadd.f32 %v852_v9, %v834_v51  ;;  %v933_v27 = vsel %vm923_vm13, %v930_v37, 0.0 }
 0x1d3   :  { %1229 = vperm.xlu1 %1490, %v2826_v7   ;;  %v895_v42 = vadd.f32 %v893_v28, %v875_v8  ;;  %v874_v15 = vadd.f32 %v872_v59, %v854_v12 }
 0x1d4   :  { %1289 = vperm.xlu0 %1492, %v1621_v2   ;;  %v941_v18 = vpop.permute.xlu1 %940  ;;  %v892_v2 = vsel %vm882_vm11, %v2336_v25, 0.0 }
 0x1d5   :  { %v981_v36 = vpop.permute.xlu0 %980  ;;  %v915_v52 = vadd.f32 %v913_v49, %v895_v42  ;;  %vm943_vm15 = vcmp.eq.s32.totalorder %v2158_v0, %v941_v18  ;;  %v894_v22 = vadd.f32 %v892_v2, %v874_v15 }
 0x1d6   :  { %vm983_vm12 = vcmp.eq.s32.totalorder %v2158_v0, %v981_v36 }
 0x1d7   :  { %1240 = vperm.xlu1 %1490, %v2827_v43   ;;  %v935_v57 = vadd.f32 %v933_v27, %v915_v52  ;;  %v914_v53 = vadd.f32 %v912_v17, %v894_v22 }
 0x1d8   :  { %1300 = vperm.xlu0 %1492, %v1656_v21   ;;  %v950_v1 = vpop.permute.xlu1 %949  ;;  %v932_v21 = vsel %vm922_vm0, %v2403_v62, 0.0  ;;  %v2830_v62 = vld [vmem:[#allocation11_spill] sm:$0xff] }
 0x1d9   :  { %v990_v39 = vpop.permute.xlu0 %989  ;;  %v953_v25 = vsel %vm943_vm15, %v950_v1, 0.0  ;;  %v934_v32 = vadd.f32 %v932_v21, %v914_v53 }
 0x1da   :  { %v993_v48 = vsel %vm983_vm12, %v990_v39, 0.0  ;;  %v955_v35 = vadd.f32 %v953_v25, %v935_v57 }
 0x1db   :  { %1249 = vperm.xlu1 %1490, %v2828_v61  }
 0x1dc   :  { %1309 = vperm.xlu0 %1492, %v1626_v6   ;;  %v954_v6 = vadd.f32 %v2441_v55, %v934_v32 }
 0x1dd   :  { %v1001_v30 = vpop.permute.xlu0 %1000  ;;  %v961_v44 = vpop.permute.xlu1 %960 }
 0x1de   :  { %vm963_vm1 = vcmp.eq.s32.totalorder %v2158_v0, %v961_v44  ;;  %vm1003_vm3 = vcmp.eq.s32.totalorder %v2158_v0, %v1001_v30 }
 0x1df   :  { %v973_v26 = vsel %vm963_vm1, %v970_v50, 0.0  ;;  %1260 = vperm.xlu1 %1490, %v2829_v58  }
 0x1e0   :  { %v975_v10 = vadd.f32 %v973_v26, %v955_v35  ;;  %1320 = vperm.xlu0 %1492, %v2830_v62  }
 0x1e1   :  { %v1010_v19 = vpop.permute.xlu0 %1009  ;;  %v966_v56 = vpop.permute.xlu1 %965 }
 0x1e2   :  { %v995_v20 = vadd.f32 %v993_v48, %v975_v10  ;;  %v1013_v63 = vsel %vm1003_vm3, %v1010_v19, 0.0  ;;  %v972_v11 = vsel %vm962_vm2, %v966_v56, 0.0 }
 0x1e3   :  { %v974_v38 = vadd.f32 %v972_v11, %v954_v6  ;;  %1269 = vperm.xlu1 %1490, %v2831_v16  }
 0x1e4   :  { %v1015_v31 = vadd.f32 %v1013_v63, %v995_v20  ;;  %1329 = vperm.xlu0 %1492, %v1637_v13   ;;  %v2833_v13 = vld [vmem:[#allocation6_spill] sm:$0xff]  ;;  %v2842_v63 = vld [vmem:[#allocation20_spill] sm:$0xff] }
 0x1e5   :  { %v1021_v23 = vpop.permute.xlu0 %1020  ;;  %v978_v37 = vpop.permute.xlu1 %977 }
 0x1e6   :  { %vm1023_vm4 = vcmp.eq.s32.totalorder %v2158_v0, %v1021_v23  ;;  %vm982_vm5 = vcmp.eq.s32.totalorder %v2158_v0, %v978_v37 }
 0x1e7   :  { %1493 = vset.pattern.permute.xlu1 %v1523_v47 }
 0x1e8   :  { %1340 = vperm.xlu0 %1492, %v2812_v29   ;;  %1280 = vperm.xlu1 %1493, %v2832_v46   ;;  %v2834_v29 = vld [vmem:[#allocation9_spill] sm:$0xff] }
 0x1e9   :  { %v1030_v55 = vpop.permute.xlu0 %1029  ;;  %v986_v50 = vpop.permute.xlu1 %985 }
 0x1ea   :  { %v1033_v24 = vsel %vm1023_vm4, %v1030_v55, 0.0  ;;  %v992_v51 = vsel %vm982_vm5, %v986_v50, 0.0 }
 0x1eb   :  { %v1035_v45 = vadd.f32 %v1033_v24, %v1015_v31  ;;  %v994_v9 = vadd.f32 %v992_v51, %v974_v38 }
 0x1ec   :  { %1349 = vperm.xlu0 %1492, %v2817_v34   ;;  %1285 = vperm.xlu1 %1493, %v2833_v13   ;;  %v2835_v34 = vld [vmem:[#allocation5_spill] sm:$0xff] }
 0x1ed   :  { %v1041_v40 = vpop.permute.xlu0 %1040  ;;  %v998_v47 = vpop.permute.xlu1 %997 }
 0x1ee   :  { %vm1043_vm6 = vcmp.eq.s32.totalorder %v2158_v0, %v1041_v40  ;;  %vm1002_vm7 = vcmp.eq.s32.totalorder %v2158_v0, %v998_v47 }
 0x1f0   :  { %1360 = vperm.xlu0 %1492, %v2822_v33   ;;  %1297 = vperm.xlu1 %1493, %v2834_v29   ;;  %v2836_v33 = vld [vmem:[#allocation10_spill] sm:$0xff] }
 0x1f1   :  { %v1050_v18 = vpop.permute.xlu0 %1049  ;;  %v1006_v28 = vpop.permute.xlu1 %1005 }
 0x1f2   :  { %v1053_v36 = vsel %vm1043_vm6, %v1050_v18, 0.0  ;;  %v1012_v59 = vsel %vm1002_vm7, %v1006_v28, 0.0 }
 0x1f3   :  { %v1055_v8 = vadd.f32 %v1053_v36, %v1035_v45  ;;  %v1014_v12 = vadd.f32 %v1012_v59, %v994_v9 }
 0x1f4   :  { %1369 = vperm.xlu0 %1492, %v2824_v5   ;;  %1305 = vperm.xlu1 %1493, %v2835_v34   ;;  %v2837_v5 = vld [vmem:[#allocation7_spill] sm:$0xff] }
 0x1f5   :  { %v1061_v49 = vpop.permute.xlu0 %1060  ;;  %v1018_v2 = vpop.permute.xlu1 %1017 }
 0x1f6   :  { %vm1063_vm8 = vcmp.eq.s32.totalorder %v2158_v0, %v1061_v49  ;;  %vm1022_vm9 = vcmp.eq.s32.totalorder %v2158_v0, %v1018_v2 }
 0x1f8   :  { %1380 = vperm.xlu0 %1492, %v2825_v14   ;;  %1317 = vperm.xlu1 %1493, %v2836_v33   ;;  %v2838_v14 = vld [vmem:[#allocation12_spill] sm:$0xff] }
 0x1f9   :  { %v1070_v42 = vpop.permute.xlu0 %1069  ;;  %v1026_v1 = vpop.permute.xlu1 %1025 }
 0x1fa   :  { %v1073_v15 = vsel %vm1063_vm8, %v1070_v42, 0.0  ;;  %v1032_v27 = vsel %vm1022_vm9, %v1026_v1, 0.0 }
 0x1fb   :  { %v1075_v39 = vadd.f32 %v1073_v15, %v1055_v8  ;;  %v1034_v17 = vadd.f32 %v1032_v27, %v1014_v12 }
 0x1fc   :  { %1389 = vperm.xlu0 %1492, %v2826_v7   ;;  %1325 = vperm.xlu1 %1493, %v2837_v5   ;;  %v2839_v7 = vld [vmem:[#allocation14_spill] sm:$0xff] }
 0x1fd   :  { %v1081_v52 = vpop.permute.xlu0 %1080  ;;  %v1038_v48 = vpop.permute.xlu1 %1037 }
 0x1fe   :  { %vm1083_vm10 = vcmp.eq.s32.totalorder %v2158_v0, %v1081_v52  ;;  %vm1042_vm11 = vcmp.eq.s32.totalorder %v2158_v0, %v1038_v48 }
 0x200   :  { %1400 = vperm.xlu0 %1492, %v2827_v43   ;;  %1337 = vperm.xlu1 %1493, %v2838_v14   ;;  %v2840_v43 = vld [vmem:[#allocation16_spill] sm:$0xff] }
 0x201   :  { %v1090_v22 = vpop.permute.xlu0 %1089  ;;  %v1046_v25 = vpop.permute.xlu1 %1045 }
 0x202   :  { %v1093_v21 = vsel %vm1083_vm10, %v1090_v22, 0.0  ;;  %v1052_v57 = vsel %vm1042_vm11, %v1046_v25, 0.0 }
 0x203   :  { %v1095_v53 = vadd.f32 %v1093_v21, %v1075_v39  ;;  %v1054_v30 = vadd.f32 %v1052_v57, %v1034_v17 }
 0x204   :  { %1409 = vperm.xlu0 %1492, %v2828_v61   ;;  %1345 = vperm.xlu1 %1493, %v2839_v7   ;;  %v2841_v61 = vld [vmem:[#allocation18_spill] sm:$0xff] }
 0x205   :  { %v1101_v44 = vpop.permute.xlu0 %1100  ;;  %v1058_v35 = vpop.permute.xlu1 %1057 }
 0x206   :  { %vm1103_vm12 = vcmp.eq.s32.totalorder %v2158_v0, %v1101_v44  ;;  %vm1062_vm13 = vcmp.eq.s32.totalorder %v2158_v0, %v1058_v35 }
 0x208   :  { %1420 = vperm.xlu0 %1492, %v2829_v58   ;;  %1357 = vperm.xlu1 %1493, %v2840_v43  }
 0x209   :  { %v1110_v32 = vpop.permute.xlu0 %1109  ;;  %v1066_v26 = vpop.permute.xlu1 %1065 }
 0x20a   :  { %v1113_v10 = vsel %vm1103_vm12, %v1110_v32, 0.0  ;;  %v1072_v62 = vsel %vm1062_vm13, %v1066_v26, 0.0 }
 0x20b   :  { %v1115_v6 = vadd.f32 %v1113_v10, %v1095_v53  ;;  %v1074_v19 = vadd.f32 %v1072_v62, %v1054_v30 }
 0x20c   :  { %1429 = vperm.xlu0 %1492, %v2831_v16   ;;  %1365 = vperm.xlu1 %1493, %v2841_v61  }
 0x20d   :  { %v1078_v56 = vpop.permute.xlu1 %1077 }
 0x20e   :  { %v1121_v20 = vpop.permute.xlu0 %1120  ;;  %vm1082_vm14 = vcmp.eq.s32.totalorder %v2158_v0, %v1078_v56 }
 0x20f   :  { %vm1123_vm3 = vcmp.eq.s32.totalorder %v2158_v0, %v1121_v20 }
 0x210   :  { %1377 = vperm.xlu1 %1493, %v2842_v63  }
 0x211   :  { %v1086_v58 = vpop.permute.xlu1 %1085 }
 0x212   :  { %v1092_v11 = vsel %vm1082_vm14, %v1086_v58, 0.0  ;;  %v1138_v38 = vpop.permute.xlu0 %1137 }
 0x213   :  { %v1094_v31 = vadd.f32 %v1092_v11, %v1074_v19  ;;  %vm1142_vm15 = vcmp.eq.s32.totalorder %v2158_v0, %v1138_v38 }
 0x214   :  { %1385 = vperm.xlu1 %1493, %v1717_v54  }
 0x215   :  { %v1098_v23 = vpop.permute.xlu1 %1097 }
 0x216   :  { %v1146_v37 = vpop.permute.xlu0 %1145  ;;  %vm1102_vm0 = vcmp.eq.s32.totalorder %v2158_v0, %v1098_v23 }
 0x217   :  { %v1152_v46 = vsel %vm1142_vm15, %v1146_v37, 0.0 }
 0x218   :  { %1397 = vperm.xlu1 %1493, %v1726_v60  }
 0x219   :  { %v1106_v16 = vpop.permute.xlu1 %1105 }
 0x21a   :  { %v1112_v55 = vsel %vm1102_vm0, %v1106_v16, 0.0  ;;  %v1158_v50 = vpop.permute.xlu0 %1157 }
 0x21b   :  { %v1114_v24 = vadd.f32 %v1112_v55, %v1094_v31  ;;  %vm1162_vm1 = vcmp.eq.s32.totalorder %v2158_v0, %v1158_v50 }
 0x21c   :  { %1405 = vperm.xlu1 %1493, %v1735_v4  }
 0x21e   :  { %v1166_v51 = vpop.permute.xlu0 %1165  ;;  %v1118_v45 = vpop.permute.xlu1 %1117 }
 0x21f   :  { %v1172_v9 = vsel %vm1162_vm1, %v1166_v51, 0.0  ;;  %vm1122_vm2 = vcmp.eq.s32.totalorder %v2158_v0, %v1118_v45 }
 0x220   :  { %1417 = vperm.xlu1 %1493, %v1743_v3  }
 0x222   :  { %v1178_v54 = vpop.permute.xlu0 %1177  ;;  %v1126_v13 = vpop.permute.xlu1 %1125 }
 0x223   :  { %v1132_v60 = vsel %vm1122_vm2, %v1126_v13, 0.0  ;;  %vm1182_vm4 = vcmp.eq.s32.totalorder %v2158_v0, %v1178_v54 }
 0x224   :  { %v1134_v40 = vadd.f32 %v1132_v60, %v1114_v24  ;;  %1425 = vperm.xlu1 %1493, %v1751_v41  }
 0x226   :  { %v1154_v47 = vadd.f32 %v1152_v46, %v1134_v40  ;;  %v1186_v29 = vpop.permute.xlu0 %1185  ;;  %v1130_v4 = vpop.permute.xlu1 %1129 }
 0x227   :  { %v1192_v18 = vsel %vm1182_vm4, %v1186_v29, 0.0  ;;  %v1133_v28 = vsel %vm1123_vm3, %v1130_v4, 0.0 }
 0x228   :  { %v1174_v36 = vadd.f32 %v1172_v9, %v1154_v47  ;;  %v1135_v59 = vadd.f32 %v1133_v28, %v1115_v6 }
 0x22a   :  { %v1194_v3 = vadd.f32 %v1192_v18, %v1174_v36  ;;  %v1198_v8 = vpop.permute.xlu0 %1197  ;;  %v1141_v12 = vpop.permute.xlu1 %1140 }
 0x22b   :  { %vm1202_vm5 = vcmp.eq.s32.totalorder %v2158_v0, %v1198_v8  ;;  %vm1143_vm9 = vcmp.eq.s32.totalorder %v2158_v0, %v1141_v12 }
 0x22e   :  { %v1206_v34 = vpop.permute.xlu0 %1205  ;;  %v1150_v49 = vpop.permute.xlu1 %1149 }
 0x22f   :  { %v1212_v2 = vsel %vm1202_vm5, %v1206_v34, 0.0  ;;  %v1153_v11 = vsel %vm1143_vm9, %v1150_v49, 0.0  ;;  %vm1436_vm9 = vcmask 523264  }
 0x230   :  { %v1214_v33 = vadd.f32 %v1212_v2, %v1194_v3  ;;  %v1155_v31 = vadd.f32 %v1153_v11, %v1135_v59 }
 0x232   :  { %v1218_v42 = vpop.permute.xlu0 %1217  ;;  %v1161_v1 = vpop.permute.xlu1 %1160 }
 0x233   :  { %vm1222_vm6 = vcmp.eq.s32.totalorder %v2158_v0, %v1218_v42  ;;  %vm1163_vm10 = vcmp.eq.s32.totalorder %v2158_v0, %v1161_v1 }
 0x236   :  { %v1226_v41 = vpop.permute.xlu0 %1225  ;;  %v1170_v15 = vpop.permute.xlu1 %1169 }
 0x237   :  { %v1232_v27 = vsel %vm1222_vm6, %v1226_v41, 0.0  ;;  %v1173_v38 = vsel %vm1163_vm10, %v1170_v15, 0.0 }
 0x238   :  { %v1234_v39 = vadd.f32 %v1232_v27, %v1214_v33  ;;  %v1175_v55 = vadd.f32 %v1173_v38, %v1155_v31 }
 0x23a   :  { %v1238_v17 = vpop.permute.xlu0 %1237  ;;  %v1181_v5 = vpop.permute.xlu1 %1180 }
 0x23b   :  { %vm1242_vm7 = vcmp.eq.s32.totalorder %v2158_v0, %v1238_v17  ;;  %vm1183_vm11 = vcmp.eq.s32.totalorder %v2158_v0, %v1181_v5 }
 0x23e   :  { %v1246_v52 = vpop.permute.xlu0 %1245  ;;  %v1190_v48 = vpop.permute.xlu1 %1189 }
 0x23f   :  { %v1252_v14 = vsel %vm1242_vm7, %v1246_v52, 0.0  ;;  %v1193_v46 = vsel %vm1183_vm11, %v1190_v48, 0.0 }
 0x240   :  { %v1254_v22 = vadd.f32 %v1252_v14, %v1234_v39  ;;  %v1195_v51 = vadd.f32 %v1193_v46, %v1175_v55 }
 0x242   :  { %v1258_v25 = vpop.permute.xlu0 %1257  ;;  %v1201_v21 = vpop.permute.xlu1 %1200 }
 0x243   :  { %vm1262_vm8 = vcmp.eq.s32.totalorder %v2158_v0, %v1258_v25  ;;  %vm1203_vm13 = vcmp.eq.s32.totalorder %v2158_v0, %v1201_v21 }
 0x246   :  { %v1266_v57 = vpop.permute.xlu0 %1265  ;;  %v1210_v53 = vpop.permute.xlu1 %1209 }
 0x247   :  { %v1272_v30 = vsel %vm1262_vm8, %v1266_v57, 0.0  ;;  %v1213_v24 = vsel %vm1203_vm13, %v1210_v53, 0.0 }
 0x248   :  { %v1274_v7 = vadd.f32 %v1272_v30, %v1254_v22  ;;  %v1215_v13 = vadd.f32 %v1213_v24, %v1195_v51 }
 0x24a   :  { %v1221_v44 = vpop.permute.xlu1 %1220 }
 0x24b   :  { %v1278_v35 = vpop.permute.xlu0 %1277  ;;  %vm1223_vm14 = vcmp.eq.s32.totalorder %v2158_v0, %v1221_v44 }
 0x24c   :  { %vm1282_vm12 = vcmp.eq.s32.totalorder %v2158_v0, %v1278_v35 }
 0x24e   :  { %v1230_v43 = vpop.permute.xlu1 %1229 }
 0x24f   :  { %v1290_v32 = vpop.permute.xlu0 %1289  ;;  %v1233_v54 = vsel %vm1223_vm14, %v1230_v43, 0.0 }
 0x250   :  { %v1235_v40 = vadd.f32 %v1233_v54, %v1215_v13 }
 0x252   :  { %v1241_v26 = vpop.permute.xlu1 %1240 }
 0x253   :  { %v1301_v10 = vpop.permute.xlu0 %1300  ;;  %vm1243_vm15 = vcmp.eq.s32.totalorder %v2158_v0, %v1241_v26 }
 0x254   :  { %vm1303_vm2 = vcmp.eq.s32.totalorder %v2158_v0, %v1301_v10 }
 0x256   :  { %v1250_v62 = vpop.permute.xlu1 %1249 }
 0x257   :  { %v1310_v6 = vpop.permute.xlu0 %1309  ;;  %v1253_v60 = vsel %vm1243_vm15, %v1250_v62, 0.0 }
 0x258   :  { %v1255_v18 = vadd.f32 %v1253_v60, %v1235_v40  ;;  %v1313_v49 = vsel %vm1303_vm2, %v1310_v6, 0.0 }
 0x25a   :  { %v1261_v19 = vpop.permute.xlu1 %1260 }
 0x25b   :  { %v1321_v61 = vpop.permute.xlu0 %1320  ;;  %vm1263_vm0 = vcmp.eq.s32.totalorder %v2158_v0, %v1261_v19 }
 0x25c   :  { %vm1323_vm3 = vcmp.eq.s32.totalorder %v2158_v0, %v1321_v61 }
 0x25e   :  { %v1270_v56 = vpop.permute.xlu1 %1269 }
 0x25f   :  { %v1330_v20 = vpop.permute.xlu0 %1329  ;;  %v1273_v4 = vsel %vm1263_vm0, %v1270_v56, 0.0 }
 0x260   :  { %v1275_v36 = vadd.f32 %v1273_v4, %v1255_v18  ;;  %v1333_v1 = vsel %vm1323_vm3, %v1330_v20, 0.0 }
 0x263   :  { %v1341_v63 = vpop.permute.xlu0 %1340  ;;  %v1281_v58 = vpop.permute.xlu1 %1280 }
 0x264   :  { %vm1283_vm1 = vcmp.eq.s32.totalorder %v2158_v0, %v1281_v58  ;;  %vm1343_vm4 = vcmp.eq.s32.totalorder %v2158_v0, %v1341_v63 }
 0x265   :  { %v1293_v28 = vsel %vm1283_vm1, %v1290_v32, 0.0 }
 0x266   :  { %v1295_v8 = vadd.f32 %v1293_v28, %v1275_v36 }
 0x267   :  { %v1350_v23 = vpop.permute.xlu0 %1349  ;;  %v1286_v37 = vpop.permute.xlu1 %1285 }
 0x268   :  { %v1292_v16 = vsel %vm1282_vm12, %v1286_v37, 0.0  ;;  %v1315_v2 = vadd.f32 %v1313_v49, %v1295_v8  ;;  %v1353_v39 = vsel %vm1343_vm4, %v1350_v23, 0.0 }
 0x269   :  { %v1294_v50 = vadd.f32 %v1292_v16, %v1274_v7 }
 0x26a   :  { %v1335_v41 = vadd.f32 %v1333_v1, %v1315_v2 }
 0x26b   :  { %v1361_v45 = vpop.permute.xlu0 %1360  ;;  %v1298_v9 = vpop.permute.xlu1 %1297 }
 0x26c   :  { %vm1363_vm5 = vcmp.eq.s32.totalorder %v2158_v0, %v1361_v45  ;;  %v1355_v5 = vadd.f32 %v1353_v39, %v1335_v41  ;;  %vm1302_vm10 = vcmp.eq.s32.totalorder %v2158_v0, %v1298_v9 }
 0x26f   :  { %v1370_v47 = vpop.permute.xlu0 %1369  ;;  %v1306_v29 = vpop.permute.xlu1 %1305 }
 0x270   :  { %v1373_v17 = vsel %vm1363_vm5, %v1370_v47, 0.0  ;;  %v1312_v32 = vsel %vm1302_vm10, %v1306_v29, 0.0 }
 0x271   :  { %v1375_v48 = vadd.f32 %v1373_v17, %v1355_v5  ;;  %v1314_v62 = vadd.f32 %v1312_v32, %v1294_v50 }
 0x273   :  { %v1381_v59 = vpop.permute.xlu0 %1380  ;;  %v1318_v3 = vpop.permute.xlu1 %1317 }
 0x274   :  { %vm1383_vm6 = vcmp.eq.s32.totalorder %v2158_v0, %v1381_v59  ;;  %vm1322_vm11 = vcmp.eq.s32.totalorder %v2158_v0, %v1318_v3 }
 0x277   :  { %v1390_v12 = vpop.permute.xlu0 %1389  ;;  %v1326_v34 = vpop.permute.xlu1 %1325 }
 0x278   :  { %v1393_v52 = vsel %vm1383_vm6, %v1390_v12, 0.0  ;;  %v1332_v10 = vsel %vm1322_vm11, %v1326_v34, 0.0 }
 0x279   :  { %v1395_v21 = vadd.f32 %v1393_v52, %v1375_v48  ;;  %v1334_v19 = vadd.f32 %v1332_v10, %v1314_v62 }
 0x27b   :  { %v1401_v33 = vpop.permute.xlu0 %1400  ;;  %v1338_v42 = vpop.permute.xlu1 %1337 }
 0x27c   :  { %vm1403_vm7 = vcmp.eq.s32.totalorder %v2158_v0, %v1401_v33  ;;  %vm1342_vm12 = vcmp.eq.s32.totalorder %v2158_v0, %v1338_v42 }
 0x27f   :  { %v1410_v15 = vpop.permute.xlu0 %1409  ;;  %v1346_v27 = vpop.permute.xlu1 %1345 }
 0x280   :  { %v1413_v25 = vsel %vm1403_vm7, %v1410_v15, 0.0  ;;  %v1352_v6 = vsel %vm1342_vm12, %v1346_v27, 0.0 }
 0x281   :  { %v1415_v57 = vadd.f32 %v1413_v25, %v1395_v21  ;;  %v1354_v20 = vadd.f32 %v1352_v6, %v1334_v19 }
 0x283   :  { %v1421_v14 = vpop.permute.xlu0 %1420  ;;  %v1358_v22 = vpop.permute.xlu1 %1357 }
 0x284   :  { %vm1423_vm8 = vcmp.eq.s32.totalorder %v2158_v0, %v1421_v14  ;;  %vm1362_vm13 = vcmp.eq.s32.totalorder %v2158_v0, %v1358_v22 }
 0x287   :  { %v1430_v53 = vpop.permute.xlu0 %1429  ;;  %v1366_v30 = vpop.permute.xlu1 %1365 }
 0x288   :  { %v1433_v7 = vsel %vm1423_vm8, %v1430_v53, 0.0  ;;  %v1372_v56 = vsel %vm1362_vm13, %v1366_v30, 0.0 }
 0x289   :  { %v1435_v44 = vadd.f32 %v1433_v7, %v1415_v57  ;;  %v1374_v58 = vadd.f32 %v1372_v56, %v1354_v20 }
 0x28b   :  { %1438 = vst.msk [vmem:[#allocation2 + $0x8] sm:$0xff] %vm1436_vm9, %v1435_v44  ;;  %v1378_v35 = vpop.permute.xlu1 %1377 }
 0x28c   :  { %vm1382_vm14 = vcmp.eq.s32.totalorder %v2158_v0, %v1378_v35 }
 0x28f   :  { %v1386_v43 = vpop.permute.xlu1 %1385 }
 0x290   :  { %v1392_v63 = vsel %vm1382_vm14, %v1386_v43, 0.0 }
 0x291   :  { %v1394_v31 = vadd.f32 %v1392_v63, %v1374_v58 }
 0x293   :  { %v1398_v26 = vpop.permute.xlu1 %1397 }
 0x294   :  { %vm1402_vm15 = vcmp.eq.s32.totalorder %v2158_v0, %v1398_v26 }
 0x297   :  { %v1406_v61 = vpop.permute.xlu1 %1405 }
 0x298   :  { %v1412_v38 = vsel %vm1402_vm15, %v1406_v61, 0.0 }
 0x299   :  { %v1414_v23 = vadd.f32 %v1412_v38, %v1394_v31 }
 0x29b   :  { %v1418_v11 = vpop.permute.xlu1 %1417 }
 0x29c   :  { %vm1422_vm0 = vcmp.eq.s32.totalorder %v2158_v0, %v1418_v11 }
 0x29f   :  { %v1426_v37 = vpop.permute.xlu1 %1425 }
 0x2a0   :  { %v1432_v46 = vsel %vm1422_vm0, %v1426_v37, 0.0 }
 0x2a1   :  { %v1434_v16 = vadd.f32 %v1432_v46, %v1414_v23 }
 0x2a3   :  { %1437 = vst.msk [vmem:[#allocation2] sm:$0xff] %vm1436_vm9, %v1434_v16 }
 0x2a4   :  { %1505 = shalt.err (!%p1502_p4)
}
 0x2a5   :  { %s1525_s30 = smov 128   ;;  %s1526_s5 = smov 8  }
 0x2a6   :  { %1450 = dma.vmem_to_hbm [thread:$0]  %s1445_s28, 256, %s2590_s4, [#allocation3], %s1525_s30, %s1525_s30, %s1526_s5  }
 0x2a7   :  { %1514 = dma.done.wait [#allocation3], 256  }
 0x2a8   :  { %1515 = vsyncadd [#allocation3], 4294967040 }
 0x2a9   :  { %1454 = vsyncpa [#allocation3], 1 }

</bundles_post_ra>
